<compile_context>
chip_gen: v7x
topology: tpu7x:2x2x1
jax: 0.10.0
libtpu: 0.0.40
codegen_flags: <defaults>
</compile_context>

<pallas_src>
import functools
from math import pi, log

import numpy as np
import jax
import jax.numpy as jnp
from jax import lax
from jax.experimental import pallas as pl
from jax.experimental.pallas import tpu as pltpu

_LOG2PI = float(log(2.0 * pi))


def _round_up(a, b):
    return (a + b - 1) // b * b


def _leaky(h):
    return jnp.where(h > 0, h, 0.01 * h)          # nn.LeakyReLU() default slope


def _dense(h, w_ref, b_ref, act):
    # bf16 MXU matmul with f32 accumulation; f32 epilogue (bias [+ LeakyReLU]).
    y = jnp.dot(h.astype(jnp.bfloat16), w_ref[...],
                preferred_element_type=jnp.float32) + b_ref[...]
    return _leaky(y) if act else y


# ---------------------------------------------------------------------------
# The single fused forward kernel
# ---------------------------------------------------------------------------
def _vae_dilo_fwd_kernel(
        # inputs ------------------------------------------------------------
        x_ref, noise_ref, inv_sigma_ref,
        qwz_w1, qwz_b1, qwz_w2, qwz_b2, qwz_w3, qwz_b3,
        qy_w1, qy_b1, qy_w2, qy_b2, qy_w3, qy_b3,
        px_w1, px_b1, px_w2, px_b2, px_w3, px_b3,
        pz_w1, pz_b1, pz_w2, pz_b2, pz_w3, pz_b3,
        # outputs -----------------------------------------------------------
        slab_ref, loss_ref,
        *, nw, nz, nclasses, batch, tb, slab_pad):
    f32 = jnp.float32
    nwz = nw + nz
    x = x_ref[...]                                            # (tb, nx) f32

    # ---- Qwz(x): 3-layer MLP (BN folded into W/b, LeakyReLU on hidden) -----
    h = _dense(x, qwz_w1, qwz_b1, True)
    h = _dense(h, qwz_w2, qwz_b2, True)
    wz = _dense(h, qwz_w3, qwz_b3, False)                     # (tb, 2*nwz)

    # Unflatten(1,(2,nw+nz)) flat layout: [mu_w | mu_z | raw_lv_w | raw_lv_z]
    mu = wz[:, :nwz]
    lv = jnp.tanh(wz[:, nwz:])
    sample = mu + noise_ref[...] * jnp.exp(0.5 * lv)          # [w | z] reparameterized
    w = sample[:, :nw]
    z = sample[:, nw:]
    mu_w, mu_z = mu[:, :nw], mu[:, nw:]
    logvar_w, logvar_z = lv[:, :nw], lv[:, nw:]

    # ---- Qy(cat([w, z])) + softmax + eps smoothing --------------------------
    h = _dense(sample, qy_w1, qy_b1, True)                    # single K=nw+nz dot
    h = _dense(h, qy_w2, qy_b2, True)
    logits = _dense(h, qy_w3, qy_b3, False)                   # (tb, nclasses)
    m = jnp.max(logits, axis=-1, keepdims=True)
    e = jnp.exp(logits - m)
    q_y = e * pl.reciprocal(jnp.sum(e, axis=-1, keepdims=True), approx=True)
    eps = 1e-6
    q_y = eps / nclasses + (1.0 - eps) * q_y

    # ---- Px(z): reconstruction ----------------------------------------------
    h = _dense(z, px_w1, px_b1, True)
    h = _dense(h, px_w2, px_b2, True)
    rec = _dense(h, px_w3, px_b3, False)                      # (tb, nx)

    # ---- Pz(w): per-class prior params, last layer pre-permuted to
    #      [all mu (nclasses*nz) | all logvar (nclasses*nz)] ------------------
    h = _dense(w, pz_w1, pz_b1, True)
    h = _dense(h, pz_w2, pz_b2, True)
    z_w = _dense(h, pz_w3, pz_b3, False)                      # (tb, 2*nclasses*nz)

    # ---- packed user-facing outputs: one lane-dense slab, one full store ----
    pieces = [wz, sample, q_y, rec]
    if slab_pad:
        pieces.append(jnp.zeros((tb, slab_pad), f32))
    slab_ref[...] = jnp.concatenate(pieces, axis=-1)          # (tb, slab_w)

    # ---- fused loss reductions (rows beyond the true batch are masked) ------
    row = pl.program_id(0) * tb + lax.broadcasted_iota(jnp.int32, (tb, 1), 0)
    valid = (row < batch).astype(f32)                         # (tb, 1)

    # -E_q[log N(x | rec, sigma_x)]: only the quadratic part here; the
    # logsigma/log(2*pi) constants are added in the wrapper (params-only).
    d = (x - rec) * inv_sigma_ref[...]
    nll_row = 0.5 * jnp.sum(d * d, axis=-1, keepdims=True)    # (tb, 1)

    # KL(q(w|x) || N(0, I))
    kldw_row = jnp.sum(
        -0.5 * (1.0 + logvar_w - mu_w * mu_w - jnp.exp(logvar_w)),
        axis=-1, keepdims=True)

    # sum_c q_y[:, c] * sum_d KL(q(z|x) || p(z|w, y=c)), vectorized over classes.
    # TODO(synk): assumes standard ut.kld2normal (KL between diagonal normals).
    cnz = nclasses * nz
    mu2 = z_w[:, :cnz]                                        # all mu, class-major
    lv2 = jnp.tanh(z_w[:, cnz:])                              # one tanh over slab
    e_neg_lv2 = jnp.exp(-lv2)                                 # one exp over slab
    mu_z_t = jnp.concatenate([mu_z] * nclasses, axis=-1)      # (tb, cnz)
    e_lvz_t = jnp.concatenate([jnp.exp(logvar_z)] * nclasses, axis=-1)
    dmu = mu2 - mu_z_t
    kld_part = lv2 + (e_lvz_t + dmu * dmu) * e_neg_lv2        # (tb, cnz)
    # per-class sums over nz via a block-diagonal 0/1 selector on the MXU
    r_i = lax.broadcasted_iota(jnp.int32, (cnz, nclasses), 0)
    c_i = lax.broadcasted_iota(jnp.int32, (cnz, nclasses), 1)
    sel = ((r_i >= c_i * nz) & (r_i < (c_i + 1) * nz)).astype(f32)
    sum_lvz = jnp.sum(logvar_z, axis=-1, keepdims=True)       # (tb, 1)
    kld_c = 0.5 * (jnp.dot(kld_part, sel, preferred_element_type=f32)
                   - (nz + sum_lvz))                          # (tb, nclasses)
    lz_row = jnp.sum(q_y * kld_c, axis=-1, keepdims=True)

    qymax_row = jnp.max(q_y, axis=-1, keepdims=True)

    s_rec = jnp.sum(valid * nll_row)
    s_w = jnp.sum(valid * kldw_row)
    s_z = jnp.sum(valid * lz_row)
    s_ymax = jnp.sum(valid * qymax_row)
    qy_sum = jnp.sum(valid * q_y, axis=0, keepdims=True)      # (1, nclasses)

    # Pack per-tile partial sums into one lane-dense 128-wide row:
    #   [0]=sum 0.5*d^2, [1]=sum KLD_w, [2]=sum loss_z, [3]=sum max(q_y),
    #   [4:4+nclasses]=column sums of q_y
    head = jnp.zeros((1, 4), f32)
    tail = jnp.zeros((1, 128 - 4 - nclasses), f32)
    packed = jnp.concatenate([head, qy_sum, tail], axis=-1)   # (1, 128)
    lane = lax.broadcasted_iota(jnp.int32, (1, 128), 1)
    packed = jnp.where(lane == 0, s_rec, packed)
    packed = jnp.where(lane == 1, s_w, packed)
    packed = jnp.where(lane == 2, s_z, packed)
    packed = jnp.where(lane == 3, s_ymax, packed)
    loss_ref[...] = packed


# ---------------------------------------------------------------------------
# Parameter construction (PyTorch-default-like init, BN folded, bf16 weights)
# ---------------------------------------------------------------------------
def _make_linear(key, fan_in, fan_out):
    kw, kb = jax.random.split(key)
    bound = 1.0 / np.sqrt(fan_in)
    W = jax.random.uniform(kw, (fan_in, fan_out), jnp.float32, -bound, bound)
    b = jax.random.uniform(kb, (fan_out,), jnp.float32, -bound, bound)
    return W, b


def _make_mlp(key, dims, out_perm=None):
    """Flat (W1, b1, ..., Wn, bn).  Hidden layers get BatchNorm1d(eval) with
    fresh running stats folded into W/b.  W stored bf16, b (1, n) f32.
    out_perm (optional) permutes the last layer's output columns."""
    n = len(dims) - 1
    keys = jax.random.split(key, n)
    flat = []
    for i in range(n):
        W, b = _make_linear(keys[i], dims[i], dims[i + 1])
        if i < n - 1:
            scale = 1.0 / np.sqrt(1.0 + 1e-5)   # gamma=1, beta=0, mean=0, var=1
            W = W * scale
            b = b * scale
        elif out_perm is not None:
            W = W[:, out_perm]
            b = b[out_perm]
        flat.append(W.astype(jnp.bfloat16))
        flat.append(b[None, :].astype(jnp.float32))
    return tuple(flat)


def init_params(key, nx, nh, nz, nw, nclasses):
    k1, k2, k3, k4 = jax.random.split(key, 4)
    # Pz last layer: reorder the per-class [mu_c | logvar_c] interleave into
    # contiguous [all mu | all logvar] slabs (kernel-side vectorized KL).
    idx = np.arange(nclasses * 2 * nz).reshape(nclasses, 2, nz)
    pz_perm = np.concatenate([idx[:, 0, :].reshape(-1), idx[:, 1, :].reshape(-1)])
    return {
        "logsigma_x": jnp.zeros((1, nx), jnp.float32),
        "Qwz": _make_mlp(k1, [nx, nh, nh, 2 * (nw + nz)]),
        "Qy": _make_mlp(k2, [nw + nz, nh, nh, nclasses]),
        "Px": _make_mlp(k3, [nz, nh, nh, nx]),
        "Pz": _make_mlp(k4, [nw, nh, nh, nclasses * 2 * nz], out_perm=pz_perm),
    }


# ---------------------------------------------------------------------------
# Tile-size selection
# ---------------------------------------------------------------------------
def _pick_tb(batch):
    br = _round_up(batch, 8)
    if br <= 8:
        return 8
    cap = 256                       # safe for v7x's 64 MiB VMEM
    try:                            # v5e/v6e (128 MiB VMEM): bigger tiles amortize per-step cost
        if pltpu.get_tpu_info().vmem_capacity_bytes >= (100 << 20):
            cap = 512
    except Exception:
        pass
    if br <= 2 * cap:
        return _round_up((br + 1) // 2, 8)   # exactly 2 tiles -> both v7x TCs busy
    return cap


# ---------------------------------------------------------------------------
# Forward wrapper (single pallas_call + tiny XLA glue)
# ---------------------------------------------------------------------------
def forward(params, x_img, key, *, nz, nw, nclasses):
    B = x_img.shape[0]
    x = x_img.reshape(B, -1).astype(jnp.float32)              # nn.Flatten()
    nx = x.shape[1]
    nwz = nw + nz
    assert nclasses + 4 <= 128

    noise = jax.random.normal(key, (B, nwz), jnp.float32)     # [noise_w | noise_z]

    # params-only precompute, hoisted out of the kernel.
    # TODO(synk): exact ut.softclip not shipped; smooth two-sided softplus clip used.
    t = params["logsigma_x"]
    logsig = -9.0 + jax.nn.softplus(t + 9.0) - jax.nn.softplus(t - 9.0)  # (1, nx)
    inv_sigma = jnp.exp(-logsig)
    nll_const = jnp.sum(logsig) + 0.5 * nx * _LOG2PI          # per-row constant

    tb = _pick_tb(B)
    Bp = _round_up(B, tb)
    num_tiles = Bp // tb
    if Bp != B:
        x_p = jnp.pad(x, ((0, Bp - B), (0, 0)))
        noise_p = jnp.pad(noise, ((0, Bp - B), (0, 0)))
    else:
        x_p, noise_p = x, noise

    slab_core = 3 * nwz + nclasses + nx                       # [wz | w,z | q_y | rec]
    slab_w = _round_up(slab_core, 128)
    slab_pad = slab_w - slab_core

    flat_inputs = [x_p, noise_p, inv_sigma]
    for name in ("Qwz", "Qy", "Px", "Pz"):
        flat_inputs.extend(params[name])

    def row_spec(n):
        return pl.BlockSpec((tb, n), lambda i: (i, 0))

    def resident_spec(shape):
        zero = (0,) * len(shape)
        return pl.BlockSpec(shape, lambda i, _z=zero: _z)     # constant block: stays in VMEM

    in_specs = [row_spec(nx), row_spec(nwz), resident_spec((1, nx))]
    in_specs += [resident_spec(a.shape) for a in flat_inputs[3:]]

    f32 = jnp.float32
    out_shape = (
        jax.ShapeDtypeStruct((Bp, slab_w), f32),              # packed output slab
        jax.ShapeDtypeStruct((num_tiles, 1, 128), f32),       # loss partial sums
    )
    out_specs = (
        row_spec(slab_w),
        pl.BlockSpec((None, 1, 128), lambda i: (i, 0, 0)),
    )

    kernel = functools.partial(_vae_dilo_fwd_kernel, nw=nw, nz=nz,
                               nclasses=nclasses, batch=B, tb=tb,
                               slab_pad=slab_pad)

    slab, loss_parts = pl.pallas_call(
        kernel,
        out_shape=out_shape,
        grid_spec=pltpu.PrefetchScalarGridSpec(
            num_scalar_prefetch=0,
            grid=(num_tiles,),
            in_specs=in_specs,
            out_specs=out_specs,
        ),
        compiler_params=pltpu.CompilerParams(
            dimension_semantics=("parallel",),
            vmem_limit_bytes=64 * 1024 * 1024,
        ),
    )(*flat_inputs)

    # ---- unpack the slab (cheap XLA slices / tanh on small arrays) ----------
    slab = slab[:B]
    wz_flat = slab[:, :2 * nwz]
    sample = slab[:, 2 * nwz:3 * nwz]
    q_y = slab[:, 3 * nwz:3 * nwz + nclasses]
    rec = slab[:, 3 * nwz + nclasses:slab_core]

    mu_w = wz_flat[:, :nw]
    mu_z = wz_flat[:, nw:nwz]
    logvar_w = jnp.tanh(wz_flat[:, nwz:nwz + nw])
    logvar_z = jnp.tanh(wz_flat[:, nwz + nw:])
    w = sample[:, :nw]
    z = sample[:, nw:]

    # ---- scalar glue on the in-kernel reductions -----------------------------
    parts = jnp.sum(loss_parts, axis=(0, 1))                  # (128,)
    inv_b = 1.0 / B
    loss_rec = parts[0] * inv_b + nll_const
    loss_w = parts[1] * inv_b
    loss_z = parts[2] * inv_b
    loss_y = -parts[3] * inv_b
    q_y_mean = parts[4:4 + nclasses] * inv_b
    lp_y = -jnp.log(jnp.float32(nclasses))                    # y_prior Cat(1/K) logits
    loss_l = jnp.sum(q_y_mean * (jnp.log(q_y_mean) - lp_y))
    total_loss = loss_rec + loss_z + loss_w + 10.0 * loss_l

    losses = {"rec": loss_rec, "loss_z": loss_z, "loss_l": loss_l,
              "loss_y": loss_y, "loss_w": loss_w, "total_loss": total_loss}
    output = {"wz": wz_flat.reshape(B, 2, nwz),
              "mu_w": mu_w, "logvar_w": logvar_w, "w": w,
              "mu_z": mu_z, "logvar_z": logvar_z, "z": z,
              "q_y": q_y, "rec": rec, "losses": losses}
    return output


# ---------------------------------------------------------------------------
if __name__ == "__main__":
    # small shapes consistent with the module (nx = C*H*W)
    B, C, H, W = 8, 1, 8, 8
    nx, nh, nz, nw, nclasses = C * H * W, 128, 32, 16, 8

    root = jax.random.PRNGKey(0)
    k_params, k_data, k_noise = jax.random.split(root, 3)

    params = init_params(k_params, nx, nh, nz, nw, nclasses)
    x_img = jax.random.normal(k_data, (B, C, H, W), jnp.float32)

    fwd = jax.jit(functools.partial(forward, nz=nz, nw=nw, nclasses=nclasses))
    out = fwd(params, x_img, k_noise)
    jax.block_until_ready(out["losses"]["total_loss"])

    assert out["rec"].shape == (B, nx)
    assert out["z"].shape == (B, nz)
    assert out["w"].shape == (B, nw)
    assert out["q_y"].shape == (B, nclasses)
    assert out["wz"].shape == (B, 2, nw + nz)
    assert np.isfinite(float(out["losses"]["total_loss"]))
    print("KERNEL_OK")
</pallas_src>

<mosaic_0001>
module attributes {stable_mosaic.version = 11 : i64} {
  func.func @_vae_dilo_fwd_kernel(%arg0: i32, %arg1: memref<8x64xf32, #tpu.memory_space<vmem>>, %arg2: memref<8x48xf32, #tpu.memory_space<vmem>>, %arg3: memref<1x64xf32, #tpu.memory_space<vmem>>, %arg4: memref<64x128xbf16, #tpu.memory_space<vmem>>, %arg5: memref<1x128xf32, #tpu.memory_space<vmem>>, %arg6: memref<128x128xbf16, #tpu.memory_space<vmem>>, %arg7: memref<1x128xf32, #tpu.memory_space<vmem>>, %arg8: memref<128x96xbf16, #tpu.memory_space<vmem>>, %arg9: memref<1x96xf32, #tpu.memory_space<vmem>>, %arg10: memref<48x128xbf16, #tpu.memory_space<vmem>>, %arg11: memref<1x128xf32, #tpu.memory_space<vmem>>, %arg12: memref<128x128xbf16, #tpu.memory_space<vmem>>, %arg13: memref<1x128xf32, #tpu.memory_space<vmem>>, %arg14: memref<128x8xbf16, #tpu.memory_space<vmem>>, %arg15: memref<1x8xf32, #tpu.memory_space<vmem>>, %arg16: memref<32x128xbf16, #tpu.memory_space<vmem>>, %arg17: memref<1x128xf32, #tpu.memory_space<vmem>>, %arg18: memref<128x128xbf16, #tpu.memory_space<vmem>>, %arg19: memref<1x128xf32, #tpu.memory_space<vmem>>, %arg20: memref<128x64xbf16, #tpu.memory_space<vmem>>, %arg21: memref<1x64xf32, #tpu.memory_space<vmem>>, %arg22: memref<16x128xbf16, #tpu.memory_space<vmem>>, %arg23: memref<1x128xf32, #tpu.memory_space<vmem>>, %arg24: memref<128x128xbf16, #tpu.memory_space<vmem>>, %arg25: memref<1x128xf32, #tpu.memory_space<vmem>>, %arg26: memref<128x512xbf16, #tpu.memory_space<vmem>>, %arg27: memref<1x512xf32, #tpu.memory_space<vmem>>, %arg28: memref<8x256xf32, #tpu.memory_space<vmem>>, %arg29: memref<1x1x128xf32, #tpu.memory_space<vmem>>) attributes {dimension_semantics = [#tpu.dimension_semantics<parallel>], iteration_bounds = array<i64: 1>, scalar_prefetch = 0 : i64, scratch_operands = 0 : i64, tpu.core_type = #tpu.core_type<tc>, window_params = [{transform_indices = @transform_0, window_bounds = array<i64: 8, 64>}, {transform_indices = @transform_1, window_bounds = array<i64: 8, 48>}, {pipeline_mode = #tpu.pipeline_mode<synchronous>, transform_indices = @transform_2, window_bounds = array<i64: 1, 64>}, {pipeline_mode = #tpu.pipeline_mode<synchronous>, transform_indices = @transform_3, window_bounds = array<i64: 64, 128>}, {pipeline_mode = #tpu.pipeline_mode<synchronous>, transform_indices = @transform_4, window_bounds = array<i64: 1, 128>}, {pipeline_mode = #tpu.pipeline_mode<synchronous>, transform_indices = @transform_5, window_bounds = array<i64: 128, 128>}, {pipeline_mode = #tpu.pipeline_mode<synchronous>, transform_indices = @transform_6, window_bounds = array<i64: 1, 128>}, {pipeline_mode = #tpu.pipeline_mode<synchronous>, transform_indices = @transform_7, window_bounds = array<i64: 128, 96>}, {pipeline_mode = #tpu.pipeline_mode<synchronous>, transform_indices = @transform_8, window_bounds = array<i64: 1, 96>}, {pipeline_mode = #tpu.pipeline_mode<synchronous>, transform_indices = @transform_9, window_bounds = array<i64: 48, 128>}, {pipeline_mode = #tpu.pipeline_mode<synchronous>, transform_indices = @transform_10, window_bounds = array<i64: 1, 128>}, {pipeline_mode = #tpu.pipeline_mode<synchronous>, transform_indices = @transform_11, window_bounds = array<i64: 128, 128>}, {pipeline_mode = #tpu.pipeline_mode<synchronous>, transform_indices = @transform_12, window_bounds = array<i64: 1, 128>}, {pipeline_mode = #tpu.pipeline_mode<synchronous>, transform_indices = @transform_13, window_bounds = array<i64: 128, 8>}, {pipeline_mode = #tpu.pipeline_mode<synchronous>, transform_indices = @transform_14, window_bounds = array<i64: 1, 8>}, {pipeline_mode = #tpu.pipeline_mode<synchronous>, transform_indices = @transform_15, window_bounds = array<i64: 32, 128>}, {pipeline_mode = #tpu.pipeline_mode<synchronous>, transform_indices = @transform_16, window_bounds = array<i64: 1, 128>}, {pipeline_mode = #tpu.pipeline_mode<synchronous>, transform_indices = @transform_17, window_bounds = array<i64: 128, 128>}, {pipeline_mode = #tpu.pipeline_mode<synchronous>, transform_indices = @transform_18, window_bounds = array<i64: 1, 128>}, {pipeline_mode = #tpu.pipeline_mode<synchronous>, transform_indices = @transform_19, window_bounds = array<i64: 128, 64>}, {pipeline_mode = #tpu.pipeline_mode<synchronous>, transform_indices = @transform_20, window_bounds = array<i64: 1, 64>}, {pipeline_mode = #tpu.pipeline_mode<synchronous>, transform_indices = @transform_21, window_bounds = array<i64: 16, 128>}, {pipeline_mode = #tpu.pipeline_mode<synchronous>, transform_indices = @transform_22, window_bounds = array<i64: 1, 128>}, {pipeline_mode = #tpu.pipeline_mode<synchronous>, transform_indices = @transform_23, window_bounds = array<i64: 128, 128>}, {pipeline_mode = #tpu.pipeline_mode<synchronous>, transform_indices = @transform_24, window_bounds = array<i64: 1, 128>}, {pipeline_mode = #tpu.pipeline_mode<synchronous>, transform_indices = @transform_25, window_bounds = array<i64: 128, 512>}, {pipeline_mode = #tpu.pipeline_mode<synchronous>, transform_indices = @transform_26, window_bounds = array<i64: 1, 512>}, {transform_indices = @transform_27, window_bounds = array<i64: 8, 256>}, {transform_indices = @transform_28, window_bounds = array<i64: 1, 1, 128>}]} {
    %c0 = arith.constant 0 : index
    %c0_0 = arith.constant 0 : index
    %0 = vector.load %arg1[%c0, %c0_0] : memref<8x64xf32, #tpu.memory_space<vmem>>, vector<8x64xf32>
    %1 = arith.truncf %0 : vector<8x64xf32> to vector<8x64xbf16>
    %c0_1 = arith.constant 0 : index
    %c0_2 = arith.constant 0 : index
    %2 = vector.load %arg4[%c0_1, %c0_2] : memref<64x128xbf16, #tpu.memory_space<vmem>>, vector<64x128xbf16>
    %cst = arith.constant dense<0.000000e+00> : vector<8x128xf32>
    %3 = tpu.matmul %1, %2, %cst {dimension_numbers = #tpu.dot_dimension_numbers<[1], [0], [0], [1], [0, 0, 1, 1], [], []>} : vector<8x64xbf16>, vector<64x128xbf16>, vector<8x128xf32> -> vector<8x128xf32>
    %c0_3 = arith.constant 0 : index
    %c0_4 = arith.constant 0 : index
    %4 = vector.load %arg5[%c0_3, %c0_4] : memref<1x128xf32, #tpu.memory_space<vmem>>, vector<1x128xf32>
    %5 = vector.broadcast %4 : vector<1x128xf32> to vector<8x128xf32>
    %6 = arith.addf %3, %5 : vector<8x128xf32>
    %cst_5 = arith.constant 0.000000e+00 : f32
    %7 = vector.broadcast %cst_5 : f32 to vector<8x128xf32>
    %8 = arith.cmpf ogt, %6, %7 : vector<8x128xf32>
    %cst_6 = arith.constant 0.00999999977 : f32
    %9 = vector.broadcast %cst_6 : f32 to vector<8x128xf32>
    %10 = arith.mulf %9, %6 : vector<8x128xf32>
    %11 = arith.select %8, %6, %10 : vector<8x128xi1>, vector<8x128xf32>
    %12 = arith.truncf %11 : vector<8x128xf32> to vector<8x128xbf16>
    %c0_7 = arith.constant 0 : index
    %c0_8 = arith.constant 0 : index
    %13 = vector.load %arg6[%c0_7, %c0_8] : memref<128x128xbf16, #tpu.memory_space<vmem>>, vector<128x128xbf16>
    %cst_9 = arith.constant dense<0.000000e+00> : vector<8x128xf32>
    %14 = tpu.matmul %12, %13, %cst_9 {dimension_numbers = #tpu.dot_dimension_numbers<[1], [0], [0], [1], [0, 0, 1, 1], [], []>} : vector<8x128xbf16>, vector<128x128xbf16>, vector<8x128xf32> -> vector<8x128xf32>
    %c0_10 = arith.constant 0 : index
    %c0_11 = arith.constant 0 : index
    %15 = vector.load %arg7[%c0_10, %c0_11] : memref<1x128xf32, #tpu.memory_space<vmem>>, vector<1x128xf32>
    %16 = vector.broadcast %15 : vector<1x128xf32> to vector<8x128xf32>
    %17 = arith.addf %14, %16 : vector<8x128xf32>
    %cst_12 = arith.constant 0.000000e+00 : f32
    %18 = vector.broadcast %cst_12 : f32 to vector<8x128xf32>
    %19 = arith.cmpf ogt, %17, %18 : vector<8x128xf32>
    %cst_13 = arith.constant 0.00999999977 : f32
    %20 = vector.broadcast %cst_13 : f32 to vector<8x128xf32>
    %21 = arith.mulf %20, %17 : vector<8x128xf32>
    %22 = arith.select %19, %17, %21 : vector<8x128xi1>, vector<8x128xf32>
    %23 = arith.truncf %22 : vector<8x128xf32> to vector<8x128xbf16>
    %c0_14 = arith.constant 0 : index
    %c0_15 = arith.constant 0 : index
    %24 = vector.load %arg8[%c0_14, %c0_15] : memref<128x96xbf16, #tpu.memory_space<vmem>>, vector<128x96xbf16>
    %cst_16 = arith.constant dense<0.000000e+00> : vector<8x96xf32>
    %25 = tpu.matmul %23, %24, %cst_16 {dimension_numbers = #tpu.dot_dimension_numbers<[1], [0], [0], [1], [0, 0, 1, 1], [], []>} : vector<8x128xbf16>, vector<128x96xbf16>, vector<8x96xf32> -> vector<8x96xf32>
    %c0_17 = arith.constant 0 : index
    %c0_18 = arith.constant 0 : index
    %26 = vector.load %arg9[%c0_17, %c0_18] : memref<1x96xf32, #tpu.memory_space<vmem>>, vector<1x96xf32>
    %27 = vector.broadcast %26 : vector<1x96xf32> to vector<8x96xf32>
    %28 = arith.addf %25, %27 : vector<8x96xf32>
    %29 = vector.extract_strided_slice %28 {offsets = [0, 0], sizes = [8, 48], strides = [1, 1]} : vector<8x96xf32> to vector<8x48xf32>
    %30 = vector.extract_strided_slice %28 {offsets = [0, 48], sizes = [8, 48], strides = [1, 1]} : vector<8x96xf32> to vector<8x48xf32>
    %31 = math.tanh %30 : vector<8x48xf32>
    %c0_19 = arith.constant 0 : index
    %c0_20 = arith.constant 0 : index
    %32 = vector.load %arg2[%c0_19, %c0_20] : memref<8x48xf32, #tpu.memory_space<vmem>>, vector<8x48xf32>
    %cst_21 = arith.constant 5.000000e-01 : f32
    %33 = vector.broadcast %cst_21 : f32 to vector<8x48xf32>
    %34 = arith.mulf %33, %31 : vector<8x48xf32>
    %35 = math.exp %34 : vector<8x48xf32>
    %36 = arith.mulf %32, %35 : vector<8x48xf32>
    %37 = arith.addf %29, %36 : vector<8x48xf32>
    %38 = vector.extract_strided_slice %37 {offsets = [0, 0], sizes = [8, 16], strides = [1, 1]} : vector<8x48xf32> to vector<8x16xf32>
    %39 = vector.extract_strided_slice %37 {offsets = [0, 16], sizes = [8, 32], strides = [1, 1]} : vector<8x48xf32> to vector<8x32xf32>
    %40 = vector.extract_strided_slice %29 {offsets = [0, 0], sizes = [8, 16], strides = [1, 1]} : vector<8x48xf32> to vector<8x16xf32>
    %41 = vector.extract_strided_slice %29 {offsets = [0, 16], sizes = [8, 32], strides = [1, 1]} : vector<8x48xf32> to vector<8x32xf32>
    %42 = vector.extract_strided_slice %31 {offsets = [0, 0], sizes = [8, 16], strides = [1, 1]} : vector<8x48xf32> to vector<8x16xf32>
    %43 = vector.extract_strided_slice %31 {offsets = [0, 16], sizes = [8, 32], strides = [1, 1]} : vector<8x48xf32> to vector<8x32xf32>
    %44 = arith.truncf %37 : vector<8x48xf32> to vector<8x48xbf16>
    %c0_22 = arith.constant 0 : index
    %c0_23 = arith.constant 0 : index
    %45 = vector.load %arg10[%c0_22, %c0_23] : memref<48x128xbf16, #tpu.memory_space<vmem>>, vector<48x128xbf16>
    %cst_24 = arith.constant dense<0.000000e+00> : vector<8x128xf32>
    %46 = tpu.matmul %44, %45, %cst_24 {dimension_numbers = #tpu.dot_dimension_numbers<[1], [0], [0], [1], [0, 0, 1, 1], [], []>} : vector<8x48xbf16>, vector<48x128xbf16>, vector<8x128xf32> -> vector<8x128xf32>
    %c0_25 = arith.constant 0 : index
    %c0_26 = arith.constant 0 : index
    %47 = vector.load %arg11[%c0_25, %c0_26] : memref<1x128xf32, #tpu.memory_space<vmem>>, vector<1x128xf32>
    %48 = vector.broadcast %47 : vector<1x128xf32> to vector<8x128xf32>
    %49 = arith.addf %46, %48 : vector<8x128xf32>
    %cst_27 = arith.constant 0.000000e+00 : f32
    %50 = vector.broadcast %cst_27 : f32 to vector<8x128xf32>
    %51 = arith.cmpf ogt, %49, %50 : vector<8x128xf32>
    %cst_28 = arith.constant 0.00999999977 : f32
    %52 = vector.broadcast %cst_28 : f32 to vector<8x128xf32>
    %53 = arith.mulf %52, %49 : vector<8x128xf32>
    %54 = arith.select %51, %49, %53 : vector<8x128xi1>, vector<8x128xf32>
    %55 = arith.truncf %54 : vector<8x128xf32> to vector<8x128xbf16>
    %c0_29 = arith.constant 0 : index
    %c0_30 = arith.constant 0 : index
    %56 = vector.load %arg12[%c0_29, %c0_30] : memref<128x128xbf16, #tpu.memory_space<vmem>>, vector<128x128xbf16>
    %cst_31 = arith.constant dense<0.000000e+00> : vector<8x128xf32>
    %57 = tpu.matmul %55, %56, %cst_31 {dimension_numbers = #tpu.dot_dimension_numbers<[1], [0], [0], [1], [0, 0, 1, 1], [], []>} : vector<8x128xbf16>, vector<128x128xbf16>, vector<8x128xf32> -> vector<8x128xf32>
    %c0_32 = arith.constant 0 : index
    %c0_33 = arith.constant 0 : index
    %58 = vector.load %arg13[%c0_32, %c0_33] : memref<1x128xf32, #tpu.memory_space<vmem>>, vector<1x128xf32>
    %59 = vector.broadcast %58 : vector<1x128xf32> to vector<8x128xf32>
    %60 = arith.addf %57, %59 : vector<8x128xf32>
    %cst_34 = arith.constant 0.000000e+00 : f32
    %61 = vector.broadcast %cst_34 : f32 to vector<8x128xf32>
    %62 = arith.cmpf ogt, %60, %61 : vector<8x128xf32>
    %cst_35 = arith.constant 0.00999999977 : f32
    %63 = vector.broadcast %cst_35 : f32 to vector<8x128xf32>
    %64 = arith.mulf %63, %60 : vector<8x128xf32>
    %65 = arith.select %62, %60, %64 : vector<8x128xi1>, vector<8x128xf32>
    %66 = arith.truncf %65 : vector<8x128xf32> to vector<8x128xbf16>
    %c0_36 = arith.constant 0 : index
    %c0_37 = arith.constant 0 : index
    %67 = vector.load %arg14[%c0_36, %c0_37] : memref<128x8xbf16, #tpu.memory_space<vmem>>, vector<128x8xbf16>
    %cst_38 = arith.constant dense<0.000000e+00> : vector<8x8xf32>
    %68 = tpu.matmul %66, %67, %cst_38 {dimension_numbers = #tpu.dot_dimension_numbers<[1], [0], [0], [1], [0, 0, 1, 1], [], []>} : vector<8x128xbf16>, vector<128x8xbf16>, vector<8x8xf32> -> vector<8x8xf32>
    %c0_39 = arith.constant 0 : index
    %c0_40 = arith.constant 0 : index
    %69 = vector.load %arg15[%c0_39, %c0_40] : memref<1x8xf32, #tpu.memory_space<vmem>>, vector<1x8xf32>
    %70 = vector.broadcast %69 : vector<1x8xf32> to vector<8x8xf32>
    %71 = arith.addf %68, %70 : vector<8x8xf32>
    %cst_41 = arith.constant dense<0xFF800000> : vector<8xf32>
    %72 = vector.multi_reduction <maximumf>, %71, %cst_41 [1] : vector<8x8xf32> to vector<8xf32>
    %73 = vector.shape_cast %72 : vector<8xf32> to vector<8x1xf32>
    %74 = vector.broadcast %73 : vector<8x1xf32> to vector<8x8xf32>
    %75 = arith.subf %71, %74 : vector<8x8xf32>
    %76 = math.exp %75 : vector<8x8xf32>
    %cst_42 = arith.constant dense<0.000000e+00> : vector<8xf32>
    %77 = vector.multi_reduction <add>, %76, %cst_42 [1] : vector<8x8xf32> to vector<8xf32>
    %78 = vector.shape_cast %77 : vector<8xf32> to vector<8x1xf32>
    %79 = tpu.reciprocal %78 {approx = true} : vector<8x1xf32> -> vector<8x1xf32>
    %80 = vector.broadcast %79 : vector<8x1xf32> to vector<8x8xf32>
    %81 = arith.mulf %76, %80 : vector<8x8xf32>
    %cst_43 = arith.constant 0.999998986 : f32
    %82 = vector.broadcast %cst_43 : f32 to vector<8x8xf32>
    %83 = arith.mulf %82, %81 : vector<8x8xf32>
    %cst_44 = arith.constant 1.250000e-07 : f32
    %84 = vector.broadcast %cst_44 : f32 to vector<8x8xf32>
    %85 = arith.addf %84, %83 : vector<8x8xf32>
    %86 = arith.truncf %39 : vector<8x32xf32> to vector<8x32xbf16>
    %c0_45 = arith.constant 0 : index
    %c0_46 = arith.constant 0 : index
    %87 = vector.load %arg16[%c0_45, %c0_46] : memref<32x128xbf16, #tpu.memory_space<vmem>>, vector<32x128xbf16>
    %cst_47 = arith.constant dense<0.000000e+00> : vector<8x128xf32>
    %88 = tpu.matmul %86, %87, %cst_47 {dimension_numbers = #tpu.dot_dimension_numbers<[1], [0], [0], [1], [0, 0, 1, 1], [], []>} : vector<8x32xbf16>, vector<32x128xbf16>, vector<8x128xf32> -> vector<8x128xf32>
    %c0_48 = arith.constant 0 : index
    %c0_49 = arith.constant 0 : index
    %89 = vector.load %arg17[%c0_48, %c0_49] : memref<1x128xf32, #tpu.memory_space<vmem>>, vector<1x128xf32>
    %90 = vector.broadcast %89 : vector<1x128xf32> to vector<8x128xf32>
    %91 = arith.addf %88, %90 : vector<8x128xf32>
    %cst_50 = arith.constant 0.000000e+00 : f32
    %92 = vector.broadcast %cst_50 : f32 to vector<8x128xf32>
    %93 = arith.cmpf ogt, %91, %92 : vector<8x128xf32>
    %cst_51 = arith.constant 0.00999999977 : f32
    %94 = vector.broadcast %cst_51 : f32 to vector<8x128xf32>
    %95 = arith.mulf %94, %91 : vector<8x128xf32>
    %96 = arith.select %93, %91, %95 : vector<8x128xi1>, vector<8x128xf32>
    %97 = arith.truncf %96 : vector<8x128xf32> to vector<8x128xbf16>
    %c0_52 = arith.constant 0 : index
    %c0_53 = arith.constant 0 : index
    %98 = vector.load %arg18[%c0_52, %c0_53] : memref<128x128xbf16, #tpu.memory_space<vmem>>, vector<128x128xbf16>
    %cst_54 = arith.constant dense<0.000000e+00> : vector<8x128xf32>
    %99 = tpu.matmul %97, %98, %cst_54 {dimension_numbers = #tpu.dot_dimension_numbers<[1], [0], [0], [1], [0, 0, 1, 1], [], []>} : vector<8x128xbf16>, vector<128x128xbf16>, vector<8x128xf32> -> vector<8x128xf32>
    %c0_55 = arith.constant 0 : index
    %c0_56 = arith.constant 0 : index
    %100 = vector.load %arg19[%c0_55, %c0_56] : memref<1x128xf32, #tpu.memory_space<vmem>>, vector<1x128xf32>
    %101 = vector.broadcast %100 : vector<1x128xf32> to vector<8x128xf32>
    %102 = arith.addf %99, %101 : vector<8x128xf32>
    %cst_57 = arith.constant 0.000000e+00 : f32
    %103 = vector.broadcast %cst_57 : f32 to vector<8x128xf32>
    %104 = arith.cmpf ogt, %102, %103 : vector<8x128xf32>
    %cst_58 = arith.constant 0.00999999977 : f32
    %105 = vector.broadcast %cst_58 : f32 to vector<8x128xf32>
    %106 = arith.mulf %105, %102 : vector<8x128xf32>
    %107 = arith.select %104, %102, %106 : vector<8x128xi1>, vector<8x128xf32>
    %108 = arith.truncf %107 : vector<8x128xf32> to vector<8x128xbf16>
    %c0_59 = arith.constant 0 : index
    %c0_60 = arith.constant 0 : index
    %109 = vector.load %arg20[%c0_59, %c0_60] : memref<128x64xbf16, #tpu.memory_space<vmem>>, vector<128x64xbf16>
    %cst_61 = arith.constant dense<0.000000e+00> : vector<8x64xf32>
    %110 = tpu.matmul %108, %109, %cst_61 {dimension_numbers = #tpu.dot_dimension_numbers<[1], [0], [0], [1], [0, 0, 1, 1], [], []>} : vector<8x128xbf16>, vector<128x64xbf16>, vector<8x64xf32> -> vector<8x64xf32>
    %c0_62 = arith.constant 0 : index
    %c0_63 = arith.constant 0 : index
    %111 = vector.load %arg21[%c0_62, %c0_63] : memref<1x64xf32, #tpu.memory_space<vmem>>, vector<1x64xf32>
    %112 = vector.broadcast %111 : vector<1x64xf32> to vector<8x64xf32>
    %113 = arith.addf %110, %112 : vector<8x64xf32>
    %114 = arith.truncf %38 : vector<8x16xf32> to vector<8x16xbf16>
    %c0_64 = arith.constant 0 : index
    %c0_65 = arith.constant 0 : index
    %115 = vector.load %arg22[%c0_64, %c0_65] : memref<16x128xbf16, #tpu.memory_space<vmem>>, vector<16x128xbf16>
    %cst_66 = arith.constant dense<0.000000e+00> : vector<8x128xf32>
    %116 = tpu.matmul %114, %115, %cst_66 {dimension_numbers = #tpu.dot_dimension_numbers<[1], [0], [0], [1], [0, 0, 1, 1], [], []>} : vector<8x16xbf16>, vector<16x128xbf16>, vector<8x128xf32> -> vector<8x128xf32>
    %c0_67 = arith.constant 0 : index
    %c0_68 = arith.constant 0 : index
    %117 = vector.load %arg23[%c0_67, %c0_68] : memref<1x128xf32, #tpu.memory_space<vmem>>, vector<1x128xf32>
    %118 = vector.broadcast %117 : vector<1x128xf32> to vector<8x128xf32>
    %119 = arith.addf %116, %118 : vector<8x128xf32>
    %cst_69 = arith.constant 0.000000e+00 : f32
    %120 = vector.broadcast %cst_69 : f32 to vector<8x128xf32>
    %121 = arith.cmpf ogt, %119, %120 : vector<8x128xf32>
    %cst_70 = arith.constant 0.00999999977 : f32
    %122 = vector.broadcast %cst_70 : f32 to vector<8x128xf32>
    %123 = arith.mulf %122, %119 : vector<8x128xf32>
    %124 = arith.select %121, %119, %123 : vector<8x128xi1>, vector<8x128xf32>
    %125 = arith.truncf %124 : vector<8x128xf32> to vector<8x128xbf16>
    %c0_71 = arith.constant 0 : index
    %c0_72 = arith.constant 0 : index
    %126 = vector.load %arg24[%c0_71, %c0_72] : memref<128x128xbf16, #tpu.memory_space<vmem>>, vector<128x128xbf16>
    %cst_73 = arith.constant dense<0.000000e+00> : vector<8x128xf32>
    %127 = tpu.matmul %125, %126, %cst_73 {dimension_numbers = #tpu.dot_dimension_numbers<[1], [0], [0], [1], [0, 0, 1, 1], [], []>} : vector<8x128xbf16>, vector<128x128xbf16>, vector<8x128xf32> -> vector<8x128xf32>
    %c0_74 = arith.constant 0 : index
    %c0_75 = arith.constant 0 : index
    %128 = vector.load %arg25[%c0_74, %c0_75] : memref<1x128xf32, #tpu.memory_space<vmem>>, vector<1x128xf32>
    %129 = vector.broadcast %128 : vector<1x128xf32> to vector<8x128xf32>
    %130 = arith.addf %127, %129 : vector<8x128xf32>
    %cst_76 = arith.constant 0.000000e+00 : f32
    %131 = vector.broadcast %cst_76 : f32 to vector<8x128xf32>
    %132 = arith.cmpf ogt, %130, %131 : vector<8x128xf32>
    %cst_77 = arith.constant 0.00999999977 : f32
    %133 = vector.broadcast %cst_77 : f32 to vector<8x128xf32>
    %134 = arith.mulf %133, %130 : vector<8x128xf32>
    %135 = arith.select %132, %130, %134 : vector<8x128xi1>, vector<8x128xf32>
    %136 = arith.truncf %135 : vector<8x128xf32> to vector<8x128xbf16>
    %c0_78 = arith.constant 0 : index
    %c0_79 = arith.constant 0 : index
    %137 = vector.load %arg26[%c0_78, %c0_79] : memref<128x512xbf16, #tpu.memory_space<vmem>>, vector<128x512xbf16>
    %cst_80 = arith.constant dense<0.000000e+00> : vector<8x512xf32>
    %138 = tpu.matmul %136, %137, %cst_80 {dimension_numbers = #tpu.dot_dimension_numbers<[1], [0], [0], [1], [0, 0, 1, 1], [], []>} : vector<8x128xbf16>, vector<128x512xbf16>, vector<8x512xf32> -> vector<8x512xf32>
    %c0_81 = arith.constant 0 : index
    %c0_82 = arith.constant 0 : index
    %139 = vector.load %arg27[%c0_81, %c0_82] : memref<1x512xf32, #tpu.memory_space<vmem>>, vector<1x512xf32>
    %140 = vector.broadcast %139 : vector<1x512xf32> to vector<8x512xf32>
    %141 = arith.addf %138, %140 : vector<8x512xf32>
    %cst_83 = arith.constant 0.000000e+00 : f32
    %142 = vector.broadcast %cst_83 : f32 to vector<8x40xf32>
    %143 = tpu.concatenate %28, %37, %85, %113, %142 in 1 : vector<8x96xf32>, vector<8x48xf32>, vector<8x8xf32>, vector<8x64xf32>, vector<8x40xf32> -> vector<8x256xf32>
    %c0_84 = arith.constant 0 : index
    %c0_85 = arith.constant 0 : index
    %144 = vector.load %arg28[%c0_84, %c0_85] : memref<8x256xf32, #tpu.memory_space<vmem>>, vector<8x256xf32>
    tpu.vector_store %arg28[%c0_84, %c0_85], %143 {strides = array<i32>} : memref<8x256xf32, #tpu.memory_space<vmem>>, vector<8x256xf32>,
    %c8_i32 = arith.constant 8 : i32
    %145 = arith.muli %arg0, %c8_i32 : i32
    %146 = tpu.iota {dimensions = array<i32: 0>} : vector<8x1xi32>
    %147 = vector.broadcast %145 : i32 to vector<8x1xi32>
    %148 = arith.addi %147, %146 : vector<8x1xi32>
    %c8_i32_86 = arith.constant 8 : i32
    %149 = vector.broadcast %c8_i32_86 : i32 to vector<8x1xi32>
    %150 = arith.cmpi slt, %148, %149 : vector<8x1xi32>
    %151 = arith.extui %150 : vector<8x1xi1> to vector<8x1xi32>
    %152 = arith.sitofp %151 : vector<8x1xi32> to vector<8x1xf32>
    %153 = arith.subf %0, %113 : vector<8x64xf32>
    %c0_87 = arith.constant 0 : index
    %c0_88 = arith.constant 0 : index
    %154 = vector.load %arg3[%c0_87, %c0_88] : memref<1x64xf32, #tpu.memory_space<vmem>>, vector<1x64xf32>
    %155 = vector.broadcast %154 : vector<1x64xf32> to vector<8x64xf32>
    %156 = arith.mulf %153, %155 : vector<8x64xf32>
    %157 = arith.mulf %156, %156 : vector<8x64xf32>
    %cst_89 = arith.constant dense<0.000000e+00> : vector<8xf32>
    %158 = vector.multi_reduction <add>, %157, %cst_89 [1] : vector<8x64xf32> to vector<8xf32>
    %159 = vector.shape_cast %158 : vector<8xf32> to vector<8x1xf32>
    %cst_90 = arith.constant 5.000000e-01 : f32
    %160 = vector.broadcast %cst_90 : f32 to vector<8x1xf32>
    %161 = arith.mulf %160, %159 : vector<8x1xf32>
    %cst_91 = arith.constant 1.000000e+00 : f32
    %162 = vector.broadcast %cst_91 : f32 to vector<8x16xf32>
    %163 = arith.addf %162, %42 : vector<8x16xf32>
    %164 = arith.mulf %40, %40 : vector<8x16xf32>
    %165 = arith.subf %163, %164 : vector<8x16xf32>
    %166 = math.exp %42 : vector<8x16xf32>
    %167 = arith.subf %165, %166 : vector<8x16xf32>
    %cst_92 = arith.constant -5.000000e-01 : f32
    %168 = vector.broadcast %cst_92 : f32 to vector<8x16xf32>
    %169 = arith.mulf %168, %167 : vector<8x16xf32>
    %cst_93 = arith.constant dense<0.000000e+00> : vector<8xf32>
    %170 = vector.multi_reduction <add>, %169, %cst_93 [1] : vector<8x16xf32> to vector<8xf32>
    %171 = vector.shape_cast %170 : vector<8xf32> to vector<8x1xf32>
    %172 = vector.extract_strided_slice %141 {offsets = [0, 0], sizes = [8, 256], strides = [1, 1]} : vector<8x512xf32> to vector<8x256xf32>
    %173 = vector.extract_strided_slice %141 {offsets = [0, 256], sizes = [8, 256], strides = [1, 1]} : vector<8x512xf32> to vector<8x256xf32>
    %174 = math.tanh %173 : vector<8x256xf32>
    %cst_94 = arith.constant 0.000000e+00 : f32
    %175 = vector.broadcast %cst_94 : f32 to vector<8x256xf32>
    %176 = arith.subf %175, %174 : vector<8x256xf32>
    %177 = math.exp %176 : vector<8x256xf32>
    %178 = tpu.concatenate %41, %41, %41, %41, %41, %41, %41, %41 in 1 : vector<8x32xf32>, vector<8x32xf32>, vector<8x32xf32>, vector<8x32xf32>, vector<8x32xf32>, vector<8x32xf32>, vector<8x32xf32>, vector<8x32xf32> -> vector<8x256xf32>
    %179 = math.exp %43 : vector<8x32xf32>
    %180 = tpu.concatenate %179, %179, %179, %179, %179, %179, %179, %179 in 1 : vector<8x32xf32>, vector<8x32xf32>, vector<8x32xf32>, vector<8x32xf32>, vector<8x32xf32>, vector<8x32xf32>, vector<8x32xf32>, vector<8x32xf32> -> vector<8x256xf32>
    %181 = arith.subf %172, %178 : vector<8x256xf32>
    %182 = arith.mulf %181, %181 : vector<8x256xf32>
    %183 = arith.addf %180, %182 : vector<8x256xf32>
    %184 = arith.mulf %183, %177 : vector<8x256xf32>
    %185 = arith.addf %174, %184 : vector<8x256xf32>
    %186 = tpu.iota {dimensions = array<i32: 0>} : vector<256x8xi32>
    %187 = tpu.iota {dimensions = array<i32: 1>} : vector<256x8xi32>
    %c32_i32 = arith.constant 32 : i32
    %188 = vector.broadcast %c32_i32 : i32 to vector<256x8xi32>
    %189 = arith.muli %187, %188 : vector<256x8xi32>
    %190 = arith.cmpi sge, %186, %189 : vector<256x8xi32>
    %c1_i32 = arith.constant 1 : i32
    %191 = vector.broadcast %c1_i32 : i32 to vector<256x8xi32>
    %192 = arith.addi %187, %191 : vector<256x8xi32>
    %c32_i32_95 = arith.constant 32 : i32
    %193 = vector.broadcast %c32_i32_95 : i32 to vector<256x8xi32>
    %194 = arith.muli %192, %193 : vector<256x8xi32>
    %195 = arith.cmpi slt, %186, %194 : vector<256x8xi32>
    %196 = arith.andi %190, %195 : vector<256x8xi1>
    %197 = arith.extui %196 : vector<256x8xi1> to vector<256x8xi32>
    %198 = arith.sitofp %197 : vector<256x8xi32> to vector<256x8xf32>
    %cst_96 = arith.constant dense<0.000000e+00> : vector<8xf32>
    %199 = vector.multi_reduction <add>, %43, %cst_96 [1] : vector<8x32xf32> to vector<8xf32>
    %200 = vector.shape_cast %199 : vector<8xf32> to vector<8x1xf32>
    %cst_97 = arith.constant dense<0.000000e+00> : vector<8x8xf32>
    %201 = tpu.matmul %185, %198, %cst_97 {dimension_numbers = #tpu.dot_dimension_numbers<[1], [0], [0], [1], [0, 0, 1, 1], [], []>} : vector<8x256xf32>, vector<256x8xf32>, vector<8x8xf32> -> vector<8x8xf32>
    %cst_98 = arith.constant 3.200000e+01 : f32
    %202 = vector.broadcast %cst_98 : f32 to vector<8x1xf32>
    %203 = arith.addf %202, %200 : vector<8x1xf32>
    %204 = vector.broadcast %203 : vector<8x1xf32> to vector<8x8xf32>
    %205 = arith.subf %201, %204 : vector<8x8xf32>
    %cst_99 = arith.constant 5.000000e-01 : f32
    %206 = vector.broadcast %cst_99 : f32 to vector<8x8xf32>
    %207 = arith.mulf %206, %205 : vector<8x8xf32>
    %208 = arith.mulf %85, %207 : vector<8x8xf32>
    %cst_100 = arith.constant dense<0.000000e+00> : vector<8xf32>
    %209 = vector.multi_reduction <add>, %208, %cst_100 [1] : vector<8x8xf32> to vector<8xf32>
    %210 = vector.shape_cast %209 : vector<8xf32> to vector<8x1xf32>
    %cst_101 = arith.constant dense<0xFF800000> : vector<8xf32>
    %211 = vector.multi_reduction <maximumf>, %85, %cst_101 [1] : vector<8x8xf32> to vector<8xf32>
    %212 = vector.shape_cast %211 : vector<8xf32> to vector<8x1xf32>
    %213 = arith.mulf %152, %161 : vector<8x1xf32>
    %214 = vector.shape_cast %213 : vector<8x1xf32> to vector<1x8x1xf32>
    %cst_102 = arith.constant dense<0.000000e+00> : vector<1xf32>
    %215 = vector.multi_reduction <add>, %214, %cst_102 [1, 2] : vector<1x8x1xf32> to vector<1xf32>
    %216 = vector.shape_cast %215 : vector<1xf32> to vector<1x1x1xf32>
    %217 = vector.extract %216[0, 0, 0] : f32 from vector<1x1x1xf32>
    %218 = arith.mulf %152, %171 : vector<8x1xf32>
    %219 = vector.shape_cast %218 : vector<8x1xf32> to vector<1x8x1xf32>
    %cst_103 = arith.constant dense<0.000000e+00> : vector<1xf32>
    %220 = vector.multi_reduction <add>, %219, %cst_103 [1, 2] : vector<1x8x1xf32> to vector<1xf32>
    %221 = vector.shape_cast %220 : vector<1xf32> to vector<1x1x1xf32>
    %222 = vector.extract %221[0, 0, 0] : f32 from vector<1x1x1xf32>
    %223 = arith.mulf %152, %210 : vector<8x1xf32>
    %224 = vector.shape_cast %223 : vector<8x1xf32> to vector<1x8x1xf32>
    %cst_104 = arith.constant dense<0.000000e+00> : vector<1xf32>
    %225 = vector.multi_reduction <add>, %224, %cst_104 [1, 2] : vector<1x8x1xf32> to vector<1xf32>
    %226 = vector.shape_cast %225 : vector<1xf32> to vector<1x1x1xf32>
    %227 = vector.extract %226[0, 0, 0] : f32 from vector<1x1x1xf32>
    %228 = arith.mulf %152, %212 : vector<8x1xf32>
    %229 = vector.shape_cast %228 : vector<8x1xf32> to vector<1x8x1xf32>
    %cst_105 = arith.constant dense<0.000000e+00> : vector<1xf32>
    %230 = vector.multi_reduction <add>, %229, %cst_105 [1, 2] : vector<1x8x1xf32> to vector<1xf32>
    %231 = vector.shape_cast %230 : vector<1xf32> to vector<1x1x1xf32>
    %232 = vector.extract %231[0, 0, 0] : f32 from vector<1x1x1xf32>
    %233 = vector.broadcast %152 : vector<8x1xf32> to vector<8x8xf32>
    %234 = arith.mulf %233, %85 : vector<8x8xf32>
    %cst_106 = arith.constant dense<0.000000e+00> : vector<8xf32>
    %235 = vector.multi_reduction <add>, %234, %cst_106 [0] : vector<8x8xf32> to vector<8xf32>
    %236 = vector.shape_cast %235 : vector<8xf32> to vector<1x8xf32>
    %cst_107 = arith.constant 0.000000e+00 : f32
    %237 = vector.broadcast %cst_107 : f32 to vector<1x4xf32>
    %cst_108 = arith.constant 0.000000e+00 : f32
    %238 = vector.broadcast %cst_108 : f32 to vector<1x116xf32>
    %239 = tpu.concatenate %237, %236, %238 in 1 : vector<1x4xf32>, vector<1x8xf32>, vector<1x116xf32> -> vector<1x128xf32>
    %240 = tpu.iota {dimensions = array<i32: 1>} : vector<1x128xi32>
    %c0_i32 = arith.constant 0 : i32
    %241 = vector.broadcast %c0_i32 : i32 to vector<1x128xi32>
    %242 = arith.cmpi eq, %240, %241 : vector<1x128xi32>
    %243 = vector.broadcast %217 : f32 to vector<1x128xf32>
    %244 = arith.select %242, %243, %239 : vector<1x128xi1>, vector<1x128xf32>
    %c1_i32_109 = arith.constant 1 : i32
    %245 = vector.broadcast %c1_i32_109 : i32 to vector<1x128xi32>
    %246 = arith.cmpi eq, %240, %245 : vector<1x128xi32>
    %247 = vector.broadcast %222 : f32 to vector<1x128xf32>
    %248 = arith.select %246, %247, %244 : vector<1x128xi1>, vector<1x128xf32>
    %c2_i32 = arith.constant 2 : i32
    %249 = vector.broadcast %c2_i32 : i32 to vector<1x128xi32>
    %250 = arith.cmpi eq, %240, %249 : vector<1x128xi32>
    %251 = vector.broadcast %227 : f32 to vector<1x128xf32>
    %252 = arith.select %250, %251, %248 : vector<1x128xi1>, vector<1x128xf32>
    %c3_i32 = arith.constant 3 : i32
    %253 = vector.broadcast %c3_i32 : i32 to vector<1x128xi32>
    %254 = arith.cmpi eq, %240, %253 : vector<1x128xi32>
    %255 = vector.broadcast %232 : f32 to vector<1x128xf32>
    %256 = arith.select %254, %255, %252 : vector<1x128xi1>, vector<1x128xf32>
    %c0_110 = arith.constant 0 : index
    %c0_111 = arith.constant 0 : index
    %c0_112 = arith.constant 0 : index
    %257 = vector.load %arg29[%c0_110, %c0_111, %c0_112] : memref<1x1x128xf32, #tpu.memory_space<vmem>>, vector<1x1x128xf32>
    %258 = vector.shape_cast %257 : vector<1x1x128xf32> to vector<1x128xf32>
    %259 = vector.shape_cast %256 : vector<1x128xf32> to vector<1x1x128xf32>
    tpu.vector_store %arg29[%c0_110, %c0_111, %c0_112], %259 {strides = array<i32>} : memref<1x1x128xf32, #tpu.memory_space<vmem>>, vector<1x1x128xf32>,
    return
  }
  func.func @transform_0(%arg0: i32) -> (i32, i32) {
    %c0_i32 = arith.constant 0 : i32
    %c0_i32_0 = arith.constant 0 : i32
    return %arg0, %c0_i32 : i32, i32
  }
  func.func @transform_1(%arg0: i32) -> (i32, i32) {
    %c0_i32 = arith.constant 0 : i32
    %c0_i32_0 = arith.constant 0 : i32
    return %arg0, %c0_i32 : i32, i32
  }
  func.func @transform_2(%arg0: i32) -> (i32, i32) {
    %c0_i32 = arith.constant 0 : i32
    %c0_i32_0 = arith.constant 0 : i32
    %c0_i32_1 = arith.constant 0 : i32
    return %c0_i32, %c0_i32_0 : i32, i32
  }
  func.func @transform_3(%arg0: i32) -> (i32, i32) {
    %c0_i32 = arith.constant 0 : i32
    %c0_i32_0 = arith.constant 0 : i32
    %c0_i32_1 = arith.constant 0 : i32
    return %c0_i32, %c0_i32_0 : i32, i32
  }
  func.func @transform_4(%arg0: i32) -> (i32, i32) {
    %c0_i32 = arith.constant 0 : i32
    %c0_i32_0 = arith.constant 0 : i32
    %c0_i32_1 = arith.constant 0 : i32
    return %c0_i32, %c0_i32_0 : i32, i32
  }
  func.func @transform_5(%arg0: i32) -> (i32, i32) {
    %c0_i32 = arith.constant 0 : i32
    %c0_i32_0 = arith.constant 0 : i32
    %c0_i32_1 = arith.constant 0 : i32
    return %c0_i32, %c0_i32_0 : i32, i32
  }
  func.func @transform_6(%arg0: i32) -> (i32, i32) {
    %c0_i32 = arith.constant 0 : i32
    %c0_i32_0 = arith.constant 0 : i32
    %c0_i32_1 = arith.constant 0 : i32
    return %c0_i32, %c0_i32_0 : i32, i32
  }
  func.func @transform_7(%arg0: i32) -> (i32, i32) {
    %c0_i32 = arith.constant 0 : i32
    %c0_i32_0 = arith.constant 0 : i32
    %c0_i32_1 = arith.constant 0 : i32
    return %c0_i32, %c0_i32_0 : i32, i32
  }
  func.func @transform_8(%arg0: i32) -> (i32, i32) {
    %c0_i32 = arith.constant 0 : i32
    %c0_i32_0 = arith.constant 0 : i32
    %c0_i32_1 = arith.constant 0 : i32
    return %c0_i32, %c0_i32_0 : i32, i32
  }
  func.func @transform_9(%arg0: i32) -> (i32, i32) {
    %c0_i32 = arith.constant 0 : i32
    %c0_i32_0 = arith.constant 0 : i32
    %c0_i32_1 = arith.constant 0 : i32
    return %c0_i32, %c0_i32_0 : i32, i32
  }
  func.func @transform_10(%arg0: i32) -> (i32, i32) {
    %c0_i32 = arith.constant 0 : i32
    %c0_i32_0 = arith.constant 0 : i32
    %c0_i32_1 = arith.constant 0 : i32
    return %c0_i32, %c0_i32_0 : i32, i32
  }
  func.func @transform_11(%arg0: i32) -> (i32, i32) {
    %c0_i32 = arith.constant 0 : i32
    %c0_i32_0 = arith.constant 0 : i32
    %c0_i32_1 = arith.constant 0 : i32
    return %c0_i32, %c0_i32_0 : i32, i32
  }
  func.func @transform_12(%arg0: i32) -> (i32, i32) {
    %c0_i32 = arith.constant 0 : i32
    %c0_i32_0 = arith.constant 0 : i32
    %c0_i32_1 = arith.constant 0 : i32
    return %c0_i32, %c0_i32_0 : i32, i32
  }
  func.func @transform_13(%arg0: i32) -> (i32, i32) {
    %c0_i32 = arith.constant 0 : i32
    %c0_i32_0 = arith.constant 0 : i32
    %c0_i32_1 = arith.constant 0 : i32
    return %c0_i32, %c0_i32_0 : i32, i32
  }
  func.func @transform_14(%arg0: i32) -> (i32, i32) {
    %c0_i32 = arith.constant 0 : i32
    %c0_i32_0 = arith.constant 0 : i32
    %c0_i32_1 = arith.constant 0 : i32
    return %c0_i32, %c0_i32_0 : i32, i32
  }
  func.func @transform_15(%arg0: i32) -> (i32, i32) {
    %c0_i32 = arith.constant 0 : i32
    %c0_i32_0 = arith.constant 0 : i32
    %c0_i32_1 = arith.constant 0 : i32
    return %c0_i32, %c0_i32_0 : i32, i32
  }
  func.func @transform_16(%arg0: i32) -> (i32, i32) {
    %c0_i32 = arith.constant 0 : i32
    %c0_i32_0 = arith.constant 0 : i32
    %c0_i32_1 = arith.constant 0 : i32
    return %c0_i32, %c0_i32_0 : i32, i32
  }
  func.func @transform_17(%arg0: i32) -> (i32, i32) {
    %c0_i32 = arith.constant 0 : i32
    %c0_i32_0 = arith.constant 0 : i32
    %c0_i32_1 = arith.constant 0 : i32
    return %c0_i32, %c0_i32_0 : i32, i32
  }
  func.func @transform_18(%arg0: i32) -> (i32, i32) {
    %c0_i32 = arith.constant 0 : i32
    %c0_i32_0 = arith.constant 0 : i32
    %c0_i32_1 = arith.constant 0 : i32
    return %c0_i32, %c0_i32_0 : i32, i32
  }
  func.func @transform_19(%arg0: i32) -> (i32, i32) {
    %c0_i32 = arith.constant 0 : i32
    %c0_i32_0 = arith.constant 0 : i32
    %c0_i32_1 = arith.constant 0 : i32
    return %c0_i32, %c0_i32_0 : i32, i32
  }
  func.func @transform_20(%arg0: i32) -> (i32, i32) {
    %c0_i32 = arith.constant 0 : i32
    %c0_i32_0 = arith.constant 0 : i32
    %c0_i32_1 = arith.constant 0 : i32
    return %c0_i32, %c0_i32_0 : i32, i32
  }
  func.func @transform_21(%arg0: i32) -> (i32, i32) {
    %c0_i32 = arith.constant 0 : i32
    %c0_i32_0 = arith.constant 0 : i32
    %c0_i32_1 = arith.constant 0 : i32
    return %c0_i32, %c0_i32_0 : i32, i32
  }
  func.func @transform_22(%arg0: i32) -> (i32, i32) {
    %c0_i32 = arith.constant 0 : i32
    %c0_i32_0 = arith.constant 0 : i32
    %c0_i32_1 = arith.constant 0 : i32
    return %c0_i32, %c0_i32_0 : i32, i32
  }
  func.func @transform_23(%arg0: i32) -> (i32, i32) {
    %c0_i32 = arith.constant 0 : i32
    %c0_i32_0 = arith.constant 0 : i32
    %c0_i32_1 = arith.constant 0 : i32
    return %c0_i32, %c0_i32_0 : i32, i32
  }
  func.func @transform_24(%arg0: i32) -> (i32, i32) {
    %c0_i32 = arith.constant 0 : i32
    %c0_i32_0 = arith.constant 0 : i32
    %c0_i32_1 = arith.constant 0 : i32
    return %c0_i32, %c0_i32_0 : i32, i32
  }
  func.func @transform_25(%arg0: i32) -> (i32, i32) {
    %c0_i32 = arith.constant 0 : i32
    %c0_i32_0 = arith.constant 0 : i32
    %c0_i32_1 = arith.constant 0 : i32
    return %c0_i32, %c0_i32_0 : i32, i32
  }
  func.func @transform_26(%arg0: i32) -> (i32, i32) {
    %c0_i32 = arith.constant 0 : i32
    %c0_i32_0 = arith.constant 0 : i32
    %c0_i32_1 = arith.constant 0 : i32
    return %c0_i32, %c0_i32_0 : i32, i32
  }
  func.func @transform_27(%arg0: i32) -> (i32, i32) {
    %c0_i32 = arith.constant 0 : i32
    %c0_i32_0 = arith.constant 0 : i32
    return %arg0, %c0_i32 : i32, i32
  }
  func.func @transform_28(%arg0: i32) -> (i32, i32, i32) {
    %c0_i32 = arith.constant 0 : i32
    %c0_i32_0 = arith.constant 0 : i32
    %c0_i32_1 = arith.constant 0 : i32
    return %arg0, %c0_i32, %c0_i32_0 : i32, i32, i32
  }
}

</mosaic_0001>

<bundles_post_ra>
// kernel: forward.1
= control target key start
LH: loop header
LB: loop body
LE: loop exit
PB: predicated region body
PF: predicated region fallthrough
CT: control target
= control target key end

     0   :  { %s4638_s0 = inlined_call_operand.hbm [shape: f32[8,64], index: 0, kind: input, shape index: {}]   ;;  %s4639_s1 = inlined_call_operand.hbm [shape: f32[8,48], index: 1, kind: input, shape index: {}]   ;;  %s4640_s2 = inlined_call_operand.hbm [shape: f32[1,64], index: 2, kind: input, shape index: {}]   ;;  %s4641_s3 = inlined_call_operand.hbm [shape: bf16[64,128], index: 3, kind: input, shape index: {}]   ;;  %s4642_s4 = inlined_call_operand.hbm [shape: f32[1,128], index: 4, kind: input, shape index: {}]   ;;  %s4643_s5 = inlined_call_operand.hbm [shape: bf16[128,128], index: 5, kind: input, shape index: {}]   ;;  %s4644_s6 = inlined_call_operand.hbm [shape: f32[1,128], index: 6, kind: input, shape index: {}]   ;;  %s4645_s7 = inlined_call_operand.hbm [shape: bf16[128,96], index: 7, kind: input, shape index: {}]   ;;  %s4646_s8 = inlined_call_operand.hbm [shape: f32[1,96], index: 8, kind: input, shape index: {}]   ;;  %s4647_s9 = inlined_call_operand.hbm [shape: bf16[48,128], index: 9, kind: input, shape index: {}]   ;;  %s4648_s10 = inlined_call_operand.hbm [shape: f32[1,128], index: 10, kind: input, shape index: {}]   ;;  %s4649_s11 = inlined_call_operand.hbm [shape: bf16[128,128], index: 11, kind: input, shape index: {}]   ;;  %s4650_s12 = inlined_call_operand.hbm [shape: f32[1,128], index: 12, kind: input, shape index: {}]   ;;  %s4651_s13 = inlined_call_operand.hbm [shape: bf16[128,8], index: 13, kind: input, shape index: {}]   ;;  %s4652_s14 = inlined_call_operand.hbm [shape: f32[1,8], index: 14, kind: input, shape index: {}]   ;;  %s4653_s15 = inlined_call_operand.hbm [shape: bf16[32,128], index: 15, kind: input, shape index: {}]   ;;  %s4654_s16 = inlined_call_operand.hbm [shape: f32[1,128], index: 16, kind: input, shape index: {}]   ;;  %s4655_s17 = inlined_call_operand.hbm [shape: bf16[128,128], index: 17, kind: input, shape index: {}]   ;;  %s4656_s18 = inlined_call_operand.hbm [shape: f32[1,128], index: 18, kind: input, shape index: {}]   ;;  %s4657_s19 = inlined_call_operand.hbm [shape: bf16[128,64], index: 19, kind: input, shape index: {}]   ;;  %s4658_s20 = inlined_call_operand.hbm [shape: f32[1,64], index: 20, kind: input, shape index: {}]   ;;  %s4659_s21 = inlined_call_operand.hbm [shape: bf16[16,128], index: 21, kind: input, shape index: {}]   ;;  %s4660_s22 = inlined_call_operand.hbm [shape: f32[1,128], index: 22, kind: input, shape index: {}]   ;;  %s4661_s23 = inlined_call_operand.hbm [shape: bf16[128,128], index: 23, kind: input, shape index: {}]   ;;  %s4662_s24 = inlined_call_operand.hbm [shape: f32[1,128], index: 24, kind: input, shape index: {}]   ;;  %s4663_s25 = inlined_call_operand.hbm [shape: bf16[128,512], index: 25, kind: input, shape index: {}]   ;;  %s4664_s26 = inlined_call_operand.hbm [shape: f32[1,512], index: 26, kind: input, shape index: {}]   ;;  %s4665_s27 = inlined_call_operand.hbm [shape: f32[8,256], index: 27, kind: output, shape index: {0}]   ;;  %s4666_s28 = inlined_call_operand.hbm [shape: f32[1,1,128], index: 28, kind: output, shape index: {1}]  }
   0x1   :  { %4687 = sst [smem:[#allocation63_spill]] %s4638_s0 }
   0x2   :  { %4688 = sst [smem:[#allocation64_spill]] %s4639_s1 }
   0x3   :  { %4689 = sst [smem:[#allocation65_spill]] %s4640_s2 }
   0x4   :  { %4690 = sst [smem:[#allocation66_spill]] %s4641_s3 }
   0x5   :  { %4691 = sst [smem:[#allocation67_spill]] %s4642_s4 }
   0x6   :  { %4692 = sst [smem:[#allocation68_spill]] %s4643_s5 }
   0x7   :  { %4693 = sst [smem:[#allocation69_spill]] %s4644_s6 }
   0x8   :  { %4694 = sst [smem:[#allocation70_spill]] %s4645_s7 }
   0x9   :  { %4695 = sst [smem:[#allocation71_spill]] %s4646_s8 }
   0xa   :  { %4696 = sst [smem:[#allocation72_spill]] %s4647_s9 }
   0xb   :  { %4697 = sst [smem:[#allocation73_spill]] %s4648_s10 }
   0xc   :  { %4698 = sst [smem:[#allocation74_spill]] %s4649_s11 }
   0xd   :  { %4699 = sst [smem:[#allocation75_spill]] %s4650_s12 }
   0xe   :  { %4700 = sst [smem:[#allocation76_spill]] %s4664_s26 }
   0xf   :  { %4701 = sst [smem:[#allocation77_spill]] %s4665_s27 }
  0x10   :  { %4702 = sst [smem:[#allocation78_spill]] %s4666_s28 }
  0x11   :  { %34 = vsyncpa [#allocation3], 0 }
  0x12   :  { %35 = vsyncpa [#allocation6], 0 }
  0x13   :  { %36 = vsyncpa [#allocation9], 0 }
  0x14   :  { %37 = vsyncpa [#allocation12], 0 }
  0x15   :  { %38 = vsyncpa [#allocation15], 0 }
  0x16   :  { %39 = vsyncpa [#allocation18], 0 }
  0x17   :  { %40 = vsyncpa [#allocation21], 0 }
  0x18   :  { %41 = vsyncpa [#allocation24], 0 }
  0x19   :  { %42 = vsyncpa [#allocation27], 0 }
  0x1a   :  { %43 = vsyncpa [#allocation30], 0 }
  0x1b   :  { %44 = vsyncpa [#allocation33], 0 }
  0x1c   :  { %45 = vsyncpa [#allocation36], 0 }
  0x1d   :  { %46 = vsyncpa [#allocation39], 0 }
  0x1e   :  { %47 = vsyncpa [#allocation42], 0 }
  0x1f   :  { %48 = vsyncpa [#allocation4], 0 }
  0x20   :  { %49 = vsyncpa [#allocation46], 0  ;;  %s3704_s8 = smov [#allocation5]   ;;  %s3705_s9 = smov [#allocation8]  }
  0x21   :  { %s66_s5 = sshll.u32 %s3704_s8, 4  ;;  %s85_s30 = sshll.u32 %s3705_s9, 4  ;;  %s67_s5 = int_to_ptr.vmem [resolvable:$true] %s66_s5  ;;  %s3892_s30 = int_to_ptr.vmem [resolvable:$true] %s85_s30 }
  0x22   :  { %s4703_s10 = sld [smem:[#allocation64_spill]] }
  0x28   :  { %s3034_s0 = scalar_lea.hbm %s4703_s10, 128 }
  0x29   :  { %p3035_p0 = scmp.ne.s32.totalorder %s4703_s10, %s3034_s0  ;;  %p3038_p1 = scmp.lt.u32.totalorder %s3034_s0, %s4703_s10 }
  0x2b   :  { %p3040_p2 = pnand %p3038_p1, %p3035_p0 }
  0x2d   :  { %3043 = shalt.err (!%p3040_p2)
}
  0x2e   :  { %s3044_s12 = scalar_lea.vmem %s67_s5, 128  ;;  %p3049_p4 = scmp.lt.s32.totalorder %s67_s5, %s67_s5 }
  0x2f   :  { %p3045_p3 = scmp.ne.s32.totalorder %s67_s5, %s3044_s12  ;;  %p3050_p5 = scmp.lt.s32.totalorder %s3044_s12, %s3044_s12 }
  0x31   :  { %p3051_p6 = por %p3050_p5, %p3049_p4 }
  0x33   :  { %p3052_p7 = pnand %p3051_p6, %p3045_p3 }
  0x35   :  { %3055 = shalt.err (!%p3052_p7)
}
  0x36   :  { %69 = dma.hbm_to_vmem [thread:$0]  %s4703_s10, 128, %s67_s5, [#allocation6]  }
  0x37   :  { %s4704_s3 = sld [smem:[#allocation66_spill]] }
  0x3d   :  { %s3056_s6 = scalar_lea.hbm %s4704_s3, 512 }
  0x3e   :  { %p3057_p8 = scmp.ne.s32.totalorder %s4704_s3, %s3056_s6  ;;  %p3060_p9 = scmp.lt.u32.totalorder %s3056_s6, %s4704_s3 }
  0x40   :  { %p3062_p10 = pnand %p3060_p9, %p3057_p8 }
  0x42   :  { %3065 = shalt.err (!%p3062_p10)
}
  0x43   :  { %s3066_s7 = scalar_lea.vmem %s3892_s30, 512  ;;  %p3071_p12 = scmp.lt.s32.totalorder %s3892_s30, %s3892_s30 }
  0x44   :  { %p3067_p11 = scmp.ne.s32.totalorder %s3892_s30, %s3066_s7  ;;  %p3072_p13 = scmp.lt.s32.totalorder %s3066_s7, %s3066_s7 }
  0x46   :  { %p3073_p0 = por %p3072_p13, %p3071_p12 }
  0x48   :  { %p3074_p1 = pnand %p3073_p0, %p3067_p11 }
  0x4a   :  { %3077 = shalt.err (!%p3074_p1)
}
  0x4b   :  { %s3706_s5 = smov 64   ;;  %s3707_s10 = smov 4  }
  0x4c   :  { %91 = dma.hbm_to_vmem [thread:$0]  %s4704_s3, 512, %s3892_s30, [#allocation9], %s3706_s5, %s3706_s5, %s3707_s10  }
  0x4d   :  { %s3708_s4 = smov [#allocation11]   ;;  %s3709_s9 = smov [#allocation14]  }
  0x4e   :  { %s107_s8 = sshll.u32 %s3708_s4, 4  ;;  %s129_s6 = sshll.u32 %s3709_s9, 4  ;;  %s108_s8 = int_to_ptr.vmem [resolvable:$true] %s107_s8  ;;  %s3926_s6 = int_to_ptr.vmem [resolvable:$true] %s129_s6 }
  0x4f   :  { %s4705_s0 = sld [smem:[#allocation68_spill]] }
  0x55   :  { %s3078_s2 = scalar_lea.hbm %s4705_s0, 1024 }
  0x56   :  { %p3079_p2 = scmp.ne.s32.totalorder %s4705_s0, %s3078_s2  ;;  %p3082_p3 = scmp.lt.u32.totalorder %s3078_s2, %s4705_s0 }
  0x58   :  { %p3084_p4 = pnand %p3082_p3, %p3079_p2 }
  0x5a   :  { %3087 = shalt.err (!%p3084_p4)
}
  0x5b   :  { %s3088_s30 = scalar_lea.vmem %s108_s8, 1024  ;;  %p3093_p6 = scmp.lt.s32.totalorder %s108_s8, %s108_s8 }
  0x5c   :  { %p3089_p5 = scmp.ne.s32.totalorder %s108_s8, %s3088_s30  ;;  %p3094_p7 = scmp.lt.s32.totalorder %s3088_s30, %s3088_s30 }
  0x5e   :  { %p3095_p8 = por %p3094_p7, %p3093_p6 }
  0x60   :  { %p3096_p9 = pnand %p3095_p8, %p3089_p5 }
  0x62   :  { %3099 = shalt.err (!%p3096_p9)
}
  0x63   :  { %113 = dma.hbm_to_vmem [thread:$0]  %s4705_s0, 1024, %s108_s8, [#allocation12], %s3706_s5, %s3706_s5, %s3707_s10  }
  0x64   :  { %s4706_s26 = sld [smem:[#allocation70_spill]] }
  0x6a   :  { %s3100_s27 = scalar_lea.hbm %s4706_s26, 1024 }
  0x6b   :  { %p3101_p10 = scmp.ne.s32.totalorder %s4706_s26, %s3100_s27  ;;  %p3104_p11 = scmp.lt.u32.totalorder %s3100_s27, %s4706_s26 }
  0x6d   :  { %p3106_p12 = pnand %p3104_p11, %p3101_p10 }
  0x6f   :  { %3109 = shalt.err (!%p3106_p12)
}
  0x70   :  { %s3110_s2 = scalar_lea.vmem %s3926_s6, 1024  ;;  %p3115_p0 = scmp.lt.s32.totalorder %s3926_s6, %s3926_s6 }
  0x71   :  { %p3111_p13 = scmp.ne.s32.totalorder %s3926_s6, %s3110_s2  ;;  %p3116_p1 = scmp.lt.s32.totalorder %s3110_s2, %s3110_s2 }
  0x73   :  { %p3117_p2 = por %p3116_p1, %p3115_p0 }
  0x75   :  { %p3118_p3 = pnand %p3117_p2, %p3111_p13 }
  0x77   :  { %3121 = shalt.err (!%p3118_p3)
}
  0x78   :  { %135 = dma.hbm_to_vmem [thread:$0]  %s4706_s26, 1024, %s3926_s6, [#allocation15], %s3706_s5, %s3706_s5, %s3707_s10  }
  0x79   :  { %s3710_s7 = smov [#allocation17]   ;;  %s3711_s3 = smov [#allocation20]  }
  0x7a   :  { %s151_s30 = sshll.u32 %s3710_s7, 4  ;;  %s173_s12 = sshll.u32 %s3711_s3, 4  ;;  %s152_s30 = int_to_ptr.vmem [resolvable:$true] %s151_s30  ;;  %s3963_s12 = int_to_ptr.vmem [resolvable:$true] %s173_s12 }
  0x7b   :  { %s4707_s27 = sld [smem:[#allocation72_spill]] }
  0x81   :  { %s3122_s4 = scalar_lea.hbm %s4707_s27, 384 }
  0x82   :  { %p3123_p4 = scmp.ne.s32.totalorder %s4707_s27, %s3122_s4  ;;  %p3126_p5 = scmp.lt.u32.totalorder %s3122_s4, %s4707_s27 }
  0x84   :  { %p3128_p6 = pnand %p3126_p5, %p3123_p4 }
  0x86   :  { %3131 = shalt.err (!%p3128_p6)
}
  0x87   :  { %s3132_s6 = scalar_lea.vmem %s152_s30, 384  ;;  %p3137_p8 = scmp.lt.s32.totalorder %s152_s30, %s152_s30 }
  0x88   :  { %p3133_p7 = scmp.ne.s32.totalorder %s152_s30, %s3132_s6  ;;  %p3138_p9 = scmp.lt.s32.totalorder %s3132_s6, %s3132_s6 }
  0x8a   :  { %p3139_p10 = por %p3138_p9, %p3137_p8 }
  0x8c   :  { %p3140_p11 = pnand %p3139_p10, %p3133_p7 }
  0x8e   :  { %3143 = shalt.err (!%p3140_p11)
}
  0x8f   :  { %157 = dma.hbm_to_vmem [thread:$0]  %s4707_s27, 384, %s152_s30, [#allocation18], %s3706_s5, %s3706_s5, %s3707_s10  }
  0x90   :  { %s4708_s3 = sld [smem:[#allocation74_spill]] }
  0x96   :  { %s3144_s28 = scalar_lea.hbm %s4708_s3, 1024 }
  0x97   :  { %p3145_p12 = scmp.ne.s32.totalorder %s4708_s3, %s3144_s28  ;;  %p3148_p13 = scmp.lt.u32.totalorder %s3144_s28, %s4708_s3 }
  0x99   :  { %p3150_p0 = pnand %p3148_p13, %p3145_p12 }
  0x9b   :  { %3153 = shalt.err (!%p3150_p0)
}
  0x9c   :  { %s3154_s29 = scalar_lea.vmem %s3963_s12, 1024  ;;  %p3159_p2 = scmp.lt.s32.totalorder %s3963_s12, %s3963_s12 }
  0x9d   :  { %p3155_p1 = scmp.ne.s32.totalorder %s3963_s12, %s3154_s29  ;;  %p3160_p3 = scmp.lt.s32.totalorder %s3154_s29, %s3154_s29 }
  0x9f   :  { %p3161_p4 = por %p3160_p3, %p3159_p2 }
  0xa1   :  { %p3162_p5 = pnand %p3161_p4, %p3155_p1 }
  0xa3   :  { %3165 = shalt.err (!%p3162_p5)
}
  0xa4   :  { %179 = dma.hbm_to_vmem [thread:$0]  %s4708_s3, 1024, %s3963_s12, [#allocation21], %s3706_s5, %s3706_s5, %s3707_s10  }
  0xa5   :  { %s3712_s2 = smov [#allocation23]   ;;  %s3713_s26 = smov [#allocation26]  }
  0xa6   :  { %s195_s6 = sshll.u32 %s3712_s2, 4  ;;  %s217_s8 = sshll.u32 %s3713_s26, 4  ;;  %s196_s6 = int_to_ptr.vmem [resolvable:$true] %s195_s6  ;;  %s4000_s8 = int_to_ptr.vmem [resolvable:$true] %s217_s8 }
  0xa7   :  { %s3166_s28 = scalar_lea.hbm %s4651_s13, 1024 }
  0xa8   :  { %p3167_p6 = scmp.ne.s32.totalorder %s4651_s13, %s3166_s28  ;;  %p3170_p7 = scmp.lt.u32.totalorder %s3166_s28, %s4651_s13 }
  0xaa   :  { %p3172_p8 = pnand %p3170_p7, %p3167_p6 }
  0xac   :  { %3175 = shalt.err (!%p3172_p8)
}
  0xad   :  { %s3176_s12 = scalar_lea.vmem %s196_s6, 1024  ;;  %p3181_p10 = scmp.lt.s32.totalorder %s196_s6, %s196_s6 }
  0xae   :  { %p3177_p9 = scmp.ne.s32.totalorder %s196_s6, %s3176_s12  ;;  %p3182_p11 = scmp.lt.s32.totalorder %s3176_s12, %s3176_s12 }
  0xb0   :  { %p3183_p12 = por %p3182_p11, %p3181_p10 }
  0xb2   :  { %p3184_p13 = pnand %p3183_p12, %p3177_p9 }
  0xb4   :  { %3187 = shalt.err (!%p3184_p13)
}
  0xb5   :  { %201 = dma.hbm_to_vmem [thread:$0]  %s4651_s13, 1024, %s196_s6, [#allocation24], %s3706_s5, %s3706_s5, %s3707_s10  }
  0xb6   :  { %s3188_s2 = scalar_lea.hbm %s4653_s15, 256 }
  0xb7   :  { %p3189_p0 = scmp.ne.s32.totalorder %s4653_s15, %s3188_s2  ;;  %p3192_p1 = scmp.lt.u32.totalorder %s3188_s2, %s4653_s15 }
  0xb9   :  { %p3194_p2 = pnand %p3192_p1, %p3189_p0 }
  0xbb   :  { %3197 = shalt.err (!%p3194_p2)
}
  0xbc   :  { %s3198_s1 = scalar_lea.vmem %s4000_s8, 256  ;;  %p3203_p4 = scmp.lt.s32.totalorder %s4000_s8, %s4000_s8 }
  0xbd   :  { %p3199_p3 = scmp.ne.s32.totalorder %s4000_s8, %s3198_s1  ;;  %p3204_p5 = scmp.lt.s32.totalorder %s3198_s1, %s3198_s1 }
  0xbf   :  { %p3205_p6 = por %p3204_p5, %p3203_p4 }
  0xc1   :  { %p3206_p7 = pnand %p3205_p6, %p3199_p3 }
  0xc3   :  { %3209 = shalt.err (!%p3206_p7)
}
  0xc4   :  { %223 = dma.hbm_to_vmem [thread:$0]  %s4653_s15, 256, %s4000_s8, [#allocation27], %s3706_s5, %s3706_s5, %s3707_s10  }
  0xc5   :  { %s3714_s4 = smov [#allocation29]   ;;  %s3715_s11 = smov [#allocation32]  }
  0xc6   :  { %s239_s9 = sshll.u32 %s3714_s4, 4  ;;  %s261_s12 = sshll.u32 %s3715_s11, 4  ;;  %s240_s9 = int_to_ptr.vmem [resolvable:$true] %s239_s9  ;;  %s4037_s12 = int_to_ptr.vmem [resolvable:$true] %s261_s12 }
  0xc7   :  { %s3210_s30 = scalar_lea.hbm %s4655_s17, 1024 }
  0xc8   :  { %p3211_p8 = scmp.ne.s32.totalorder %s4655_s17, %s3210_s30  ;;  %p3214_p9 = scmp.lt.u32.totalorder %s3210_s30, %s4655_s17 }
  0xca   :  { %p3216_p10 = pnand %p3214_p9, %p3211_p8 }
  0xcc   :  { %3219 = shalt.err (!%p3216_p10)
}
  0xcd   :  { %s3220_s15 = scalar_lea.vmem %s240_s9, 1024  ;;  %p3225_p12 = scmp.lt.s32.totalorder %s240_s9, %s240_s9 }
  0xce   :  { %p3221_p11 = scmp.ne.s32.totalorder %s240_s9, %s3220_s15  ;;  %p3226_p13 = scmp.lt.s32.totalorder %s3220_s15, %s3220_s15 }
  0xd0   :  { %p3227_p0 = por %p3226_p13, %p3225_p12 }
  0xd2   :  { %p3228_p1 = pnand %p3227_p0, %p3221_p11 }
  0xd4   :  { %3231 = shalt.err (!%p3228_p1)
}
  0xd5   :  { %245 = dma.hbm_to_vmem [thread:$0]  %s4655_s17, 1024, %s240_s9, [#allocation30], %s3706_s5, %s3706_s5, %s3707_s10  }
  0xd6   :  { %s3232_s13 = scalar_lea.hbm %s4657_s19, 1024 }
  0xd7   :  { %p3233_p2 = scmp.ne.s32.totalorder %s4657_s19, %s3232_s13  ;;  %p3236_p3 = scmp.lt.u32.totalorder %s3232_s13, %s4657_s19 }
  0xd9   :  { %p3238_p4 = pnand %p3236_p3, %p3233_p2 }
  0xdb   :  { %3241 = shalt.err (!%p3238_p4)
}
  0xdc   :  { %s3242_s29 = scalar_lea.vmem %s4037_s12, 1024  ;;  %p3247_p6 = scmp.lt.s32.totalorder %s4037_s12, %s4037_s12 }
  0xdd   :  { %p3243_p5 = scmp.ne.s32.totalorder %s4037_s12, %s3242_s29  ;;  %p3248_p7 = scmp.lt.s32.totalorder %s3242_s29, %s3242_s29 }
  0xdf   :  { %p3249_p8 = por %p3248_p7, %p3247_p6 }
  0xe1   :  { %p3250_p9 = pnand %p3249_p8, %p3243_p5 }
  0xe3   :  { %3253 = shalt.err (!%p3250_p9)
}
  0xe4   :  { %267 = dma.hbm_to_vmem [thread:$0]  %s4657_s19, 1024, %s4037_s12, [#allocation33], %s3706_s5, %s3706_s5, %s3707_s10  }
  0xe5   :  { %s3716_s30 = smov [#allocation35]   ;;  %s3717_s2 = smov [#allocation38]  }
  0xe6   :  { %s283_s27 = sshll.u32 %s3716_s30, 4  ;;  %s305_s26 = sshll.u32 %s3717_s2, 4  ;;  %s284_s27 = int_to_ptr.vmem [resolvable:$true] %s283_s27  ;;  %s4074_s26 = int_to_ptr.vmem [resolvable:$true] %s305_s26 }
  0xe7   :  { %s3254_s8 = scalar_lea.hbm %s4659_s21, 128 }
  0xe8   :  { %p3255_p10 = scmp.ne.s32.totalorder %s4659_s21, %s3254_s8  ;;  %p3258_p11 = scmp.lt.u32.totalorder %s3254_s8, %s4659_s21 }
  0xea   :  { %p3260_p12 = pnand %p3258_p11, %p3255_p10 }
  0xec   :  { %3263 = shalt.err (!%p3260_p12)
}
  0xed   :  { %s3264_s19 = scalar_lea.vmem %s284_s27, 128  ;;  %p3269_p0 = scmp.lt.s32.totalorder %s284_s27, %s284_s27 }
  0xee   :  { %p3265_p13 = scmp.ne.s32.totalorder %s284_s27, %s3264_s19  ;;  %p3270_p1 = scmp.lt.s32.totalorder %s3264_s19, %s3264_s19 }
  0xf0   :  { %p3271_p2 = por %p3270_p1, %p3269_p0 }
  0xf2   :  { %p3272_p3 = pnand %p3271_p2, %p3265_p13 }
  0xf4   :  { %3275 = shalt.err (!%p3272_p3)
}
  0xf5   :  { %289 = dma.hbm_to_vmem [thread:$0]  %s4659_s21, 128, %s284_s27, [#allocation36], %s3706_s5, %s3706_s5, %s3707_s10  }
  0xf6   :  { %s3276_s3 = scalar_lea.hbm %s4661_s23, 1024 }
  0xf7   :  { %p3277_p4 = scmp.ne.s32.totalorder %s4661_s23, %s3276_s3  ;;  %p3280_p5 = scmp.lt.u32.totalorder %s3276_s3, %s4661_s23 }
  0xf9   :  { %p3282_p6 = pnand %p3280_p5, %p3277_p4 }
  0xfb   :  { %3285 = shalt.err (!%p3282_p6)
}
  0xfc   :  { %s3286_s2 = scalar_lea.vmem %s4074_s26, 1024  ;;  %p3291_p8 = scmp.lt.s32.totalorder %s4074_s26, %s4074_s26 }
  0xfd   :  { %p3287_p7 = scmp.ne.s32.totalorder %s4074_s26, %s3286_s2  ;;  %p3292_p9 = scmp.lt.s32.totalorder %s3286_s2, %s3286_s2 }
  0xff   :  { %p3293_p10 = por %p3292_p9, %p3291_p8 }
 0x101   :  { %p3294_p11 = pnand %p3293_p10, %p3287_p7 }
 0x103   :  { %3297 = shalt.err (!%p3294_p11)
}
 0x104   :  { %311 = dma.hbm_to_vmem [thread:$0]  %s4661_s23, 1024, %s4074_s26, [#allocation39], %s3706_s5, %s3706_s5, %s3707_s10  }
 0x105   :  { %s3718_s0 = smov [#allocation41]   ;;  %s3298_s28 = scalar_lea.hbm %s4663_s25, 4096 }
 0x106   :  { %s327_s15 = sshll.u32 %s3718_s0, 4  ;;  %p3299_p12 = scmp.ne.s32.totalorder %s4663_s25, %s3298_s28  ;;  %s328_s15 = int_to_ptr.vmem [resolvable:$true] %s327_s15 }
 0x107   :  { %p3302_p13 = scmp.lt.u32.totalorder %s3298_s28, %s4663_s25 }
 0x109   :  { %p3304_p0 = pnand %p3302_p13, %p3299_p12 }
 0x10b   :  { %3307 = shalt.err (!%p3304_p0)
}
 0x10c   :  { %s3308_s6 = scalar_lea.vmem %s328_s15, 4096  ;;  %p3313_p2 = scmp.lt.s32.totalorder %s328_s15, %s328_s15 }
 0x10d   :  { %p3309_p1 = scmp.ne.s32.totalorder %s328_s15, %s3308_s6  ;;  %p3314_p3 = scmp.lt.s32.totalorder %s3308_s6, %s3308_s6 }
 0x10f   :  { %p3315_p4 = por %p3314_p3, %p3313_p2 }
 0x111   :  { %p3316_p5 = pnand %p3315_p4, %p3309_p1 }
 0x113   :  { %3319 = shalt.err (!%p3316_p5)
}
 0x114   :  { %s3719_s23 = smov 256   ;;  %s3720_s26 = smov 16  }
 0x115   :  { %333 = dma.hbm_to_vmem [thread:$0]  %s4663_s25, 4096, %s328_s15, [#allocation42], %s3719_s23, %s3719_s23, %s3720_s26  }
 0x116   :  { %s3721_s3 = smov [#allocation2]   ;;  %s3722_s17 = smov [#allocation7]  }
 0x117   :  { %s56_s29 = sshll.u32 %s3721_s3, 4  ;;  %s76_s9 = sshll.u32 %s3722_s17, 4  ;;  %s57_s29 = int_to_ptr.vmem [resolvable:$true] %s56_s29  ;;  %s77_s9 = int_to_ptr.vmem [resolvable:$true] %s76_s9 }
 0x118   :  { %s4709_s21 = sld [smem:[#allocation63_spill]] }
 0x11e   :  { %s3320_s27 = scalar_lea.hbm %s4709_s21, 128 }
 0x11f   :  { %p3321_p6 = scmp.ne.s32.totalorder %s4709_s21, %s3320_s27  ;;  %p3324_p7 = scmp.lt.u32.totalorder %s3320_s27, %s4709_s21 }
 0x121   :  { %p3326_p8 = pnand %p3324_p7, %p3321_p6 }
 0x123   :  { %3329 = shalt.err (!%p3326_p8)
}
 0x124   :  { %s3330_s25 = scalar_lea.vmem %s57_s29, 128  ;;  %p3335_p10 = scmp.lt.s32.totalorder %s57_s29, %s57_s29 }
 0x125   :  { %p3331_p9 = scmp.ne.s32.totalorder %s57_s29, %s3330_s25  ;;  %p3336_p11 = scmp.lt.s32.totalorder %s3330_s25, %s3330_s25 }
 0x127   :  { %p3337_p12 = por %p3336_p11, %p3335_p10 }
 0x129   :  { %p3338_p13 = pnand %p3337_p12, %p3331_p9 }
 0x12b   :  { %3341 = shalt.err (!%p3338_p13)
}
 0x12c   :  { %59 = dma.hbm_to_vmem [thread:$0]  %s4709_s21, 128, %s57_s29, [#allocation3]  }
 0x12d   :  { %s4710_s12 = sld [smem:[#allocation65_spill]] }
 0x133   :  { %s3342_s6 = scalar_lea.hbm %s4710_s12, 16 }
 0x134   :  { %p3343_p0 = scmp.ne.s32.totalorder %s4710_s12, %s3342_s6  ;;  %p3346_p1 = scmp.lt.u32.totalorder %s3342_s6, %s4710_s12 }
 0x136   :  { %p3348_p2 = pnand %p3346_p1, %p3343_p0 }
 0x138   :  { %3351 = shalt.err (!%p3348_p2)
}
 0x139   :  { %s3352_s17 = scalar_lea.vmem %s77_s9, 16  ;;  %s3356_s30 = scalar_lea.vmem %s77_s9, 32 }
 0x13a   :  { %p3353_p3 = scmp.ne.s32.totalorder %s77_s9, %s3352_s17  ;;  %p3357_p4 = scmp.lt.s32.totalorder %s77_s9, %s77_s9 }
 0x13b   :  { %p3358_p5 = scmp.lt.s32.totalorder %s3356_s30, %s3352_s17 }
 0x13d   :  { %p3359_p6 = por %p3358_p5, %p3357_p4 }
 0x13f   :  { %p3360_p7 = pnand %p3359_p6, %p3353_p3 }
 0x141   :  { %3363 = shalt.err (!%p3360_p7)
}
 0x142   :  { %79 = dma.hbm_to_vmem [thread:$0]  %s4710_s12, 16, %s77_s9, [#allocation6]  }
 0x143   :  { %s3723_s21 = smov [#allocation10]   ;;  %s3724_s0 = smov [#allocation13]  }
 0x144   :  { %s98_s27 = sshll.u32 %s3723_s21, 4  ;;  %s120_s8 = sshll.u32 %s3724_s0, 4  ;;  %s99_s27 = int_to_ptr.vmem [resolvable:$true] %s98_s27  ;;  %s121_s8 = int_to_ptr.vmem [resolvable:$true] %s120_s8 }
 0x145   :  { %s4711_s25 = sld [smem:[#allocation67_spill]] }
 0x14b   :  { %s3364_s15 = scalar_lea.hbm %s4711_s25, 16 }
 0x14c   :  { %p3365_p8 = scmp.ne.s32.totalorder %s4711_s25, %s3364_s15  ;;  %p3368_p9 = scmp.lt.u32.totalorder %s3364_s15, %s4711_s25 }
 0x14e   :  { %p3370_p10 = pnand %p3368_p9, %p3365_p8 }
 0x150   :  { %3373 = shalt.err (!%p3370_p10)
}
 0x151   :  { %s3374_s9 = scalar_lea.vmem %s99_s27, 16  ;;  %s3378_s12 = scalar_lea.vmem %s99_s27, 32 }
 0x152   :  { %p3375_p11 = scmp.ne.s32.totalorder %s99_s27, %s3374_s9  ;;  %p3379_p12 = scmp.lt.s32.totalorder %s99_s27, %s99_s27 }
 0x153   :  { %p3380_p13 = scmp.lt.s32.totalorder %s3378_s12, %s3374_s9 }
 0x155   :  { %p3381_p0 = por %p3380_p13, %p3379_p12 }
 0x157   :  { %p3382_p1 = pnand %p3381_p0, %p3375_p11 }
 0x159   :  { %3385 = shalt.err (!%p3382_p1)
}
 0x15a   :  { %101 = dma.hbm_to_vmem [thread:$0]  %s4711_s25, 16, %s99_s27, [#allocation9]  }
 0x15b   :  { %s4712_s17 = sld [smem:[#allocation69_spill]] }
 0x161   :  { %s3386_s30 = scalar_lea.hbm %s4712_s17, 16 }
 0x162   :  { %p3387_p2 = scmp.ne.s32.totalorder %s4712_s17, %s3386_s30  ;;  %p3390_p3 = scmp.lt.u32.totalorder %s3386_s30, %s4712_s17 }
 0x164   :  { %p3392_p4 = pnand %p3390_p3, %p3387_p2 }
 0x166   :  { %3395 = shalt.err (!%p3392_p4)
}
 0x167   :  { %s3396_s7 = scalar_lea.vmem %s121_s8, 16  ;;  %s3400_s28 = scalar_lea.vmem %s121_s8, 32 }
 0x168   :  { %p3397_p5 = scmp.ne.s32.totalorder %s121_s8, %s3396_s7  ;;  %p3401_p6 = scmp.lt.s32.totalorder %s121_s8, %s121_s8 }
 0x169   :  { %p3402_p7 = scmp.lt.s32.totalorder %s3400_s28, %s3396_s7 }
 0x16b   :  { %p3403_p8 = por %p3402_p7, %p3401_p6 }
 0x16d   :  { %p3404_p9 = pnand %p3403_p8, %p3397_p5 }
 0x16f   :  { %3407 = shalt.err (!%p3404_p9)
}
 0x170   :  { %123 = dma.hbm_to_vmem [thread:$0]  %s4712_s17, 16, %s121_s8, [#allocation12]  }
 0x171   :  { %s3725_s15 = smov [#allocation16]   ;;  %s3726_s13 = smov [#allocation19]  }
 0x172   :  { %s142_s1 = sshll.u32 %s3725_s15, 4  ;;  %s164_s19 = sshll.u32 %s3726_s13, 4  ;;  %s143_s1 = int_to_ptr.vmem [resolvable:$true] %s142_s1  ;;  %s165_s19 = int_to_ptr.vmem [resolvable:$true] %s164_s19 }
 0x173   :  { %s4713_s12 = sld [smem:[#allocation71_spill]] }
 0x179   :  { %s3408_s23 = scalar_lea.hbm %s4713_s12, 16 }
 0x17a   :  { %p3409_p10 = scmp.ne.s32.totalorder %s4713_s12, %s3408_s23  ;;  %p3412_p11 = scmp.lt.u32.totalorder %s3408_s23, %s4713_s12 }
 0x17c   :  { %p3414_p12 = pnand %p3412_p11, %p3409_p10 }
 0x17e   :  { %3417 = shalt.err (!%p3414_p12)
}
 0x17f   :  { %s3418_s8 = scalar_lea.vmem %s143_s1, 16  ;;  %s3422_s17 = scalar_lea.vmem %s143_s1, 32 }
 0x180   :  { %p3419_p13 = scmp.ne.s32.totalorder %s143_s1, %s3418_s8  ;;  %p3423_p0 = scmp.lt.s32.totalorder %s143_s1, %s143_s1 }
 0x181   :  { %p3424_p1 = scmp.lt.s32.totalorder %s3422_s17, %s3418_s8 }
 0x183   :  { %p3425_p2 = por %p3424_p1, %p3423_p0 }
 0x185   :  { %p3426_p3 = pnand %p3425_p2, %p3419_p13 }
 0x187   :  { %3429 = shalt.err (!%p3426_p3)
}
 0x188   :  { %145 = dma.hbm_to_vmem [thread:$0]  %s4713_s12, 16, %s143_s1, [#allocation15]  }
 0x189   :  { %s4714_s7 = sld [smem:[#allocation73_spill]] }
 0x18f   :  { %s3430_s28 = scalar_lea.hbm %s4714_s7, 16 }
 0x190   :  { %p3431_p4 = scmp.ne.s32.totalorder %s4714_s7, %s3430_s28  ;;  %p3434_p5 = scmp.lt.u32.totalorder %s3430_s28, %s4714_s7 }
 0x192   :  { %p3436_p6 = pnand %p3434_p5, %p3431_p4 }
 0x194   :  { %3439 = shalt.err (!%p3436_p6)
}
 0x195   :  { %s3440_s6 = scalar_lea.vmem %s165_s19, 16  ;;  %s3444_s9 = scalar_lea.vmem %s165_s19, 32 }
 0x196   :  { %p3441_p7 = scmp.ne.s32.totalorder %s165_s19, %s3440_s6  ;;  %p3445_p8 = scmp.lt.s32.totalorder %s165_s19, %s165_s19 }
 0x197   :  { %p3446_p9 = scmp.lt.s32.totalorder %s3444_s9, %s3440_s6 }
 0x199   :  { %p3447_p10 = por %p3446_p9, %p3445_p8 }
 0x19b   :  { %p3448_p11 = pnand %p3447_p10, %p3441_p7 }
 0x19d   :  { %3451 = shalt.err (!%p3448_p11)
}
 0x19e   :  { %167 = dma.hbm_to_vmem [thread:$0]  %s4714_s7, 16, %s165_s19, [#allocation18]  }
 0x19f   :  { %s3727_s23 = smov [#allocation22]   ;;  %s3728_s11 = smov [#allocation25]  }
 0x1a0   :  { %s186_s4 = sshll.u32 %s3727_s23, 4  ;;  %s208_s3 = sshll.u32 %s3728_s11, 4  ;;  %s187_s4 = int_to_ptr.vmem [resolvable:$true] %s186_s4  ;;  %s209_s3 = int_to_ptr.vmem [resolvable:$true] %s208_s3 }
 0x1a1   :  { %s4715_s17 = sld [smem:[#allocation75_spill]] }
 0x1a7   :  { %s3452_s29 = scalar_lea.hbm %s4715_s17, 16 }
 0x1a8   :  { %p3453_p12 = scmp.ne.s32.totalorder %s4715_s17, %s3452_s29  ;;  %p3456_p13 = scmp.lt.u32.totalorder %s3452_s29, %s4715_s17 }
 0x1aa   :  { %p3458_p0 = pnand %p3456_p13, %p3453_p12 }
 0x1ac   :  { %3461 = shalt.err (!%p3458_p0)
}
 0x1ad   :  { %s3462_s19 = scalar_lea.vmem %s187_s4, 16  ;;  %s3466_s7 = scalar_lea.vmem %s187_s4, 32 }
 0x1ae   :  { %p3463_p1 = scmp.ne.s32.totalorder %s187_s4, %s3462_s19  ;;  %p3467_p2 = scmp.lt.s32.totalorder %s187_s4, %s187_s4 }
 0x1af   :  { %p3468_p3 = scmp.lt.s32.totalorder %s3466_s7, %s3462_s19 }
 0x1b1   :  { %p3469_p4 = por %p3468_p3, %p3467_p2 }
 0x1b3   :  { %p3470_p5 = pnand %p3469_p4, %p3463_p1 }
 0x1b5   :  { %3473 = shalt.err (!%p3470_p5)
}
 0x1b6   :  { %189 = dma.hbm_to_vmem [thread:$0]  %s4715_s17, 16, %s187_s4, [#allocation21]  }
 0x1b7   :  { %s3474_s6 = scalar_lea.hbm %s4652_s14, 16 }
 0x1b8   :  { %p3475_p6 = scmp.ne.s32.totalorder %s4652_s14, %s3474_s6  ;;  %p3478_p7 = scmp.lt.u32.totalorder %s3474_s6, %s4652_s14 }
 0x1ba   :  { %p3480_p8 = pnand %p3478_p7, %p3475_p6 }
 0x1bc   :  { %3483 = shalt.err (!%p3480_p8)
}
 0x1bd   :  { %s3484_s11 = scalar_lea.vmem %s209_s3, 16  ;;  %s3488_s30 = scalar_lea.vmem %s209_s3, 32 }
 0x1be   :  { %p3485_p9 = scmp.ne.s32.totalorder %s209_s3, %s3484_s11  ;;  %p3489_p10 = scmp.lt.s32.totalorder %s209_s3, %s209_s3 }
 0x1bf   :  { %p3490_p11 = scmp.lt.s32.totalorder %s3488_s30, %s3484_s11 }
 0x1c1   :  { %p3491_p12 = por %p3490_p11, %p3489_p10 }
 0x1c3   :  { %p3492_p13 = pnand %p3491_p12, %p3485_p9 }
 0x1c5   :  { %3495 = shalt.err (!%p3492_p13)
}
 0x1c6   :  { %211 = dma.hbm_to_vmem [thread:$0]  %s4652_s14, 16, %s209_s3, [#allocation24]  }
 0x1c7   :  { %s3729_s17 = smov [#allocation28]   ;;  %s3730_s2 = smov [#allocation31]  }
 0x1c8   :  { %s230_s29 = sshll.u32 %s3729_s17, 4  ;;  %s252_s21 = sshll.u32 %s3730_s2, 4  ;;  %s231_s29 = int_to_ptr.vmem [resolvable:$true] %s230_s29  ;;  %s253_s21 = int_to_ptr.vmem [resolvable:$true] %s252_s21 }
 0x1c9   :  { %s3496_s19 = scalar_lea.hbm %s4654_s16, 16 }
 0x1ca   :  { %p3497_p0 = scmp.ne.s32.totalorder %s4654_s16, %s3496_s19  ;;  %p3500_p1 = scmp.lt.u32.totalorder %s3496_s19, %s4654_s16 }
 0x1cc   :  { %p3502_p2 = pnand %p3500_p1, %p3497_p0 }
 0x1ce   :  { %3505 = shalt.err (!%p3502_p2)
}
 0x1cf   :  { %s3506_s14 = scalar_lea.vmem %s231_s29, 16  ;;  %s3510_s3 = scalar_lea.vmem %s231_s29, 32 }
 0x1d0   :  { %p3507_p3 = scmp.ne.s32.totalorder %s231_s29, %s3506_s14  ;;  %p3511_p4 = scmp.lt.s32.totalorder %s231_s29, %s231_s29 }
 0x1d1   :  { %p3512_p5 = scmp.lt.s32.totalorder %s3510_s3, %s3506_s14 }
 0x1d3   :  { %p3513_p6 = por %p3512_p5, %p3511_p4 }
 0x1d5   :  { %p3514_p7 = pnand %p3513_p6, %p3507_p3 }
 0x1d7   :  { %3517 = shalt.err (!%p3514_p7)
}
 0x1d8   :  { %233 = dma.hbm_to_vmem [thread:$0]  %s4654_s16, 16, %s231_s29, [#allocation27]  }
 0x1d9   :  { %s3518_s12 = scalar_lea.hbm %s4656_s18, 16 }
 0x1da   :  { %p3519_p8 = scmp.ne.s32.totalorder %s4656_s18, %s3518_s12  ;;  %p3522_p9 = scmp.lt.u32.totalorder %s3518_s12, %s4656_s18 }
 0x1dc   :  { %p3524_p10 = pnand %p3522_p9, %p3519_p8 }
 0x1de   :  { %3527 = shalt.err (!%p3524_p10)
}
 0x1df   :  { %s3528_s8 = scalar_lea.vmem %s253_s21, 16  ;;  %s3532_s17 = scalar_lea.vmem %s253_s21, 32 }
 0x1e0   :  { %p3529_p11 = scmp.ne.s32.totalorder %s253_s21, %s3528_s8  ;;  %p3533_p12 = scmp.lt.s32.totalorder %s253_s21, %s253_s21 }
 0x1e1   :  { %p3534_p13 = scmp.lt.s32.totalorder %s3532_s17, %s3528_s8 }
 0x1e3   :  { %p3535_p0 = por %p3534_p13, %p3533_p12 }
 0x1e5   :  { %p3536_p1 = pnand %p3535_p0, %p3529_p11 }
 0x1e7   :  { %3539 = shalt.err (!%p3536_p1)
}
 0x1e8   :  { %255 = dma.hbm_to_vmem [thread:$0]  %s4656_s18, 16, %s253_s21, [#allocation30]  }
 0x1e9   :  { %s3731_s2 = smov [#allocation34]   ;;  %s3732_s28 = smov [#allocation37]  }
 0x1ea   :  { %s274_s0 = sshll.u32 %s3731_s2, 4  ;;  %s296_s19 = sshll.u32 %s3732_s28, 4  ;;  %s275_s0 = int_to_ptr.vmem [resolvable:$true] %s274_s0  ;;  %s297_s19 = int_to_ptr.vmem [resolvable:$true] %s296_s19 }
 0x1eb   :  { %s3540_s25 = scalar_lea.hbm %s4658_s20, 16 }
 0x1ec   :  { %p3541_p2 = scmp.ne.s32.totalorder %s4658_s20, %s3540_s25  ;;  %p3544_p3 = scmp.lt.u32.totalorder %s3540_s25, %s4658_s20 }
 0x1ee   :  { %p3546_p4 = pnand %p3544_p3, %p3541_p2 }
 0x1f0   :  { %3549 = shalt.err (!%p3546_p4)
}
 0x1f1   :  { %s3550_s18 = scalar_lea.vmem %s275_s0, 16  ;;  %s3554_s21 = scalar_lea.vmem %s275_s0, 32 }
 0x1f2   :  { %p3551_p5 = scmp.ne.s32.totalorder %s275_s0, %s3550_s18  ;;  %p3555_p6 = scmp.lt.s32.totalorder %s275_s0, %s275_s0 }
 0x1f3   :  { %p3556_p7 = scmp.lt.s32.totalorder %s3554_s21, %s3550_s18 }
 0x1f5   :  { %p3557_p8 = por %p3556_p7, %p3555_p6 }
 0x1f7   :  { %p3558_p9 = pnand %p3557_p8, %p3551_p5 }
 0x1f9   :  { %3561 = shalt.err (!%p3558_p9)
}
 0x1fa   :  { %277 = dma.hbm_to_vmem [thread:$0]  %s4658_s20, 16, %s275_s0, [#allocation33]  }
 0x1fb   :  { %s3562_s23 = scalar_lea.hbm %s4660_s22, 16 }
 0x1fc   :  { %p3563_p10 = scmp.ne.s32.totalorder %s4660_s22, %s3562_s23  ;;  %p3566_p11 = scmp.lt.u32.totalorder %s3562_s23, %s4660_s22 }
 0x1fe   :  { %p3568_p12 = pnand %p3566_p11, %p3563_p10 }
 0x200   :  { %3571 = shalt.err (!%p3568_p12)
}
 0x201   :  { %s3572_s17 = scalar_lea.vmem %s297_s19, 16  ;;  %s3576_s16 = scalar_lea.vmem %s297_s19, 32 }
 0x202   :  { %p3573_p13 = scmp.ne.s32.totalorder %s297_s19, %s3572_s17  ;;  %p3577_p0 = scmp.lt.s32.totalorder %s297_s19, %s297_s19 }
 0x203   :  { %p3578_p1 = scmp.lt.s32.totalorder %s3576_s16, %s3572_s17 }
 0x205   :  { %p3579_p2 = por %p3578_p1, %p3577_p0 }
 0x207   :  { %p3580_p3 = pnand %p3579_p2, %p3573_p13 }
 0x209   :  { %3583 = shalt.err (!%p3580_p3)
}
 0x20a   :  { %299 = dma.hbm_to_vmem [thread:$0]  %s4660_s22, 16, %s297_s19, [#allocation36]  }
 0x20b   :  { %s3733_s2 = smov [#allocation40]   ;;  %s3734_s28 = smov [#allocation43]  }
 0x20c   :  { %s318_s0 = sshll.u32 %s3733_s2, 4  ;;  %s340_s7 = sshll.u32 %s3734_s28, 4  ;;  %s319_s0 = int_to_ptr.vmem [resolvable:$true] %s318_s0  ;;  %s341_s7 = int_to_ptr.vmem [resolvable:$true] %s340_s7 }
 0x20d   :  { %s3584_s15 = scalar_lea.hbm %s4662_s24, 16 }
 0x20e   :  { %p3585_p4 = scmp.ne.s32.totalorder %s4662_s24, %s3584_s15  ;;  %p3588_p5 = scmp.lt.u32.totalorder %s3584_s15, %s4662_s24 }
 0x210   :  { %p3590_p6 = pnand %p3588_p5, %p3585_p4 }
 0x212   :  { %3593 = shalt.err (!%p3590_p6)
}
 0x213   :  { %s3594_s22 = scalar_lea.vmem %s319_s0, 16  ;;  %s3598_s19 = scalar_lea.vmem %s319_s0, 32 }
 0x214   :  { %p3595_p7 = scmp.ne.s32.totalorder %s319_s0, %s3594_s22  ;;  %p3599_p8 = scmp.lt.s32.totalorder %s319_s0, %s319_s0 }
 0x215   :  { %p3600_p9 = scmp.lt.s32.totalorder %s3598_s19, %s3594_s22 }
 0x217   :  { %p3601_p10 = por %p3600_p9, %p3599_p8 }
 0x219   :  { %p3602_p11 = pnand %p3601_p10, %p3595_p7 }
 0x21b   :  { %3605 = shalt.err (!%p3602_p11)
}
 0x21c   :  { %321 = dma.hbm_to_vmem [thread:$0]  %s4662_s24, 16, %s319_s0, [#allocation39]  }
 0x21d   :  { %s4716_s12 = sld [smem:[#allocation76_spill]] }
 0x223   :  { %s3606_s23 = scalar_lea.hbm %s4716_s12, 64 }
 0x224   :  { %p3607_p12 = scmp.ne.s32.totalorder %s4716_s12, %s3606_s23  ;;  %p3610_p13 = scmp.lt.u32.totalorder %s3606_s23, %s4716_s12 }
 0x226   :  { %p3612_p0 = pnand %p3610_p13, %p3607_p12 }
 0x228   :  { %3615 = shalt.err (!%p3612_p0)
}
 0x229   :  { %s3616_s17 = scalar_lea.vmem %s341_s7, 64  ;;  %p3621_p2 = scmp.lt.s32.totalorder %s341_s7, %s341_s7 }
 0x22a   :  { %p3617_p1 = scmp.ne.s32.totalorder %s341_s7, %s3616_s17  ;;  %p3622_p3 = scmp.lt.s32.totalorder %s3616_s17, %s3616_s17 }
 0x22c   :  { %p3623_p4 = por %p3622_p3, %p3621_p2 }
 0x22e   :  { %p3624_p5 = pnand %p3623_p4, %p3617_p1 }
 0x230   :  { %3627 = shalt.err (!%p3624_p5)
}
 0x231   :  { %343 = dma.hbm_to_vmem [thread:$0]  %s4716_s12, 64, %s341_s7, [#allocation42]  }
 0x232   :  { %3672 = dma.done.wait [#allocation3], 128  }
 0x233   :  { %3673 = vsyncadd [#allocation3], 4294967168 }
 0x234   :  { %3674 = dma.done.wait [#allocation6], 144  }
 0x235   :  { %3675 = vsyncadd [#allocation6], 4294967152 }
 0x236   :  { %3676 = dma.done.wait [#allocation9], 528  }
 0x237   :  { %3677 = vsyncadd [#allocation9], 4294966768 }
 0x238   :  { %3678 = dma.done.wait [#allocation12], 1040  }
 0x239   :  { %3679 = vsyncadd [#allocation12], 4294966256 }
 0x23a   :  { %3680 = dma.done.wait [#allocation15], 1040  }
 0x23b   :  { %3681 = vsyncadd [#allocation15], 4294966256 }
 0x23c   :  { %3682 = dma.done.wait [#allocation18], 400  }
 0x23d   :  { %3683 = vsyncadd [#allocation18], 4294966896 }
 0x23e   :  { %3684 = dma.done.wait [#allocation21], 1040  }
 0x23f   :  { %3685 = vsyncadd [#allocation21], 4294966256 }
 0x240   :  { %3686 = dma.done.wait [#allocation24], 1040  }
 0x241   :  { %3687 = vsyncadd [#allocation24], 4294966256 }
 0x242   :  { %3688 = dma.done.wait [#allocation27], 272  }
 0x243   :  { %3689 = vsyncadd [#allocation27], 4294967024 }
 0x244   :  { %3690 = dma.done.wait [#allocation30], 1040  }
 0x245   :  { %3691 = vsyncadd [#allocation30], 4294966256 }
 0x246   :  { %3692 = dma.done.wait [#allocation33], 1040  }
 0x247   :  { %3693 = vsyncadd [#allocation33], 4294966256 }
 0x248   :  { %3694 = dma.done.wait [#allocation36], 144  }
 0x249   :  { %3695 = vsyncadd [#allocation36], 4294967152 }
 0x24a   :  { %3696 = dma.done.wait [#allocation39], 1040  }
 0x24b   :  { %3697 = vsyncadd [#allocation39], 4294966256 }
 0x24c   :  { %3698 = dma.done.wait [#allocation42], 4160  }
 0x24d   :  { %3699 = vsyncadd [#allocation42], 4294963136  ;;  %v3735_v0 = vmov 0.0   ;;  %vm3736_vm0 = vmmov 0   ;;  %v2901_v1 = vld [vmem:[#allocation8] sm:$0xff]   ;;  %v2902_v2 = vld [vmem:[#allocation8 + $0x8] sm:$0xff]  }
 0x24e   :  { %2642 = vmatprep.subr.bf16.mxu0 %v3735_v0  ;;  %2650 = vmatprep.mubr.msk.bf16.mxu0 %vm3736_vm0, %v3735_v0  ;;  %v2905_v3 = vld [vmem:[#allocation11] sm:$0xff]   ;;  %v2903_v4 = vld [vmem:[#allocation8 + $0x10] sm:$0xff]   ;;  %v2904_v6 = vld [vmem:[#allocation8 + $0x18] sm:$0xff]   ;;  %vm467_vm1 = vcmask 523264   ;;  %s3737_s20 = smov 112   ;;  %s3738_s29 = smov 80  }
 0x24f   :  { %2654 = vmatprep.subr.bf16.mxu1 %v3735_v0  ;;  %2670 = vmatprep.mubr.msk.bf16.mxu1 %vm3736_vm0, %v3735_v0  ;;  %v2906_v5 = vld [vmem:[#allocation11 + $0x8] sm:$0xff]   ;;  %v2907_v8 = vld [vmem:[#allocation11 + $0x10] sm:$0xff]   ;;  %v2908_v10 = vld [vmem:[#allocation11 + $0x18] sm:$0xff]   ;;  %s3739_s2 = smov 96   ;;  %vm1098_vm4 = vcmask 261120   ;;  %vm784_vm5 = vcmask 392192  }
 0x250   :  { %2643 = vmatpush3.bf16.msra.mxu0 %v2901_v1  ;;  %2655 = vmatpush3.bf16.msra.mxu1 %v2905_v3  ;;  %v426_v7 = vld [vmem:[#allocation2] sm:$0xff]  ;;  %v2909_v11 = vld [vmem:[#allocation11 + $0x20] sm:$0xff]   ;;  %v2912_v14 = vld [vmem:[#allocation11 + $0x38] sm:$0xff]   ;;  %s3740_s0 = smov 48   ;;  %s3741_s28 = smov 32   ;;  %vm4686_vm6 = vcmask 785408  }
 0x251   :  { %2644 = vmatprep.subr.bf16.mxu0 %v3735_v0  ;;  %2656 = vmatprep.subr.bf16.mxu1 %v3735_v0  ;;  %v427_v9 = vpack.c.bf16 %v426_v7, %v426_v7  ;;  %v2910_v12 = vld [vmem:[#allocation11 + $0x28] sm:$0xff]   ;;  %v2911_v13 = vld [vmem:[#allocation11 + $0x30] sm:$0xff]   ;;  %v2916_v18 = vld [vmem:[#allocation14 + $0x18] sm:$0xff]   ;;  %vm4683_vm10 = vcmask 130048   ;;  %vm4684_vm11 = vcmask 64512  }
 0x252   :  { %v2913_v15 = vld [vmem:[#allocation14] sm:$0xff]   ;;  %v2914_v16 = vld [vmem:[#allocation14 + $0x8] sm:$0xff]   ;;  %v2915_v17 = vld [vmem:[#allocation14 + $0x10] sm:$0xff]  }
 0x253   :  { %v2917_v19 = vld [vmem:[#allocation14 + $0x20] sm:$0xff]   ;;  %v2918_v20 = vld [vmem:[#allocation14 + $0x28] sm:$0xff]   ;;  %v2352_v21 = vld [vmem:[#allocation10] ss:$0 sm:$0xff] }
 0x254   :  { %2645 = vmatpush3.bf16.msra.mxu0 %v2902_v2  ;;  %2657 = vmatpush3.bf16.msra.mxu1 %v2906_v5  ;;  %v2919_v30 = vld [vmem:[#allocation14 + $0x30] sm:$0xff]   ;;  %v2920_v31 = vld [vmem:[#allocation14 + $0x38] sm:$0xff]   ;;  %v2921_v41 = vld [vmem:[#allocation17] sm:$0xff]  }
 0x255   :  { %2646 = vmatprep.subr.bf16.mxu0 %v3735_v0  ;;  %2658 = vmatprep.subr.bf16.mxu1 %v3735_v0  ;;  %v2358_v32 = vld [vmem:[#allocation13] ss:$0 sm:$0xff]  ;;  %v2367_v42 = vld [vmem:[#allocation16] ss:$0 sm:$0xff]  ;;  %v2922_v49 = vld [vmem:[#allocation17 + $0x8] sm:$0xff]  }
 0x256   :  { %v2923_v53 = vld [vmem:[#allocation17 + $0x10] sm:$0xff]   ;;  %v2924_v1 = vld [vmem:[#allocation20] sm:$0xff]   ;;  %v2925_v2 = vld [vmem:[#allocation20 + $0x8] sm:$0xff]  }
 0x257   :  { %v742_v59 = vld [vmem:[#allocation5] sm:$0xff]  ;;  %v2929_v7 = vld [vmem:[#allocation20 + $0x28] sm:$0xff]  }
 0x258   :  { %2647 = vmatpush3.bf16.msra.mxu0 %v2903_v4  ;;  %2659 = vmatpush3.bf16.msra.mxu1 %v2907_v8  ;;  %v2926_v3 = vld [vmem:[#allocation20 + $0x10] sm:$0xff]   ;;  %v2927_v5 = vld [vmem:[#allocation20 + $0x18] sm:$0xff]  }
 0x259   :  { %2648 = vmatprep.subr.bf16.mxu0 %v3735_v0  ;;  %2660 = vmatprep.subr.bf16.mxu1 %v3735_v0  ;;  %v2930_v8 = vld [vmem:[#allocation20 + $0x30] sm:$0xff]  }
 0x25c   :  { %2649 = vmatpush3.bf16.msra.mxu0 %v2904_v6  ;;  %2661 = vmatpush3.bf16.msra.mxu1 %v2908_v10  ;;  %v2928_v6 = vld [vmem:[#allocation20 + $0x20] sm:$0xff]  }
 0x25d   :  { %2674 = vmatprep.subr.bf16.mxu0 %v3735_v0  ;;  %2662 = vmatprep.subr.bf16.mxu1 %v3735_v0  ;;  %v2934_v10 = vld [vmem:[#allocation23] sm:$0xff]  }
 0x25f   :  { %2651 = vmatmul.mubr.msk.bf16.vlgmr.msra.gmra.mrb[0].mxu0 %vm467_vm1, %v427_v9  ;;  %v2931_v9 = vld [vmem:[#allocation20 + $0x38] sm:$0xff]  }
 0x260   :  { %2690 = vmatprep.mubr.msk.bf16.mxu0 %vm3736_vm0, %v3735_v0  ;;  %2663 = vmatpush3.bf16.msra.mxu1 %v2909_v11  ;;  %v2935_v11 = vld [vmem:[#allocation23 + $0x8] sm:$0xff]  }
 0x261   :  { %2664 = vmatprep.subr.bf16.mxu1 %v3735_v0  ;;  %2675 = vmatpush3.bf16.msra.mxu0 %v2913_v15 }
 0x262   :  { %2676 = vmatprep.subr.bf16.mxu0 %v3735_v0 }
 0x264   :  { %2665 = vmatpush3.bf16.msra.mxu1 %v2910_v12  ;;  %v2936_v12 = vld [vmem:[#allocation23 + $0x10] sm:$0xff]  }
 0x265   :  { %2666 = vmatprep.subr.bf16.mxu1 %v3735_v0  ;;  %2677 = vmatpush3.bf16.msra.mxu0 %v2914_v16  ;;  %v2939_v16 = vld [vmem:[#allocation23 + $0x28] sm:$0xff]  }
 0x266   :  { %2678 = vmatprep.subr.bf16.mxu0 %v3735_v0 }
 0x268   :  { %2667 = vmatpush3.bf16.msra.mxu1 %v2911_v13  ;;  %v2937_v13 = vld [vmem:[#allocation23 + $0x18] sm:$0xff]  }
 0x269   :  { %2668 = vmatprep.subr.bf16.mxu1 %v3735_v0  ;;  %2679 = vmatpush3.bf16.msra.mxu0 %v2915_v17 }
 0x26a   :  { %2680 = vmatprep.subr.bf16.mxu0 %v3735_v0 }
 0x26c   :  { %2669 = vmatpush3.bf16.msra.mxu1 %v2912_v14  ;;  %v2938_v14 = vld [vmem:[#allocation23 + $0x20] sm:$0xff]  }
 0x26d   :  { %2694 = vmatprep.subr.bf16.mxu1 %v3735_v0  ;;  %2681 = vmatpush3.bf16.msra.mxu0 %v2916_v18 }
 0x26e   :  { %2682 = vmatprep.subr.bf16.mxu0 %v3735_v0 }
 0x271   :  { %2683 = vmatpush3.bf16.msra.mxu0 %v2917_v19 }
 0x272   :  { %2684 = vmatprep.subr.bf16.mxu0 %v3735_v0 }
 0x275   :  { %2685 = vmatpush3.bf16.msra.mxu0 %v2918_v20 }
 0x276   :  { %2686 = vmatprep.subr.bf16.mxu0 %v3735_v0 }
 0x279   :  { %2687 = vmatpush3.bf16.msra.mxu0 %v2919_v30 }
 0x27a   :  { %2688 = vmatprep.subr.bf16.mxu0 %v3735_v0 }
 0x27d   :  { %2689 = vmatpush3.bf16.msra.mxu0 %v2920_v31 }
 0x27e   :  { %2724 = vmatprep.subr.bf16.mxu0 %v3735_v0 }
 0x332   :  { %v505_v22 = vpop.f32.mrb[0].mxu0 }
 0x333   :  { %v506_v23 = vadd.f32 %v2352_v21, %v505_v22  ;;  %v2652_v24 = vpop.f32.mrb[1].mxu0 }
 0x334   :  { %v508_v25 = vpop.f32.mrb[2].mxu0 }
 0x335   :  { %vm511_vm2 = vcmp.gt.f32.partialorder %v506_v23, 0.0  ;;  %v512_v26 = vmul.f32 0.01, %v506_v23  ;;  %v2653_v27 = vpop.f32.mrb[3].mxu0 }
 0x337   :  { %v513_v28 = vsel %vm511_vm2, %v506_v23, %v512_v26  ;;  %v2376_v26 = vld [vmem:[#allocation19] ss:$0 sm:$0xff] }
 0x338   :  { %v514_v29 = vpack.c.bf16 %v513_v28, %v513_v28 }
 0x33a   :  { %2671 = vmatmul.mubr.bf16.vlgmr.msra.gmra.mrb[0].mxu1 %v514_v29 }
 0x33b   :  { %2700 = vmatprep.mubr.msk.bf16.mxu1 %vm3736_vm0, %v3735_v0  ;;  %2695 = vmatpush3.bf16.msra.mxu1 %v2921_v41 }
 0x33c   :  { %2696 = vmatprep.subr.bf16.mxu1 %v3735_v0 }
 0x33f   :  { %2697 = vmatpush3.bf16.msra.mxu1 %v2922_v49  ;;  %v2942_v49 = vld [vmem:[#allocation29] sm:$0xff]  }
 0x340   :  { %2698 = vmatprep.subr.bf16.mxu1 %v3735_v0 }
 0x343   :  { %2699 = vmatpush3.bf16.msra.mxu1 %v2923_v53  ;;  %v2943_v53 = vld [vmem:[#allocation29 + $0x8] sm:$0xff]  }
 0x344   :  { %2704 = vmatprep.subr.bf16.mxu1 %v3735_v0 }
 0x40d   :  { %v620_v33 = vpop.f32.mrb[0].mxu1 }
 0x40e   :  { %v621_v34 = vadd.f32 %v2358_v32, %v620_v33  ;;  %v2672_v35 = vpop.f32.mrb[1].mxu1 }
 0x40f   :  { %v623_v36 = vpop.f32.mrb[2].mxu1 }
 0x410   :  { %vm626_vm3 = vcmp.gt.f32.partialorder %v621_v34, 0.0  ;;  %v627_v37 = vmul.f32 0.01, %v621_v34  ;;  %v2673_v38 = vpop.f32.mrb[3].mxu1  ;;  %v2933_v36 = vld [vmem:[#allocation26 + $0x8] sm:$0xff]  }
 0x411   :  { %v2941_v38 = vld [vmem:[#allocation23 + $0x38] sm:$0xff]  }
 0x412   :  { %v628_v39 = vsel %vm626_vm3, %v621_v34, %v627_v37  ;;  %v2932_v34 = vld [vmem:[#allocation26] sm:$0xff]   ;;  %v2940_v37 = vld [vmem:[#allocation23 + $0x30] sm:$0xff]  }
 0x413   :  { %v629_v40 = vpack.c.bf16 %v628_v39, %v628_v39  ;;  %v2381_v39 = vld [vmem:[#allocation22] ss:$0 sm:$0xff] }
 0x415   :  { %2691 = vmatmul.mubr.bf16.vlgmr.msra.gmra.mrb[4].mxu0 %v629_v40 }
 0x416   :  { %2740 = vmatprep.mubr.msk.bf16.mxu0 %vm3736_vm0, %v3735_v0  ;;  %2725 = vmatpush3.bf16.msra.mxu0 %v2934_v10  ;;  %v2953_v10 = vld [vmem:[#allocation32 + $0x10] sm:$0xff]  }
 0x417   :  { %2726 = vmatprep.subr.bf16.mxu0 %v3735_v0 }
 0x41a   :  { %2727 = vmatpush3.bf16.msra.mxu0 %v2935_v11  ;;  %v2954_v11 = vld [vmem:[#allocation32 + $0x18] sm:$0xff]  }
 0x41b   :  { %2728 = vmatprep.subr.bf16.mxu0 %v3735_v0 }
 0x41e   :  { %2729 = vmatpush3.bf16.msra.mxu0 %v2936_v12  ;;  %v2955_v12 = vld [vmem:[#allocation32 + $0x20] sm:$0xff]  }
 0x41f   :  { %2730 = vmatprep.subr.bf16.mxu0 %v3735_v0 }
 0x422   :  { %2731 = vmatpush3.bf16.msra.mxu0 %v2937_v13  ;;  %v2957_v13 = vld [vmem:[#allocation32 + $0x30] sm:$0xff]  }
 0x423   :  { %2732 = vmatprep.subr.bf16.mxu0 %v3735_v0 }
 0x426   :  { %2733 = vmatpush3.bf16.msra.mxu0 %v2938_v14  ;;  %v2958_v14 = vld [vmem:[#allocation32 + $0x38] sm:$0xff]  }
 0x427   :  { %2734 = vmatprep.subr.bf16.mxu0 %v3735_v0 }
 0x42a   :  { %2735 = vmatpush3.bf16.msra.mxu0 %v2939_v16 }
 0x42b   :  { %2736 = vmatprep.subr.bf16.mxu0 %v3735_v0 }
 0x42e   :  { %2737 = vmatpush3.bf16.msra.mxu0 %v2940_v37 }
 0x42f   :  { %2738 = vmatprep.subr.bf16.mxu0 %v3735_v0 }
 0x432   :  { %2739 = vmatpush3.bf16.msra.mxu0 %v2941_v38 }
 0x433   :  { %2752 = vmatprep.subr.bf16.mxu0 %v3735_v0 }
 0x4e8   :  { %v735_v43 = vpop.f32.mrb[4].mxu0 }
 0x4e9   :  { %v4326_v44 = vadd.f32 %v2367_v42, %v735_v43  ;;  %v2692_v45 = vpop.f32.mrb[5].mxu0 }
 0x4ea   :  { %v738_v46 = vpop.f32.mrb[6].mxu0 }
 0x4eb   :  { %3015 = vtanh.f32 %v4326_v44  ;;  %1915 = vrot.lane.b32.xlu1 %v4326_v44, %s3737_s20  ;;  %v2693_v47 = vpop.f32.mrb[7].mxu0  ;;  %v1889_v4 = vmul.f32 %v4326_v44, %v4326_v44 }
 0x4ef   :  { %1918 = vrot.lane.b32.xlu1 %v4326_v44, %s3720_s26 }
 0x4f3   :  { %1924 = vrot.lane.b32.xlu1 %v4326_v44, %s3738_s29 }
 0x4f5   :  { %v4335_v48 = vpop.eup %3015 }
 0x4f6   :  { %v1895_v50 = vmul.f32 1.442695, %v4335_v48  ;;  %v743_v51 = vmul.f32 0.5, %v4335_v48 }
 0x4f8   :  { %3017 = vpow2.f32 %v1895_v50  ;;  %v744_v52 = vmul.f32 1.442695, %v743_v51 }
 0x4fa   :  { %3019 = vpow2.f32 %v744_v52 }
 0x502   :  { %v4341_v54 = vpop.eup %3017 }
 0x503   :  { %1934 = vrot.lane.b32.xlu1 %v4341_v54, %s3739_s2 }
 0x504   :  { %v3020_v55 = vpop.eup %3019 }
 0x505   :  { %747 = vrot.lane.b32.xlu0 %v3020_v55, %s3738_s29 }
 0x55d   :  { %v1916_v56 = vpop.permute.xlu1 %1915 }
 0x561   :  { %v1919_v57 = vpop.permute.xlu1 %1918 }
 0x562   :  { %v1927_v58 = vsel %vm1098_vm4, %v1916_v56, %v1919_v57  ;;  %v2944_v57 = vld [vmem:[#allocation29 + $0x10] sm:$0xff]  }
 0x565   :  { %v4379_v17 = vpop.permute.xlu1 %1924 }
 0x575   :  { %v1935_v20 = vpop.permute.xlu1 %1934 }
 0x577   :  { %v748_v60 = vpop.permute.xlu0 %747 }
 0x578   :  { %v750_v61 = vmul.f32 %v748_v60, %v742_v59  ;;  %v2946_v59 = vld [vmem:[#allocation29 + $0x20] sm:$0xff]   ;;  %v2399_v60 = vld [vmem:[#allocation28] ss:$0 sm:$0xff] }
 0x57a   :  { %v4348_v62 = vadd.f32 %v750_v61, %v4326_v44  ;;  %v2947_v61 = vld [vmem:[#allocation29 + $0x28] sm:$0xff]  }
 0x57c   :  { %v4352_v63 = vpack.c.bf16 %v4348_v62, %v4348_v62 }
 0x57e   :  { %1084 = vrot.lane.b32.xlu0 %v4352_v63, %s3737_s20  ;;  %2701 = vmatmul.mubr.msk.bf16.vlgmr.msra.gmra.mrb[4].mxu1 %vm784_vm5, %v4352_v63 }
 0x57f   :  { %2720 = vmatprep.mubr.msk.bf16.mxu1 %vm3736_vm0, %v3735_v0  ;;  %2705 = vmatpush3.bf16.msra.mxu1 %v2924_v1 }
 0x580   :  { %2706 = vmatprep.subr.bf16.mxu1 %v3735_v0 }
 0x582   :  { %1921 = vrot.lane.b32.xlu0 %v4326_v44, %s3740_s0 }
 0x583   :  { %2707 = vmatpush3.bf16.msra.mxu1 %v2925_v2  ;;  %v2948_v2 = vld [vmem:[#allocation29 + $0x30] sm:$0xff]  }
 0x584   :  { %2708 = vmatprep.subr.bf16.mxu1 %v3735_v0 }
 0x586   :  { %1931 = vrot.lane.b32.xlu0 %v4341_v54, %s3706_s5 }
 0x587   :  { %2709 = vmatpush3.bf16.msra.mxu1 %v2926_v3 }
 0x588   :  { %2710 = vmatprep.subr.bf16.mxu1 %v3735_v0 }
 0x58a   :  { %1937 = vrot.lane.b32.xlu0 %v4341_v54, %s3741_s28 }
 0x58b   :  { %2711 = vmatpush3.bf16.msra.mxu1 %v2927_v5 }
 0x58c   :  { %2712 = vmatprep.subr.bf16.mxu1 %v3735_v0 }
 0x58e   :  { %2150 = vrot.lane.b32.xlu0 %v4335_v48, %s3706_s5  ;;  %s3744_s5 = smov 24  }
 0x58f   :  { %2713 = vmatpush3.bf16.msra.mxu1 %v2928_v6  ;;  %v2950_v6 = vld [vmem:[#allocation35] sm:$0xff]  }
 0x590   :  { %2714 = vmatprep.subr.bf16.mxu1 %v3735_v0 }
 0x592   :  { %1891 = vrot.lane.b32.xlu0 %v1889_v4, %s3740_s0  ;;  %v2949_v4 = vld [vmem:[#allocation29 + $0x38] sm:$0xff]  }
 0x593   :  { %2715 = vmatpush3.bf16.msra.mxu1 %v2929_v7 }
 0x594   :  { %2716 = vmatprep.subr.bf16.mxu1 %v3735_v0 }
 0x597   :  { %2717 = vmatpush3.bf16.msra.mxu1 %v2930_v8  ;;  %v2951_v8 = vld [vmem:[#allocation32] sm:$0xff]  }
 0x598   :  { %2718 = vmatprep.subr.bf16.mxu1 %v3735_v0 }
 0x59b   :  { %2719 = vmatpush3.bf16.msra.mxu1 %v2931_v9  ;;  %v2952_v9 = vld [vmem:[#allocation32 + $0x8] sm:$0xff]  }
 0x59c   :  { %2744 = vmatprep.subr.bf16.mxu1 %v3735_v0 }
 0x5f0   :  { %v1085_v15 = vpop.permute.xlu0 %1084 }
 0x5f4   :  { %v1922_v18 = vpop.permute.xlu0 %1921 }
 0x5f5   :  { %v4383_v19 = vsel %vm467_vm1, %v1927_v58, %v1922_v18  ;;  %v2945_v58 = vld [vmem:[#allocation29 + $0x18] sm:$0xff]  }
 0x5f8   :  { %v1932_v21 = vpop.permute.xlu0 %1931 }
 0x5f9   :  { %v1940_v22 = vsel %vm1098_vm4, %v1932_v21, %v1935_v20 }
 0x5fa   :  { %v1941_v23 = vsel %vm467_vm1, %v1940_v22, %v4341_v54 }
 0x5fc   :  { %v1938_v24 = vpop.permute.xlu0 %1937 }
 0x5fd   :  { %v4390_v25 = vsel %vm4686_vm6, %v1941_v23, %v1938_v24 }
 0x600   :  { %v2151_v24 = vpop.permute.xlu0 %2150 }
 0x651   :  { %v822_v27 = vpop.f32.mrb[4].mxu1 }
 0x652   :  { %v823_v28 = vadd.f32 %v2376_v26, %v822_v27  ;;  %v2702_v29 = vpop.f32.mrb[5].mxu1  ;;  %v2153_v26 = vsel %vm1098_vm4, %v2151_v24, 0.0  ;;  %v1892_v27 = vpop.permute.xlu0 %1891  ;;  %v2997_v24 = vld [vmem:[#allocation41 + $0xa0] ss:$16 sps:$4 sm:$0xff]  }
 0x653   :  { %v825_v30 = vpop.f32.mrb[6].mxu1 }
 0x654   :  { %vm828_vm7 = vcmp.gt.f32.partialorder %v823_v28, 0.0  ;;  %v829_v31 = vmul.f32 0.01, %v823_v28  ;;  %v2703_v32 = vpop.f32.mrb[7].mxu1 }
 0x655   :  { %v2403_v32 = vld [vmem:[#allocation31] ss:$0 sm:$0xff] }
 0x656   :  { %v830_v33 = vsel %vm828_vm7, %v823_v28, %v829_v31  ;;  %v1888_v28 = vadd.f32 1.0, %v4335_v48 }
 0x657   :  { %v831_v35 = vpack.c.bf16 %v830_v33, %v830_v33 }
 0x658   :  { %v1894_v29 = vsub.f32 %v1888_v28, %v1892_v27  ;;  %v3005_v27 = vld [vmem:[#allocation41 + $0xc4] ss:$16 sps:$4 sm:$0xff]   ;;  %v3008_v28 = vld [vmem:[#allocation41 + $0xcc] ss:$16 sps:$4 sm:$0xff]  }
 0x659   :  { %2721 = vmatmul.mubr.bf16.vlgmr.msra.gmra.mrb[8].mxu1 %v831_v35 }
 0x65a   :  { %2745 = vmatpush3.bf16.msra.mxu1 %v2932_v34  ;;  %2748 = vmatprep.mubr.msk.bf16.mxu1 %vm3736_vm0, %v3735_v0  ;;  %v1897_v30 = vsub.f32 %v1894_v29, %v4341_v54  ;;  %v3003_v29 = vld [vmem:[#allocation41 + $0xc0] ss:$16 sps:$4 sm:$0xff]  }
 0x65b   :  { %2746 = vmatprep.subr.bf16.mxu1 %v3735_v0 }
 0x65c   :  { %v1898_v31 = vmul.f32 -0.5, %v1897_v30  ;;  %v3006_v30 = vld [vmem:[#allocation41 + $0xc8] ss:$16 sps:$4 sm:$0xff]  }
 0x65e   :  { %2747 = vmatpush3.bf16.msra.mxu1 %v2933_v36 }
 0x65f   :  { %2772 = vmatprep.subr.bf16.mxu1 %v3735_v0 }
 0x661   :  { %2749 = vmatmul.mubr.msk.bf16.vlgmr.msra.gmra.mrb[12].mxu1 %vm1098_vm4, %v1085_v15  ;;  %v2390_v15 = vld [vmem:[#allocation25] ss:$0 sm:$0xff] }
 0x662   :  { %2788 = vmatprep.mubr.msk.bf16.mxu1 %vm3736_vm0, %v3735_v0  ;;  %2773 = vmatpush3.bf16.msra.mxu1 %v2951_v8  ;;  %v2982_v8 = vld [vmem:[#allocation41 + $0x48] ss:$16 sps:$4 sm:$0xff]  }
 0x663   :  { %2774 = vmatprep.subr.bf16.mxu1 %v3735_v0 }
 0x666   :  { %2775 = vmatpush3.bf16.msra.mxu1 %v2952_v9  ;;  %v2987_v9 = vld [vmem:[#allocation41 + $0x64] ss:$16 sps:$4 sm:$0xff]  }
 0x667   :  { %2776 = vmatprep.subr.bf16.mxu1 %v3735_v0 }
 0x66a   :  { %2777 = vmatpush3.bf16.msra.mxu1 %v2953_v10  ;;  %v2990_v10 = vld [vmem:[#allocation41 + $0x6c] ss:$16 sps:$4 sm:$0xff]  }
 0x66b   :  { %2778 = vmatprep.subr.bf16.mxu1 %v3735_v0 }
 0x66e   :  { %2779 = vmatpush3.bf16.msra.mxu1 %v2954_v11  ;;  %v2985_v11 = vld [vmem:[#allocation41 + $0x60] ss:$16 sps:$4 sm:$0xff]  }
 0x66f   :  { %2780 = vmatprep.subr.bf16.mxu1 %v3735_v0 }
 0x672   :  { %2781 = vmatpush3.bf16.msra.mxu1 %v2955_v12  ;;  %v2988_v12 = vld [vmem:[#allocation41 + $0x68] ss:$16 sps:$4 sm:$0xff]  }
 0x673   :  { %2782 = vmatprep.subr.bf16.mxu1 %v3735_v0 }
 0x72c   :  { %v937_v40 = vpop.f32.mrb[8].mxu1 }
 0x72d   :  { %v938_v41 = vadd.f32 %v2381_v39, %v937_v40  ;;  %v2722_v42 = vpop.f32.mrb[9].mxu1  ;;  %v2959_v40 = vld [vmem:[#allocation38] sm:$0xff]  }
 0x72e   :  { %v940_v43 = vpop.f32.mrb[10].mxu1 }
 0x72f   :  { %vm943_vm8 = vcmp.gt.f32.partialorder %v938_v41, 0.0  ;;  %v944_v45 = vmul.f32 0.01, %v938_v41  ;;  %v2723_v46 = vpop.f32.mrb[11].mxu1  ;;  %v2960_v43 = vld [vmem:[#allocation38 + $0x8] sm:$0xff]  }
 0x730   :  { %v2961_v46 = vld [vmem:[#allocation38 + $0x10] sm:$0xff]  }
 0x731   :  { %v945_v47 = vsel %vm943_vm8, %v938_v41, %v944_v45 }
 0x732   :  { %v946_v50 = vpack.c.bf16 %v945_v47, %v945_v47  ;;  %v2962_v47 = vld [vmem:[#allocation38 + $0x18] sm:$0xff]  }
 0x734   :  { %2741 = vmatmul.mubr.bf16.vlgmr.msra.gmra.mrb[8].mxu0 %v946_v50  ;;  %v1136_v51 = vpop.f32.mrb[12].mxu1  ;;  %v2421_v50 = vld [vmem:[#allocation37] ss:$0 sm:$0xff] }
 0x735   :  { %2753 = vmatpush3.bf16.msra.mxu0 %v2942_v49  ;;  %v2750_v52 = vpop.f32.mrb[13].mxu1  ;;  %2768 = vmatprep.mubr.msk.bf16.mxu0 %vm3736_vm0, %v3735_v0  ;;  %v1137_v1 = vadd.f32 %v2399_v60, %v1136_v51  ;;  %v2963_v49 = vld [vmem:[#allocation38 + $0x20] sm:$0xff]   ;;  %v2964_v51 = vld [vmem:[#allocation38 + $0x28] sm:$0xff]  }
 0x736   :  { %v1139_v55 = vpop.f32.mrb[14].mxu1  ;;  %2754 = vmatprep.subr.bf16.mxu0 %v3735_v0  ;;  %v2969_v60 = vld [vmem:[#allocation41 + $0x4] ss:$16 sps:$4 sm:$0xff]  }
 0x737   :  { %v2751_v56 = vpop.f32.mrb[15].mxu1  ;;  %v1143_v3 = vmul.f32 0.01, %v1137_v1  ;;  %vm1142_vm9 = vcmp.gt.f32.partialorder %v1137_v1, 0.0 }
 0x738   :  { %v2966_v56 = vld [vmem:[#allocation38 + $0x38] sm:$0xff]  }
 0x739   :  { %2755 = vmatpush3.bf16.msra.mxu0 %v2943_v53  ;;  %v1144_v5 = vsel %vm1142_vm9, %v1137_v1, %v1143_v3  ;;  %v2965_v53 = vld [vmem:[#allocation38 + $0x30] sm:$0xff]  }
 0x73a   :  { %2756 = vmatprep.subr.bf16.mxu0 %v3735_v0  ;;  %v1145_v7 = vpack.c.bf16 %v1144_v5, %v1144_v5  ;;  %v2972_v1 = vld [vmem:[#allocation41 + $0xc] ss:$16 sps:$4 sm:$0xff]   ;;  %v2975_v3 = vld [vmem:[#allocation41 + $0x24] ss:$16 sps:$4 sm:$0xff]  }
 0x73b   :  { %v2978_v5 = vld [vmem:[#allocation41 + $0x2c] ss:$16 sps:$4 sm:$0xff]  }
 0x73d   :  { %2757 = vmatpush3.bf16.msra.mxu0 %v2944_v57 }
 0x73e   :  { %2758 = vmatprep.subr.bf16.mxu0 %v3735_v0 }
 0x741   :  { %2759 = vmatpush3.bf16.msra.mxu0 %v2945_v58 }
 0x742   :  { %2760 = vmatprep.subr.bf16.mxu0 %v3735_v0 }
 0x745   :  { %2761 = vmatpush3.bf16.msra.mxu0 %v2946_v59  ;;  %v2967_v59 = vld [vmem:[#allocation41] ss:$16 sps:$4 sm:$0xff]  }
 0x746   :  { %2762 = vmatprep.subr.bf16.mxu0 %v3735_v0 }
 0x749   :  { %2763 = vmatpush3.bf16.msra.mxu0 %v2947_v61  ;;  %v2970_v61 = vld [vmem:[#allocation41 + $0x8] ss:$16 sps:$4 sm:$0xff]  }
 0x74a   :  { %2764 = vmatprep.subr.bf16.mxu0 %v3735_v0 }
 0x74d   :  { %2765 = vmatpush3.bf16.msra.mxu0 %v2948_v2  ;;  %v2973_v2 = vld [vmem:[#allocation41 + $0x20] ss:$16 sps:$4 sm:$0xff]  }
 0x74e   :  { %2766 = vmatprep.subr.bf16.mxu0 %v3735_v0 }
 0x751   :  { %2767 = vmatpush3.bf16.msra.mxu0 %v2949_v4  ;;  %v2976_v4 = vld [vmem:[#allocation41 + $0x28] ss:$16 sps:$4 sm:$0xff]  }
 0x752   :  { %2792 = vmatprep.subr.bf16.mxu0 %v3735_v0 }
 0x754   :  { %2769 = vmatmul.mubr.bf16.vlgmr.msra.gmra.mrb[12].mxu0 %v1145_v7  ;;  %v2984_v7 = vld [vmem:[#allocation41 + $0x4c] ss:$16 sps:$4 sm:$0xff]  }
 0x755   :  { %2793 = vmatpush3.bf16.msra.mxu0 %v2950_v6  ;;  %2794 = vmatprep.mubr.msk.bf16.mxu0 %vm3736_vm0, %v3735_v0  ;;  %v2981_v6 = vld [vmem:[#allocation41 + $0x44] ss:$16 sps:$4 sm:$0xff]  }
 0x756   :  { %1763 = vmatprep.subr.bf16.mxu0 %v2969_v60 }
 0x75c   :  { %2795 = vmatmul.mubr.msk.bf16.vlgmr.msra.gmra.mrb[16].mxu0 %vm4683_vm10, %v4352_v63  ;;  %v2956_v63 = vld [vmem:[#allocation32 + $0x28] sm:$0xff]  }
 0x75d   :  { %2783 = vmatpush3.bf16.msra.mxu1 %v2956_v63  ;;  %1764 = vmatpush1.bf16.msra.mxu0 %v2967_v59  ;;  %v2993_v63 = vld [vmem:[#allocation41 + $0x84] ss:$16 sps:$4 sm:$0xff]  }
 0x75e   :  { %2784 = vmatprep.subr.bf16.mxu1 %v3735_v0  ;;  %1765 = vmatprep.subr.bf16.mxu0 %v2975_v3 }
 0x761   :  { %2785 = vmatpush3.bf16.msra.mxu1 %v2957_v13  ;;  %1766 = vmatpush1.bf16.msra.mxu0 %v2973_v2  ;;  %v2996_v13 = vld [vmem:[#allocation41 + $0x8c] ss:$16 sps:$4 sm:$0xff]  }
 0x762   :  { %2786 = vmatprep.subr.bf16.mxu1 %v3735_v0  ;;  %1767 = vmatprep.subr.bf16.mxu0 %v2981_v6 }
 0x765   :  { %2787 = vmatpush3.bf16.msra.mxu1 %v2958_v14  ;;  %v2991_v14 = vld [vmem:[#allocation41 + $0x80] ss:$16 sps:$4 sm:$0xff]  }
 0x766   :  { %2798 = vmatprep.subr.bf16.mxu1 %v3735_v0 }
 0x807   :  { %v1052_v16 = vpop.f32.mrb[8].mxu0 }
 0x808   :  { %v4423_v18 = vadd.f32 %v2390_v15, %v1052_v16  ;;  %v2742_v20 = vpop.f32.mrb[9].mxu0  ;;  %v2994_v16 = vld [vmem:[#allocation41 + $0x88] ss:$16 sps:$4 sm:$0xff]  }
 0x809   :  { %v1055_v21 = vpop.f32.mrb[10].mxu0  ;;  %v2999_v20 = vld [vmem:[#allocation41 + $0xa4] ss:$16 sps:$4 sm:$0xff]  }
 0x80a   :  { %v2743_v22 = vpop.f32.mrb[11].mxu0  ;;  %v1059_v23 = vsel %vm4684_vm11, %v4423_v18, -inf }
 0x80b   :  { %1060 = vmax.xlane.f32.xlu1 %v1059_v23  ;;  %v3002_v22 = vld [vmem:[#allocation41 + $0xac] ss:$16 sps:$4 sm:$0xff]  }
 0x80f   :  { %2154 = vadd.xlane.f32.xlu1 %v2153_v26  ;;  %v3000_v26 = vld [vmem:[#allocation41 + $0xa8] ss:$16 sps:$4 sm:$0xff]  }
 0x820   :  { %1900 = vrot.lane.b32.xlu1 %v1898_v31, %s3738_s29 }
 0x827   :  { %v1251_v33 = vpop.f32.mrb[12].mxu0 }
 0x828   :  { %v1252_v34 = vadd.f32 %v2403_v32, %v1251_v33  ;;  %v2770_v35 = vpop.f32.mrb[13].mxu0  ;;  %v3014_v32 = vld [vmem:[#allocation41 + $0xec] ss:$16 sps:$4 sm:$0xff]   ;;  %v3009_v33 = vld [vmem:[#allocation41 + $0xe0] ss:$16 sps:$4 sm:$0xff]  }
 0x829   :  { %v1254_v36 = vpop.f32.mrb[14].mxu0 }
 0x82a   :  { %vm1257_vm12 = vcmp.gt.f32.partialorder %v1252_v34, 0.0  ;;  %v1258_v37 = vmul.f32 0.01, %v1252_v34  ;;  %v2771_v38 = vpop.f32.mrb[15].mxu0 }
 0x82b   :  { %v3742_v38 = vmov 0  }
 0x82c   :  { %v1259_v39 = vsel %vm1257_vm12, %v1252_v34, %v1258_v37  ;;  %v3012_v34 = vld [vmem:[#allocation41 + $0xe8] ss:$16 sps:$4 sm:$0xff]   ;;  %1795 = vmatprep.mubr.bf16.mxu0 %v3742_v38 }
 0x82d   :  { %v1260_v41 = vpack.c.bf16 %v1259_v39, %v1259_v39 }
 0x82f   :  { %2789 = vmatmul.mubr.bf16.vlgmr.msra.gmra.mrb[16].mxu1 %v1260_v41  ;;  %v1424_v42 = vpop.f32.mrb[16].mxu0 }
 0x830   :  { %2799 = vmatpush3.bf16.msra.mxu1 %v2959_v40  ;;  %v2796_v48 = vpop.f32.mrb[17].mxu0  ;;  %2814 = vmatprep.mubr.msk.bf16.mxu1 %vm3736_vm0, %v3735_v0  ;;  %v1425_v52 = vadd.f32 %v2421_v50, %v1424_v42  ;;  %v2412_v40 = vld [vmem:[#allocation34] ss:$0 sm:$0xff] }
 0x831   :  { %v1427_v54 = vpop.f32.mrb[18].mxu0  ;;  %2800 = vmatprep.subr.bf16.mxu1 %v3735_v0 }
 0x832   :  { %v2797_v45 = vpop.f32.mrb[19].mxu0  ;;  %v1431_v55 = vmul.f32 0.01, %v1425_v52  ;;  %vm1430_vm13 = vcmp.gt.f32.partialorder %v1425_v52, 0.0  ;;  %v2465_v54 = vld [vmem:[#allocation7] ss:$0 sm:$0xff] }
 0x833   :  { %v3033_v45 = vld [vmem:[#allocation2] sm:$0xff] }
 0x834   :  { %2801 = vmatpush3.bf16.msra.mxu1 %v2960_v43  ;;  %v1432_v57 = vsel %vm1430_vm13, %v1425_v52, %v1431_v55  ;;  %v2424_v52 = vld [vmem:[#allocation40] ss:$0 sm:$0xff] }
 0x835   :  { %2802 = vmatprep.subr.bf16.mxu1 %v3735_v0  ;;  %v1433_v58 = vpack.c.bf16 %v1432_v57, %v1432_v57 }
 0x838   :  { %2803 = vmatpush3.bf16.msra.mxu1 %v2961_v46 }
 0x839   :  { %2804 = vmatprep.subr.bf16.mxu1 %v3735_v0 }
 0x83c   :  { %2805 = vmatpush3.bf16.msra.mxu1 %v2962_v47 }
 0x83d   :  { %2806 = vmatprep.subr.bf16.mxu1 %v3735_v0 }
 0x840   :  { %2807 = vmatpush3.bf16.msra.mxu1 %v2963_v49 }
 0x841   :  { %2808 = vmatprep.subr.bf16.mxu1 %v3735_v0 }
 0x844   :  { %2809 = vmatpush3.bf16.msra.mxu1 %v2964_v51 }
 0x845   :  { %2810 = vmatprep.subr.bf16.mxu1 %v3735_v0 }
 0x848   :  { %2811 = vmatpush3.bf16.msra.mxu1 %v2965_v53 }
 0x849   :  { %2812 = vmatprep.subr.bf16.mxu1 %v3735_v0  ;;  %v2979_v0 = vld [vmem:[#allocation41 + $0x40] ss:$16 sps:$4 sm:$0xff]  }
 0x84a   :  { %1768 = vmatpush1.bf16.msra.mxu0 %v2979_v0 }
 0x84b   :  { %1769 = vmatprep.subr.bf16.mxu0 %v2987_v9 }
 0x84c   :  { %2813 = vmatpush3.bf16.msra.mxu1 %v2966_v56 }
 0x84d   :  { %1804 = vmatprep.subr.bf16.mxu1 %v2972_v1  ;;  %v1583_v1 = vlaneseq }
 0x84e   :  { %1770 = vmatpush1.bf16.msra.mxu0 %v2985_v11 }
 0x84f   :  { %2815 = vmatmul.mubr.bf16.vlgmr.msra.gmra.mrb[20].mxu1 %v1433_v58  ;;  %1771 = vmatprep.subr.bf16.mxu0 %v2993_v63  ;;  %v4452_v2 = vshrl.u32 %v1583_v1, 7  ;;  %v4454_v3 = vand.u32 127, %v1583_v1 }
 0x850   :  { %1805 = vmatpush1.bf16.msra.mxu1 %v2970_v61  ;;  %1836 = vmatprep.mubr.bf16.mxu1 %v3742_v38 }
 0x851   :  { %1806 = vmatprep.subr.bf16.mxu1 %v2978_v5  ;;  %v1968_v5 = vadd.s32 128, %v4452_v2  ;;  %v1969_v6 = vadd.s32 136, %v4452_v2  ;;  %v1970_v9 = vadd.s32 144, %v4452_v2  ;;  %v1954_v11 = vadd.s32 16, %v4452_v2 }
 0x852   :  { %1772 = vmatpush1.bf16.msra.mxu0 %v2991_v14  ;;  %v1955_v63 = vadd.s32 24, %v4452_v2  ;;  %v1973_v14 = vadd.s32 168, %v4452_v2 }
 0x853   :  { %1773 = vmatprep.subr.bf16.mxu0 %v2999_v20  ;;  %v1974_v20 = vadd.s32 176, %v4452_v2 }
 0x854   :  { %1807 = vmatpush1.bf16.msra.mxu1 %v2976_v4  ;;  %v2019_v4 = vadd.s32 1, %v4454_v3 }
 0x855   :  { %1808 = vmatprep.subr.bf16.mxu1 %v2984_v7  ;;  %v4460_v7 = vmul.u32 32, %v4454_v3 }
 0x856   :  { %1774 = vmatpush1.bf16.msra.mxu0 %v2997_v24  ;;  %v4462_v0 = vmul.u32 32, %v2019_v4 }
 0x857   :  { %1775 = vmatprep.subr.bf16.mxu0 %v3005_v27  ;;  %vm2003_vm15 = vcmp.ge.s32.totalorder %v1968_v5, %v4460_v7  ;;  %vm2004_vm0 = vcmp.ge.s32.totalorder %v1969_v6, %v4460_v7  ;;  %vm1987_vm4 = vcmp.ge.s32.totalorder %v4452_v2, %v4460_v7  ;;  %v1977_v27 = vadd.s32 200, %v4452_v2 }
 0x858   :  { %1809 = vmatpush1.bf16.msra.mxu1 %v2982_v8  ;;  %v1953_v8 = vadd.s32 8, %v4452_v2  ;;  %vm2038_vm2 = vcmp.lt.s32.totalorder %v1969_v6, %v4462_v0  ;;  %vm2021_vm5 = vcmp.lt.s32.totalorder %v4452_v2, %v4462_v0 }
 0x859   :  { %1810 = vmatprep.subr.bf16.mxu1 %v2990_v10  ;;  %vm2070_vm7 = vmand %vm2004_vm0, %vm2038_vm2  ;;  %v1971_v10 = vadd.s32 152, %v4452_v2 }
 0x85a   :  { %1776 = vmatpush1.bf16.msra.mxu0 %v3003_v29  ;;  %vm1988_vm8 = vcmp.ge.s32.totalorder %v1953_v8, %v4460_v7  ;;  %vm2022_vm9 = vcmp.lt.s32.totalorder %v1953_v8, %v4462_v0  ;;  %vm2053_vm13 = vmand %vm1987_vm4, %vm2021_vm5  ;;  %vm2023_vm4 = vcmp.lt.s32.totalorder %v1954_v11, %v4462_v0  ;;  %v1961_v29 = vadd.s32 72, %v4452_v2 }
 0x85b   :  { %vm2054_vm0 = vmand %vm1988_vm8, %vm2022_vm9  ;;  %vm2040_vm2 = vcmp.lt.s32.totalorder %v1971_v10, %v4462_v0  ;;  %vm2024_vm8 = vcmp.lt.s32.totalorder %v1955_v63, %v4462_v0 }
 0x85c   :  { %1811 = vmatpush1.bf16.msra.mxu1 %v2988_v12  ;;  %v3743_v12 = vmov 1.0|1.0  }
 0x85d   :  { %1812 = vmatprep.subr.bf16.mxu1 %v2996_v13  ;;  %v1972_v13 = vadd.s32 160, %v4452_v2 }
 0x860   :  { %1813 = vmatpush1.bf16.msra.mxu1 %v2994_v16  ;;  %v1957_v16 = vadd.s32 40, %v4452_v2 }
 0x861   :  { %1814 = vmatprep.subr.bf16.mxu1 %v3002_v22  ;;  %v1958_v22 = vadd.s32 48, %v4452_v2 }
 0x864   :  { %1815 = vmatpush1.bf16.msra.mxu1 %v3000_v26  ;;  %v1976_v26 = vadd.s32 192, %v4452_v2 }
 0x865   :  { %1816 = vmatprep.subr.bf16.mxu1 %v3008_v28  ;;  %v1960_v28 = vadd.s32 64, %v4452_v2 }
 0x868   :  { %1817 = vmatpush1.bf16.msra.mxu1 %v3006_v30 }
 0x869   :  { %1818 = vmatprep.subr.bf16.mxu1 %v3014_v32  ;;  %v1979_v32 = vadd.s32 216, %v4452_v2 }
 0x86c   :  { %1819 = vmatpush1.bf16.msra.mxu1 %v3012_v34  ;;  %v1962_v34 = vadd.s32 80, %v4452_v2 }
 0x898   :  { %v1061_v15 = vpop.xlane.xlu1 %1060 }
 0x899   :  { %v1062_v21 = vsub.f32 %v4423_v18, %v1061_v15  ;;  %v3011_v18 = vld [vmem:[#allocation41 + $0xe4] ss:$16 sps:$4 sm:$0xff]   ;;  %v1956_v15 = vadd.s32 32, %v4452_v2 }
 0x89a   :  { %1777 = vmatprep.subr.bf16.mxu0 %v3011_v18  ;;  %v1978_v18 = vadd.s32 208, %v4452_v2 }
 0x89b   :  { %v1063_v23 = vmul.f32 1.442695, %v1062_v21  ;;  %1778 = vmatpush1.bf16.msra.mxu0 %v3009_v33  ;;  %v1975_v21 = vadd.s32 184, %v4452_v2 }
 0x89c   :  { %v4441_v31 = vpop.xlane.xlu1 %2154 }
 0x89d   :  { %3021 = vpow2.f32 %v1063_v23  ;;  %v1959_v23 = vadd.s32 56, %v4452_v2 }
 0x8a0   :  { %v1901_v37 = vpop.permute.xlu1 %1900 }
 0x8a1   :  { %v1903_v39 = vsel %vm4683_vm10, %v1901_v37, 0.0  ;;  %vm2820_vm10 = vmpackc.low %vm2054_vm0, %vm2053_vm13  ;;  %vm2008_vm0 = vcmp.ge.s32.totalorder %v1973_v14, %v4460_v7  ;;  %v1963_v37 = vadd.s32 88, %v4452_v2 }
 0x8a7   :  { %v4443_v35 = vpop.eup %3021 }
 0x8a8   :  { %v1065_v36 = vsel %vm4684_vm11, %v4443_v35, 0.0 }
 0x8a9   :  { %1066 = vadd.xlane.f32.xlu0 %v1065_v36 }
 0x8ad   :  { %1904 = vadd.xlane.f32.xlu0 %v1903_v39  ;;  %v1980_v39 = vadd.s32 224, %v4452_v2 }
 0x902   :  { %v1366_v41 = vpop.f32.mrb[16].mxu1 }
 0x903   :  { %v4448_v42 = vadd.f32 %v2412_v40, %v1366_v41  ;;  %v2790_v48 = vpop.f32.mrb[17].mxu1  ;;  %v1981_v40 = vadd.s32 232, %v4452_v2  ;;  %v1964_v41 = vadd.s32 96, %v4452_v2 }
 0x904   :  { %v1369_v43 = vpop.f32.mrb[18].mxu1  ;;  %v1965_v48 = vadd.s32 104, %v4452_v2 }
 0x905   :  { %v1874_v46 = vsub.f32 %v3033_v45, %v4448_v42  ;;  %v2791_v47 = vpop.f32.mrb[19].mxu1  ;;  %v1983_v45 = vadd.s32 248, %v4452_v2 }
 0x906   :  { %v1966_v47 = vadd.s32 112, %v4452_v2 }
 0x907   :  { %v1882_v49 = vmul.f32 %v2465_v54, %v1874_v46  ;;  %v1982_v54 = vadd.s32 240, %v4452_v2 }
 0x909   :  { %v1883_v50 = vmul.f32 %v1882_v49, %v1882_v49  ;;  %v1967_v49 = vadd.s32 120, %v4452_v2 }
 0x90b   :  { %v1884_v51 = vsel %vm467_vm1, %v1883_v50, 0.0  ;;  %vm2037_vm1 = vcmp.lt.s32.totalorder %v1968_v5, %v4462_v0 }
 0x90c   :  { %1885 = vadd.xlane.f32.xlu0 %v1884_v51  ;;  %vm2069_vm3 = vmand %vm2003_vm15, %vm2037_vm1  ;;  %vm2039_vm15 = vcmp.lt.s32.totalorder %v1970_v9, %v4462_v0  ;;  %vm2006_vm1 = vcmp.ge.s32.totalorder %v1971_v10, %v4460_v7  ;;  %v1585_v51 = vsub.s32 0, %v4452_v2 }
 0x90d   :  { %vm2818_vm12 = vmpackc.low %vm2070_vm7, %vm2069_vm3  ;;  %vm1989_vm7 = vcmp.ge.s32.totalorder %v1954_v11, %v4460_v7 }
 0x90e   :  { %2819 = vmatprep.subr.msk.bf16.mxu0 %vm2818_vm12, %v3743_v12  ;;  %vm2072_vm5 = vmand %vm2006_vm1, %vm2040_vm2  ;;  %vm1990_vm12 = vcmp.ge.s32.totalorder %v1955_v63, %v4460_v7  ;;  %vm2042_vm1 = vcmp.lt.s32.totalorder %v1973_v14, %v4462_v0 }
 0x90f   :  { %vm2055_vm13 = vmand %vm1989_vm7, %vm2023_vm4  ;;  %vm2025_vm7 = vcmp.lt.s32.totalorder %v1956_v15, %v4462_v0 }
 0x910   :  { %vm2074_vm4 = vmand %vm2008_vm0, %vm2042_vm1  ;;  %vm2010_vm0 = vcmp.ge.s32.totalorder %v1975_v21, %v4460_v7  ;;  %vm2044_vm1 = vcmp.lt.s32.totalorder %v1975_v21, %v4462_v0 }
 0x922   :  { %v1539_v53 = vpop.f32.mrb[20].mxu1 }
 0x923   :  { %v1540_v55 = vadd.f32 %v2424_v52, %v1539_v53  ;;  %v2816_v56 = vpop.f32.mrb[21].mxu1  ;;  %v1593_v52 = vsub.s32 2, %v4452_v2  ;;  %v1581_v53 = vld [vmem:[#allocation43] sm:$0xf] }
 0x924   :  { %v1542_v57 = vpop.f32.mrb[22].mxu1  ;;  %v1597_v56 = vsub.s32 3, %v4452_v2 }
 0x925   :  { %vm1545_vm14 = vcmp.gt.f32.partialorder %v1540_v55, 0.0  ;;  %v1546_v58 = vmul.f32 0.01, %v1540_v55  ;;  %v2817_v59 = vpop.f32.mrb[23].mxu1  ;;  %v1586_v57 = vrot.slane %v1581_v53, %v1585_v51 }
 0x927   :  { %v1547_v60 = vsel %vm1545_vm14, %v1540_v55, %v1546_v58  ;;  %vm2005_vm14 = vcmp.ge.s32.totalorder %v1970_v9, %v4460_v7  ;;  %v1589_v55 = vsub.s32 1, %v4452_v2  ;;  %v1594_v58 = vrot.slane %v1581_v53, %v1593_v52 }
 0x928   :  { %v1548_v61 = vpack.c.bf16 %v1547_v60, %v1547_v60  ;;  %vm2071_vm3 = vmand %vm2005_vm14, %vm2039_vm15  ;;  %vm2041_vm14 = vcmp.lt.s32.totalorder %v1972_v13, %v4462_v0  ;;  %v1598_v60 = vrot.slane %v1581_v53, %v1597_v56 }
 0x929   :  { %vm2822_vm9 = vmpackc.low %vm2072_vm5, %vm2071_vm3  ;;  %vm1991_vm5 = vcmp.ge.s32.totalorder %v1956_v15, %v4460_v7  ;;  %v1590_v59 = vrot.slane %v1581_v53, %v1589_v55 }
 0x92a   :  { %1796 = vmatmul.mubr.bf16.vlgmr.msra.gmra.mrb[20].mxu0 %v1548_v61  ;;  %1837 = vmatmul.mubr.bf16.vlgmr.msra.gmra.mrb[24].mxu1 %v1548_v61  ;;  %vm2056_vm15 = vmand %vm1990_vm12, %vm2024_vm8  ;;  %vm2026_vm12 = vcmp.lt.s32.totalorder %v1957_v16, %v4462_v0 }
 0x92b   :  { %2821 = vmatpush3.bf16.msk.msra.mxu0 %vm2820_vm10, %v3743_v12  ;;  %vm2007_vm10 = vcmp.ge.s32.totalorder %v1972_v13, %v4460_v7  ;;  %vm2824_vm2 = vmpackc.low %vm2056_vm15, %vm2055_vm13  ;;  %vm2009_vm15 = vcmp.ge.s32.totalorder %v1974_v20, %v4460_v7 }
 0x92c   :  { %2823 = vmatprep.subr.msk.bf16.mxu0 %vm2822_vm9, %v3743_v12  ;;  %vm2073_vm3 = vmand %vm2007_vm10, %vm2041_vm14  ;;  %vm1992_vm9 = vcmp.ge.s32.totalorder %v1957_v16, %v4460_v7  ;;  %vm2043_vm10 = vcmp.lt.s32.totalorder %v1974_v20, %v4462_v0 }
 0x92d   :  { %vm2826_vm8 = vmpackc.low %vm2074_vm4, %vm2073_vm3 }
 0x92e   :  { %vm2057_vm13 = vmand %vm1991_vm5, %vm2025_vm7  ;;  %vm1993_vm5 = vcmp.ge.s32.totalorder %v1958_v22, %v4460_v7  ;;  %vm2027_vm7 = vcmp.lt.s32.totalorder %v1958_v22, %v4462_v0 }
 0x92f   :  { %2825 = vmatpush3.bf16.msk.msra.mxu0 %vm2824_vm2, %v3743_v12  ;;  %vm2058_vm14 = vmand %vm1992_vm9, %vm2026_vm12  ;;  %vm2028_vm9 = vcmp.lt.s32.totalorder %v1959_v23, %v4462_v0 }
 0x930   :  { %2827 = vmatprep.subr.msk.bf16.mxu0 %vm2826_vm8, %v3743_v12  ;;  %vm2828_vm2 = vmpackc.low %vm2058_vm14, %vm2057_vm13  ;;  %vm1994_vm8 = vcmp.ge.s32.totalorder %v1959_v23, %v4460_v7  ;;  %vm2011_vm14 = vcmp.ge.s32.totalorder %v1976_v26, %v4460_v7 }
 0x931   :  { %vm2075_vm3 = vmand %vm2009_vm15, %vm2043_vm10  ;;  %vm2045_vm15 = vcmp.lt.s32.totalorder %v1976_v26, %v4462_v0 }
 0x932   :  { %vm2076_vm4 = vmand %vm2010_vm0, %vm2044_vm1  ;;  %vm2012_vm0 = vcmp.ge.s32.totalorder %v1977_v27, %v4460_v7  ;;  %vm2046_vm1 = vcmp.lt.s32.totalorder %v1977_v27, %v4462_v0 }
 0x933   :  { %2829 = vmatpush3.bf16.msk.msra.mxu0 %vm2828_vm2, %v3743_v12  ;;  %vm2830_vm12 = vmpackc.low %vm2076_vm4, %vm2075_vm3 }
 0x934   :  { %2831 = vmatprep.subr.msk.bf16.mxu0 %vm2830_vm12, %v3743_v12  ;;  %vm2059_vm13 = vmand %vm1993_vm5, %vm2027_vm7  ;;  %vm1995_vm5 = vcmp.ge.s32.totalorder %v1960_v28, %v4460_v7  ;;  %vm2029_vm7 = vcmp.lt.s32.totalorder %v1960_v28, %v4462_v0 }
 0x935   :  { %vm2060_vm10 = vmand %vm1994_vm8, %vm2028_vm9  ;;  %vm1996_vm8 = vcmp.ge.s32.totalorder %v1961_v29, %v4460_v7  ;;  %vm2030_vm9 = vcmp.lt.s32.totalorder %v1961_v29, %v4462_v0 }
 0x936   :  { %v1067_v24 = vpop.xlane.xlu0 %1066  ;;  %vm2832_vm2 = vmpackc.low %vm2060_vm10, %vm2059_vm13  ;;  %vm4685_vm10 = vcmask 7168  }
 0x937   :  { %3023 = vrcp.f32 %v1067_v24  ;;  %2833 = vmatpush3.bf16.msk.msra.mxu0 %vm2832_vm2, %v3743_v12  ;;  %vm2077_vm3 = vmand %vm2011_vm14, %vm2045_vm15  ;;  %vm2013_vm14 = vcmp.ge.s32.totalorder %v1978_v18, %v4460_v7  ;;  %vm2047_vm15 = vcmp.lt.s32.totalorder %v1978_v18, %v4462_v0  ;;  %vm2048_vm2 = vcmp.lt.s32.totalorder %v1979_v32, %v4462_v0 }
 0x938   :  { %vm2078_vm4 = vmand %vm2012_vm0, %vm2046_vm1  ;;  %vm2014_vm1 = vcmp.ge.s32.totalorder %v1979_v32, %v4460_v7 }
 0x939   :  { %vm2834_vm12 = vmpackc.low %vm2078_vm4, %vm2077_vm3  ;;  %vm2031_vm4 = vcmp.lt.s32.totalorder %v1962_v34, %v4462_v0 }
 0x93a   :  { %v4524_v30 = vpop.xlane.xlu0 %1904  ;;  %2835 = vmatprep.subr.msk.bf16.mxu0 %vm2834_vm12, %v3743_v12  ;;  %vm2061_vm13 = vmand %vm1995_vm5, %vm2029_vm7  ;;  %vm1997_vm7 = vcmp.ge.s32.totalorder %v1962_v34, %v4460_v7  ;;  %vm2032_vm12 = vcmp.lt.s32.totalorder %v1963_v37, %v4462_v0 }
 0x93b   :  { %vm2062_vm0 = vmand %vm1996_vm8, %vm2030_vm9  ;;  %vm1998_vm9 = vcmp.ge.s32.totalorder %v1963_v37, %v4460_v7 }
 0x93c   :  { %vm2836_vm3 = vmpackc.low %vm2062_vm0, %vm2061_vm13  ;;  %vm2015_vm0 = vcmp.ge.s32.totalorder %v1980_v39, %v4460_v7 }
 0x93d   :  { %2837 = vmatpush3.bf16.msk.msra.mxu0 %vm2836_vm3, %v3743_v12  ;;  %vm2079_vm5 = vmand %vm2013_vm14, %vm2047_vm15  ;;  %vm2049_vm14 = vcmp.lt.s32.totalorder %v1980_v39, %v4462_v0 }
 0x93e   :  { %vm2080_vm8 = vmand %vm2014_vm1, %vm2048_vm2  ;;  %vm2016_vm1 = vcmp.ge.s32.totalorder %v1981_v40, %v4460_v7  ;;  %vm2050_vm2 = vcmp.lt.s32.totalorder %v1981_v40, %v4462_v0 }
 0x93f   :  { %vm2838_vm11 = vmpackc.low %vm2080_vm8, %vm2079_vm5  ;;  %vm2000_vm8 = vcmp.ge.s32.totalorder %v1965_v48, %v4460_v7 }
 0x940   :  { %2839 = vmatprep.subr.msk.bf16.mxu0 %vm2838_vm11, %v3743_v12  ;;  %vm2063_vm13 = vmand %vm1997_vm7, %vm2031_vm4  ;;  %vm1999_vm11 = vcmp.ge.s32.totalorder %v1964_v41, %v4460_v7  ;;  %vm2033_vm7 = vcmp.lt.s32.totalorder %v1964_v41, %v4462_v0 }
 0x941   :  { %v3024_v43 = vpop.eup %3023  ;;  %vm2064_vm15 = vmand %vm1998_vm9, %vm2032_vm12  ;;  %vm2034_vm9 = vcmp.lt.s32.totalorder %v1965_v48, %v4462_v0  ;;  %v2226_v48 = vadd.f32 32.0, %v4441_v31 }
 0x942   :  { %vm2840_vm3 = vmpackc.low %vm2064_vm15, %vm2063_vm13  ;;  %v1069_v46 = vmul.f32 %v3024_v43, %v4443_v35 }
 0x943   :  { %2841 = vmatpush3.bf16.msk.msra.mxu0 %vm2840_vm3, %v3743_v12  ;;  %vm2081_vm5 = vmand %vm2015_vm0, %vm2049_vm14  ;;  %vm2017_vm0 = vcmp.ge.s32.totalorder %v1982_v54, %v4460_v7  ;;  %vm2051_vm14 = vcmp.lt.s32.totalorder %v1982_v54, %v4462_v0  ;;  %vm2018_vm3 = vcmp.ge.s32.totalorder %v1983_v45, %v4460_v7 }
 0x944   :  { %vm2082_vm4 = vmand %vm2016_vm1, %vm2050_vm2  ;;  %vm2052_vm1 = vcmp.lt.s32.totalorder %v1983_v45, %v4462_v0  ;;  %v1070_v35 = vmul.f32 0.999999, %v1069_v46 }
 0x945   :  { %vm2842_vm12 = vmpackc.low %vm2082_vm4, %vm2081_vm5  ;;  %vm2001_vm4 = vcmp.ge.s32.totalorder %v1966_v47, %v4460_v7 }
 0x946   :  { %2843 = vmatprep.subr.msk.bf16.mxu0 %vm2842_vm12, %v3743_v12  ;;  %vm2065_vm13 = vmand %vm1999_vm11, %vm2033_vm7  ;;  %vm2035_vm11 = vcmp.lt.s32.totalorder %v1966_v47, %v4462_v0  ;;  %vm2002_vm12 = vcmp.ge.s32.totalorder %v1967_v49, %v4460_v7  ;;  %v4577_v50 = vadd.f32 1.25e-07, %v1070_v35 }
 0x947   :  { %vm2066_vm15 = vmand %vm2000_vm8, %vm2034_vm9 }
 0x948   :  { %vm2844_vm2 = vmpackc.low %vm2066_vm15, %vm2065_vm13 }
 0x949   :  { %2845 = vmatpush3.bf16.msk.msra.mxu0 %vm2844_vm2, %v3743_v12  ;;  %vm2083_vm5 = vmand %vm2017_vm0, %vm2051_vm14  ;;  %vm4720_vm14 = vcmask 7168  }
 0x94a   :  { %vm2084_vm7 = vmand %vm2018_vm3, %vm2052_vm1  ;;  %v2249_v35 = vsel %vm4720_vm14, %v4524_v30, 0.0 }
 0x94b   :  { %vm2846_vm6 = vmpackc.low %vm2084_vm7, %vm2083_vm5  ;;  %vm1860_vm5 = vcmask 195584  }
 0x94c   :  { %2847 = vmatprep.subr.msk.bf16.mxu0 %vm2846_vm6, %v3743_v12  ;;  %vm2067_vm8 = vmand %vm2001_vm4, %vm2035_vm11  ;;  %vm4717_vm6 = vcmask 785408   ;;  %vm1862_vm4 = vcmask 719872   ;;  %vm4725_vm11 = vcmask 130048  }
 0x94d   :  { %vm4721_vm15 = vmmov %vm4720_vm14 }
 0x94e   :  { %vm4723_vm1 = vmmov %vm4720_vm14 }
 0x94f   :  { %vm4724_vm2 = vmmov %vm4717_vm6 }
 0x999   :  { %v1886_v33 = vpop.xlane.xlu0 %1885 }
 0x99a   :  { %v1887_v36 = vmul.f32 0.5, %v1886_v33 }
 0x99c   :  { %v2238_v38 = vsel %vm4685_vm10, %v1887_v36, 0.0  ;;  %vm2036_vm10 = vcmp.lt.s32.totalorder %v1967_v49, %v4462_v0  ;;  %v1929_v0 = vsel %vm4717_vm6, %v4383_v19, %v4379_v17 }
 0x99d   :  { %2239 = vadd.xlane.f32.xlu1 %v2238_v38  ;;  %vm2068_vm9 = vmand %vm2002_vm12, %vm2036_vm10  ;;  %vm4718_vm10 = vcmask 64512  }
 0x99e   :  { %vm2848_vm13 = vmpackc.low %vm2068_vm9, %vm2067_vm8 }
 0x99f   :  { %2849 = vmatpush3.bf16.msk.msra.mxu0 %vm2848_vm13, %v3743_v12  ;;  %vm4719_vm0 = vmmov %vm4718_vm10 }
 0x9a0   :  { %v2233_v49 = vsel %vm4719_vm0, %v4577_v50, -inf  ;;  %vm4722_vm3 = vmmov %vm4719_vm0 }
 0x9a1   :  { %v2282_v31 = vsel %vm4722_vm3, %v4577_v50, 0.0 }
 0x9a2   :  { %v2283_v56 = vrot.slane %v2282_v31, 4 }
 0x9ae   :  { %1850 = vrot.lane.b32.xlu1 %v4577_v50, %s3720_s26 }
 0x9fd   :  { %v1797_v61 = vpop.f32.mrb[20].mxu0  ;;  %v1838_v1 = vpop.f32.mrb[24].mxu1 }
 0x9fe   :  { %v1798_v4 = vadd.f32 %v1797_v61, %v1586_v57  ;;  %v1839_v5 = vadd.f32 %v1838_v1, %v1594_v58  ;;  %v1799_v6 = vpop.f32.mrb[21].mxu0  ;;  %v1840_v7 = vpop.f32.mrb[25].mxu1 }
 0x9ff   :  { %v1800_v8 = vadd.f32 %v1799_v6, %v1590_v59  ;;  %v1841_v9 = vadd.f32 %v1840_v7, %v1598_v60  ;;  %v1801_v10 = vpop.f32.mrb[22].mxu0  ;;  %v1842_v11 = vpop.f32.mrb[26].mxu1  ;;  %v2284_v59 = vadd.f32 %v2283_v56, %v2282_v31 }
 0xa00   :  { %v1943_v12 = vsub.f32 %v1798_v4, %v1929_v0  ;;  %3025 = vtanh.f32 %v1839_v5  ;;  %v1802_v2 = vpop.f32.mrb[23].mxu0  ;;  %v1843_v63 = vpop.f32.mrb[27].mxu1 }
 0xa01   :  { %v1944_v13 = vsub.f32 %v1800_v8, %v1929_v0  ;;  %3027 = vtanh.f32 %v1841_v9  ;;  %v2285_v1 = vrot.slane %v2284_v59, 2 }
 0xa02   :  { %v1945_v14 = vmul.f32 %v1943_v12, %v1943_v12 }
 0xa03   :  { %v1946_v15 = vmul.f32 %v1944_v13, %v1944_v13  ;;  %v2286_v5 = vadd.f32 %v2285_v1, %v2284_v59 }
 0xa04   :  { %v1947_v16 = vadd.f32 %v1945_v14, %v4390_v25 }
 0xa05   :  { %v1948_v20 = vadd.f32 %v1946_v15, %v4390_v25  ;;  %v2287_v7 = vrot.slane %v2286_v5, 1 }
 0xa07   :  { %v2288_v0 = vadd.f32 %v2287_v7, %v2286_v5 }
 0xa0a   :  { %v3026_v21 = vpop.eup %3025 }
 0xa0b   :  { %v3028_v22 = vpop.eup %3027  ;;  %v1908_v23 = vsub.f32 0.0, %v3026_v21 }
 0xa0c   :  { %v1909_v17 = vsub.f32 0.0, %v3028_v22 }
 0xa0d   :  { %v1910_v19 = vmul.f32 1.442695, %v1908_v23 }
 0xa0e   :  { %v1912_v24 = vmul.f32 1.442695, %v1909_v17 }
 0xa0f   :  { %3029 = vpow2.f32 %v1910_v19 }
 0xa10   :  { %3031 = vpow2.f32 %v1912_v24 }
 0xa19   :  { %v3030_v26 = vpop.eup %3029 }
 0xa1a   :  { %v3032_v27 = vpop.eup %3031  ;;  %v1949_v28 = vmul.f32 %v3030_v26, %v1947_v16 }
 0xa1b   :  { %v1950_v29 = vmul.f32 %v3032_v27, %v1948_v20 }
 0xa1c   :  { %v1951_v18 = vadd.f32 %v3026_v21, %v1949_v28 }
 0xa1d   :  { %v1952_v32 = vadd.f32 %v3028_v22, %v1950_v29 }
 0xa1f   :  { %2220 = vmatprep.mubr.f32.mxu0 %v1952_v32 }
 0xa20   :  { %2221 = vmatmul.mubr.f32.vlgmr.msra.gmra.mrb[24].mxu0 %v1951_v18 }
 0xa2a   :  { %v2240_v33 = vpop.xlane.xlu1 %2239 }
 0xa2b   :  { %v2241_v34 = vrot.slane %v2240_v33, 4 }
 0xa2d   :  { %v2242_v36 = vadd.f32 %v2241_v34, %v2240_v33 }
 0xa2f   :  { %v2243_v25 = vrot.slane %v2242_v36, 2 }
 0xa31   :  { %v2244_v37 = vadd.f32 %v2243_v25, %v2242_v36 }
 0xa33   :  { %v2245_v38 = vrot.slane %v2244_v37, 1 }
 0xa35   :  { %v2246_v39 = vadd.f32 %v2245_v38, %v2244_v37 }
 0xa37   :  { %2850 = vpush %v2246_v39 }
 0xaf3   :  { %v2639_v40 = vpop.f32.mrb[24].mxu0 }
 0xaf4   :  { %v2640_v41 = vpop.f32.mrb[25].mxu0 }
 0xaf5   :  { %v2641_v43 = vadd.f32 %v2640_v41, %v2639_v40 }
 0xaf7   :  { %v2227_v54 = vsub.f32 %v2641_v43, %v2226_v48 }
 0xaf9   :  { %v2228_v45 = vmul.f32 0.5, %v2227_v54 }
 0xafb   :  { %v2229_v46 = vmul.f32 %v2228_v45, %v4577_v50 }
 0xafd   :  { %v2230_v47 = vsel %vm4718_vm10, %v2229_v46, 0.0 }
 0xafe   :  { %2231 = vadd.xlane.f32.xlu0 %v2230_v47 }
 0xb02   :  { %2234 = vmax.xlane.f32.xlu0 %v2233_v49 }
 0xb06   :  { %2250 = vadd.xlane.f32.xlu0 %v2249_v35 }
 0xb8b   :  { %v2232_v51 = vpop.xlane.xlu0 %2231 }
 0xb8c   :  { %v2260_v52 = vsel %vm4721_vm15, %v2232_v51, 0.0 }
 0xb8d   :  { %2261 = vadd.xlane.f32.xlu0 %v2260_v52 }
 0xb8f   :  { %v2235_v53 = vpop.xlane.xlu0 %2234 }
 0xb90   :  { %v2271_v55 = vsel %vm4723_vm1, %v2235_v53, 0.0 }
 0xb91   :  { %2272 = vadd.xlane.f32.xlu0 %v2271_v55 }
 0xb93   :  { %v2251_v57 = vpop.xlane.xlu0 %2250 }
 0xb94   :  { %v2252_v58 = vrot.slane %v2251_v57, 4 }
 0xb96   :  { %v2253_v60 = vadd.f32 %v2252_v58, %v2251_v57 }
 0xb98   :  { %v2254_v61 = vrot.slane %v2253_v60, 2 }
 0xb9a   :  { %v2255_v30 = vadd.f32 %v2254_v61, %v2253_v60 }
 0xb9c   :  { %v2256_v4 = vrot.slane %v2255_v30, 1 }
 0xb9e   :  { %v2257_v6 = vadd.f32 %v2256_v4, %v2255_v30 }
 0xba0   :  { %2852 = vpush %v2257_v6 }
 0xba7   :  { %2290 = vrot.lane.b32.xlu0 %v2288_v0, %s3707_s10  ;;  %s3745_s10 = smov [#allocation44]  }
 0xba8   :  { %s2316_s26 = sshll.u32 %s3745_s10, 4  ;;  %s2317_s26 = int_to_ptr.vmem [resolvable:$true] %s2316_s26 }
 0xba9   :  { %s3628_s7 = scalar_lea.vmem %s2317_s26, 256  ;;  %p3633_p7 = scmp.lt.s32.totalorder %s2317_s26, %s2317_s26 }
 0xbaa   :  { %p3629_p6 = scmp.ne.s32.totalorder %s2317_s26, %s3628_s7  ;;  %p3634_p8 = scmp.lt.s32.totalorder %s3628_s7, %s3628_s7 }
 0xbab   :  { %1846 = vrot.lane.b32.xlu0 %v4348_v62, %s3739_s2 }
 0xbac   :  { %p3635_p9 = por %p3634_p8, %p3633_p7 }
 0xbae   :  { %p3636_p10 = pnand %p3635_p9, %p3629_p6 }
 0xbaf   :  { %1854 = vrot.lane.b32.xlu0 %v4448_v42, %s3744_s5  ;;  %v1851_v42 = vpop.permute.xlu1 %1850 }
 0xc1a   :  { %v2262_v50 = vpop.xlane.xlu0 %2261 }
 0xc1b   :  { %v2263_v8 = vrot.slane %v2262_v50, 4 }
 0xc1d   :  { %v2264_v9 = vadd.f32 %v2263_v8, %v2262_v50 }
 0xc1e   :  { %v2273_v10 = vpop.xlane.xlu0 %2272 }
 0xc1f   :  { %v2265_v11 = vrot.slane %v2264_v9, 2  ;;  %v2274_v12 = vrot.slane %v2273_v10, 4 }
 0xc21   :  { %v2275_v2 = vadd.f32 %v2274_v12, %v2273_v10  ;;  %v2266_v63 = vadd.f32 %v2265_v11, %v2264_v9 }
 0xc22   :  { %v2291_v13 = vpop.permute.xlu0 %2290 }
 0xc23   :  { %v2276_v14 = vrot.slane %v2275_v2, 2  ;;  %v2267_v15 = vrot.slane %v2266_v63, 1 }
 0xc25   :  { %v2268_v16 = vadd.f32 %v2267_v15, %v2266_v63  ;;  %v2277_v20 = vadd.f32 %v2276_v14, %v2275_v2 }
 0xc26   :  { %v1847_v21 = vpop.permute.xlu0 %1846 }
 0xc27   :  { %v1858_v62 = vsel %vm4724_vm2, %v4326_v44, %v1847_v21  ;;  %2854 = vpush %v2268_v16  ;;  %v2278_v22 = vrot.slane %v2277_v20, 1  ;;  %v1859_v17 = vsel %vm4725_vm11, %v1847_v21, %v1851_v42 }
 0xc28   :  { %1864 = vst [vmem:[#allocation44] sm:$0xff] %v1858_v62 }
 0xc29   :  { %v2279_v23 = vadd.f32 %v2278_v22, %v2277_v20 }
 0xc2a   :  { %v1855_v19 = vpop.permute.xlu0 %1854 }
 0xc2b   :  { %v1861_v24 = vsel %vm1860_vm5, %v1859_v17, %v1855_v19  ;;  %2856 = vpush %v2279_v23 }
 0xc2c   :  { %v1863_v26 = vsel %vm1862_vm4, %v1861_v24, 0.0 }
 0xc2d   :  { %1865 = vst [vmem:[#allocation44 + $0x8] sm:$0xff] %v1863_v26 }
 0xc2e   :  { %3639 = shalt.err (!%p3636_p10)
}
 0xc2f   :  { %s4726_s15 = sld [smem:[#allocation77_spill]] }
 0xc35   :  { %s3640_s14 = scalar_lea.hbm %s4726_s15, 256 }
 0xc36   :  { %p3641_p11 = scmp.ne.s32.totalorder %s4726_s15, %s3640_s14  ;;  %p3644_p12 = scmp.lt.u32.totalorder %s3640_s14, %s4726_s15 }
 0xc38   :  { %p3646_p13 = pnand %p3644_p12, %p3641_p11 }
 0xc3a   :  { %3649 = shalt.err (!%p3646_p13)
}
 0xc3b   :  { %2319 = dma.vmem_to_hbm [thread:$0]  %s2317_s26, 256, %s4726_s15, [#allocation4]   ;;  %vm2293_vm7 = vcmask 31744   ;;  %vm2295_vm12 = vcmask 97280   ;;  %vm2297_vm8 = vcmp.eq.s32.totalorder %v4454_v3, 0  ;;  %vm2300_vm9 = vcmp.eq.s32.totalorder %v4454_v3, 1 }
 0xc3c   :  { %v2294_v44 = vsel %vm2293_vm7, 0.0, %v2291_v13  ;;  %s2851_s6 = spop %2850  ;;  %vm2303_vm13 = vcmp.eq.s32.totalorder %v4454_v3, 2  ;;  %s3746_s12 = smov [#allocation45]   ;;  %vm2306_vm6 = vcmp.eq.s32.totalorder %v4454_v3, 3 }
 0xc3d   :  { %v2296_v27 = vsel %vm2295_vm12, %v2294_v44, 0.0  ;;  %s2853_s9 = spop %2852  ;;  %v2298_v28 = vstv %s2851_s6  ;;  %s2326_s23 = sshll.u32 %s3746_s12, 4  ;;  %s2327_s23 = int_to_ptr.vmem [resolvable:$true] %s2326_s23 }
 0xc3e   :  { %v2299_v29 = vsel %vm2297_vm8, %v2298_v28, %v2296_v27  ;;  %v2301_v32 = vstv %s2853_s9  ;;  %s3650_s30 = scalar_lea.vmem %s2327_s23, 16  ;;  %s3654_s4 = scalar_lea.vmem %s2327_s23, 32 }
 0xc3f   :  { %v2302_v33 = vsel %vm2300_vm9, %v2301_v32, %v2299_v29  ;;  %p3651_p0 = scmp.ne.s32.totalorder %s2327_s23, %s3650_s30  ;;  %p3655_p1 = scmp.lt.s32.totalorder %s2327_s23, %s2327_s23 }
 0xc40   :  { %p3656_p2 = scmp.lt.s32.totalorder %s3654_s4, %s3650_s30 }
 0xc42   :  { %p3657_p3 = por %p3656_p2, %p3655_p1 }
 0xc44   :  { %p3658_p4 = pnand %p3657_p3, %p3651_p0 }
 0xc58   :  { %s2855_s1 = spop %2854 }
 0xc59   :  { %v2304_v18 = vstv %s2855_s1 }
 0xc5a   :  { %v2305_v34 = vsel %vm2303_vm13, %v2304_v18, %v2302_v33 }
 0xc5c   :  { %s2857_s11 = spop %2856 }
 0xc5d   :  { %v2307_v36 = vstv %s2857_s11 }
 0xc5e   :  { %v2308_v25 = vsel %vm2306_vm6, %v2307_v36, %v2305_v34 }
 0xc5f   :  { %2309 = vst [vmem:[#allocation45] sm:$0x1] %v2308_v25 }
 0xc60   :  { %3661 = shalt.err (!%p3658_p4)
}
 0xc61   :  { %s4727_s24 = sld [smem:[#allocation78_spill]] }
 0xc67   :  { %s3662_s16 = scalar_lea.hbm %s4727_s24, 16 }
 0xc68   :  { %p3663_p5 = scmp.ne.s32.totalorder %s4727_s24, %s3662_s16  ;;  %p3666_p6 = scmp.lt.u32.totalorder %s3662_s16, %s4727_s24 }
 0xc6a   :  { %p3668_p7 = pnand %p3666_p6, %p3663_p5 }
 0xc6c   :  { %3671 = shalt.err (!%p3668_p7)
}
 0xc6d   :  { %2329 = dma.vmem_to_hbm [thread:$0]  %s2327_s23, 16, %s4727_s24, [#allocation46]  }
 0xc6e   :  { %3700 = dma.done.wait [#allocation4], 256  }
 0xc6f   :  { %3701 = vsyncadd [#allocation4], 4294967040 }
 0xc70   :  { %3702 = dma.done.wait [#allocation46], 16  }
 0xc71   :  { %3703 = vsyncadd [#allocation46], 4294967280 }
 0xc72   :  { %2336 = vsyncpa [#allocation3], 1 }
 0xc73   :  { %2337 = vsyncpa [#allocation6], 1 }
 0xc74   :  { %2338 = vsyncpa [#allocation9], 1 }
 0xc75   :  { %2339 = vsyncpa [#allocation12], 1 }
 0xc76   :  { %2340 = vsyncpa [#allocation15], 1 }
 0xc77   :  { %2341 = vsyncpa [#allocation18], 1 }
 0xc78   :  { %2342 = vsyncpa [#allocation21], 1 }
 0xc79   :  { %2343 = vsyncpa [#allocation24], 1 }
 0xc7a   :  { %2344 = vsyncpa [#allocation27], 1 }
 0xc7b   :  { %2345 = vsyncpa [#allocation30], 1 }
 0xc7c   :  { %2346 = vsyncpa [#allocation33], 1 }
 0xc7d   :  { %2347 = vsyncpa [#allocation36], 1 }
 0xc7e   :  { %2348 = vsyncpa [#allocation39], 1 }
 0xc7f   :  { %2349 = vsyncpa [#allocation42], 1 }
 0xc80   :  { %2350 = vsyncpa [#allocation4], 1 }
 0xc81   :  { %2351 = vsyncpa [#allocation46], 1 }

</bundles_post_ra>
